<compile_context>
chip_gen: v7x
topology: tpu7x:2x2x1
jax: 0.10.0
libtpu: 0.0.40
codegen_flags: <defaults>
</compile_context>

<pallas_src>
import jax
import jax.numpy as jnp
from jax import lax
from jax.experimental import pallas as pl
from jax.experimental.pallas import tpu as pltpu


# -------------------------- static slab layouts --------------------------

_SUBLANE = 8  # pad every packed entry to a multiple of 8 rows -> aligned static slices


def _make_layout(entries):
    """entries: [(name, rows)] -> ({name: (start, stop)}, total_padded_rows)."""
    offs, r = {}, 0
    for name, rows in entries:
        offs[name] = (r, r + rows)
        r += rows + ((-rows) % _SUBLANE)
    return offs, r


def make_layouts(E):
    # Gate-path slab: everything with last dim 4E (encoder + decoder LSTM weights/biases).
    w_entries = [
        ("e_wih0", 1), ("e_b0", 1), ("e_whh0", E),
        ("e_wih1", E), ("e_whh1", E), ("e_b1", 1),
        ("e_wih2", E), ("e_whh2", E), ("e_b2", 1),
        ("d_wx0", 1), ("d_b0", 1), ("d_wih0", E), ("d_whh0", E),
        ("d_wih1", E), ("d_whh1", E), ("d_b1", 1),
        ("d_wih2", E), ("d_whh2", E), ("d_b2", 1),
    ]
    # Attention + output-head slab: everything with last dim E.
    a_entries = [
        ("a_wh", E), ("a_we", E), ("a_b", 1), ("a_v", 1),
        ("o_wh", 1), ("o_ww", 1), ("o_b", 1),
    ]
    w_offs, w_rows = _make_layout(w_entries)
    a_offs, a_rows = _make_layout(a_entries)
    return (w_entries, w_offs, w_rows), (a_entries, a_offs, a_rows)


def _pack(params, entries, total_rows, ncols):
    parts = []
    for name, rows in entries:
        a = jnp.asarray(params[name], jnp.float32)
        assert a.shape[0] == rows
        if a.shape[1] < ncols:  # e.g. the (1,1) output bias -> padded into a full row
            a = jnp.pad(a, ((0, 0), (0, ncols - a.shape[1])))
        parts.append(a)
        pad = (-rows) % _SUBLANE
        if pad:
            parts.append(jnp.zeros((pad, ncols), jnp.float32))
    slab = jnp.concatenate(parts, axis=0)
    assert slab.shape == (total_rows, ncols)
    return slab


def pack_params(params, E):
    (w_e, _, w_rows), (a_e, _, a_rows) = make_layouts(E)
    return _pack(params, w_e, w_rows, 4 * E), _pack(params, a_e, a_rows, E)


# -------------------------- kernel helpers --------------------------

def _mm(a, b):
    """Single-pass bf16 MXU matmul with f32 accumulation (explicit precision choice)."""
    return jnp.dot(a.astype(jnp.bfloat16), b.astype(jnp.bfloat16),
                   preferred_element_type=jnp.float32)


def _lstm_gates(gates, c_prev, E):
    """PyTorch LSTMCell update. gates: (1,4E) pre-activation, c_prev: (1,E).

    Sigmoid/tanh applied once to the full gate vector (2 EUP passes), then the
    i/f/g/o quarters are taken as static lane slices.
    """
    sg = jax.nn.sigmoid(gates)
    tg = jnp.tanh(gates)
    i, f = sg[:, 0:E], sg[:, E:2 * E]
    g, o = tg[:, 2 * E:3 * E], sg[:, 3 * E:4 * E]
    c = f * c_prev + i * g
    return o * jnp.tanh(c), c


# -------------------------- the Pallas kernel --------------------------

def make_kernel(S, E, T, w_offs, a_offs):
    def kernel(x_ref, prev_ref, w_ref, a_ref, out_ref):
        # Aligned static views into the packed slabs. These reads stay INSIDE the
        # unrolled loops on purpose (per-iteration vld hides under MXU latency and
        # avoids pinning ~48 vregs of hoisted weights).
        def W(name):
            s, e = w_offs[name]
            return w_ref[s:e, :]

        def A(name):
            s, e = a_offs[name]
            return a_ref[s:e, :]

        zero = jnp.zeros((1, E), jnp.float32)
        h0 = c0 = h1 = c1 = h2 = c2 = zero

        # Encoder layer-0 input contribution for all steps at once (one VPU broadcast).
        pre0 = x_ref[...] * W("e_wih0") + W("e_b0")                     # (S, 4E)

        # ---------------- Encoder: 3-layer LSTM, zero init, fully unrolled ----------------
        enc_rows, proj_rows = [], []
        for t in range(S):
            g0 = pre0[t:t + 1, :] + _mm(h0, W("e_whh0"))
            h0, c0 = _lstm_gates(g0, c0, E)
            g1 = _mm(h0, W("e_wih1")) + _mm(h1, W("e_whh1")) + W("e_b1")
            h1, c1 = _lstm_gates(g1, c1, E)
            g2 = _mm(h1, W("e_wih2")) + _mm(h2, W("e_whh2")) + W("e_b2")
            h2, c2 = _lstm_gates(g2, c2, E)
            enc_rows.append(h2)
            # Attention encoder projection folded into the encoder loop (overlaps recurrence).
            proj_rows.append(_mm(h2, A("a_we")) + A("a_b"))

        enc = jnp.concatenate(enc_rows, axis=0)                         # (S, E), registers
        enc_proj = jnp.concatenate(proj_rows, axis=0)                   # (S, E)
        enc_bf = enc.astype(jnp.bfloat16)                               # loop-invariant cast
        o_b = A("o_b")[:, 0:1]                                          # (1, 1) scalar bias

        # ---------------- Decoder: T steps, fully unrolled ----------------
        prev = prev_ref[...]                                            # (1, 1)
        ys = []
        for _ in range(T):
            # Attention on the *incoming* top-layer hidden h2.
            energy = jnp.tanh(_mm(h2, A("a_wh")) + enc_proj)            # (S, E)
            scores = lax.dot_general(A("a_v"), energy,                  # (1, S) NT matmul
                                     (((1,), (1,)), ((), ())),
                                     preferred_element_type=jnp.float32)
            scores = scores - jnp.max(scores, axis=1, keepdims=True)
            p = jnp.exp(scores)
            attn = p * pl.reciprocal(jnp.sum(p, axis=1, keepdims=True), approx=True)
            weighted = jnp.dot(attn.astype(jnp.bfloat16), enc_bf,
                               preferred_element_type=jnp.float32)      # (1, E)

            # Decoder LSTM step, input = [prev_scalar | weighted]; un-fused W_ih / W_hh
            # so the recurrent products can issue before attention resolves.
            g0 = (prev * W("d_wx0") + _mm(weighted, W("d_wih0"))
                  + _mm(h0, W("d_whh0")) + W("d_b0"))
            h0, c0 = _lstm_gates(g0, c0, E)
            g1 = _mm(h0, W("d_wih1")) + _mm(h1, W("d_whh1")) + W("d_b1")
            h1, c1 = _lstm_gates(g1, c1, E)
            g2 = _mm(h1, W("d_wih2")) + _mm(h2, W("d_whh2")) + W("d_b2")
            h2, c2 = _lstm_gates(g2, c2, E)

            # Output head: Linear(concat(h2, weighted)) -> scalar, computed concat-free
            # as a VPU multiply + lane reduction (XLU slot; off the MXU path).
            y = jnp.sum(h2 * A("o_wh") + weighted * A("o_ww"),
                        axis=1, keepdims=True) + o_b                    # (1, 1)
            ys.append(y)
            prev = y

        # Single store of all T scalars as one (1, T) row.
        out_ref[...] = jnp.concatenate(ys, axis=1)

    return kernel


# -------------------------- wrapper --------------------------

def build_forward(*, seq_len, emb_dim, output_length):
    (_, w_offs, _), (_, a_offs, _) = make_layouts(emb_dim)
    kernel = make_kernel(seq_len, emb_dim, output_length, w_offs, a_offs)
    vmem = pl.BlockSpec(memory_space=pltpu.MemorySpace.VMEM)
    call = pl.pallas_call(
        kernel,
        out_shape=jax.ShapeDtypeStruct((1, output_length), jnp.float32),
        in_specs=[vmem] * 4,
        out_specs=vmem,
    )

    @jax.jit
    def forward(x, prev_y, w_slab, a_slab):
        out = call(x, prev_y, w_slab, a_slab)
        return out.reshape(output_length, 1)

    return forward


# -------------------------- parameter init (deterministic, synthetic) --------------------------

def init_params(key, E):
    shapes = {
        # encoder LSTM (layer-0 input is the scalar feature; layers 1/2 un-fused W_ih/W_hh)
        "e_wih0": (1, 4 * E), "e_whh0": (E, 4 * E), "e_b0": (1, 4 * E),
        "e_wih1": (E, 4 * E), "e_whh1": (E, 4 * E), "e_b1": (1, 4 * E),
        "e_wih2": (E, 4 * E), "e_whh2": (E, 4 * E), "e_b2": (1, 4 * E),
        # attention: Linear(2E -> E) split into hidden/encoder halves; v: Linear(E -> 1)
        "a_wh": (E, E), "a_we": (E, E), "a_b": (1, E), "a_v": (1, E),
        # decoder LSTM; layer-0 input (E+1) split into scalar column + weighted part
        "d_wx0": (1, 4 * E), "d_wih0": (E, 4 * E), "d_whh0": (E, 4 * E), "d_b0": (1, 4 * E),
        "d_wih1": (E, 4 * E), "d_whh1": (E, 4 * E), "d_b1": (1, 4 * E),
        "d_wih2": (E, 4 * E), "d_whh2": (E, 4 * E), "d_b2": (1, 4 * E),
        # output Linear(2E -> 1) on concat(top_output, weighted), split into two rows
        "o_wh": (1, E), "o_ww": (1, E), "o_b": (1, 1),
    }
    params = {}
    for name, shp in sorted(shapes.items()):
        key, sub = jax.random.split(key)
        params[name] = (0.1 * jax.random.normal(sub, shp)).astype(jnp.float32)
    return params


# -------------------------- pure-JAX reference --------------------------

def reference_forward(p, x, prev_y, S, E, T):
    def cell(gates, c):
        i = jax.nn.sigmoid(gates[:, :E]); f = jax.nn.sigmoid(gates[:, E:2 * E])
        g = jnp.tanh(gates[:, 2 * E:3 * E]); o = jax.nn.sigmoid(gates[:, 3 * E:])
        c2 = f * c + i * g
        return o * jnp.tanh(c2), c2

    zero = jnp.zeros((1, E), jnp.float32)
    h = [zero, zero, zero]
    c = [zero, zero, zero]
    enc_out = []
    for t in range(S):
        xt = x[t:t + 1, :]
        g0 = xt * p["e_wih0"] + h[0] @ p["e_whh0"] + p["e_b0"]
        h[0], c[0] = cell(g0, c[0])
        g1 = h[0] @ p["e_wih1"] + h[1] @ p["e_whh1"] + p["e_b1"]
        h[1], c[1] = cell(g1, c[1])
        g2 = h[1] @ p["e_wih2"] + h[2] @ p["e_whh2"] + p["e_b2"]
        h[2], c[2] = cell(g2, c[2])
        enc_out.append(h[2])
    enc = jnp.concatenate(enc_out, axis=0)

    prev = prev_y.reshape(1, 1)
    outs = []
    for _ in range(T):
        energy = jnp.tanh(h[2] @ p["a_wh"] + enc @ p["a_we"] + p["a_b"])    # (S, E)
        scores = energy @ p["a_v"].T                                        # (S, 1)
        a = jax.nn.softmax(scores, axis=0)
        weighted = jnp.sum(a * enc, axis=0, keepdims=True)                  # (1, E)
        g0 = prev * p["d_wx0"] + weighted @ p["d_wih0"] + h[0] @ p["d_whh0"] + p["d_b0"]
        h[0], c[0] = cell(g0, c[0])
        g1 = h[0] @ p["d_wih1"] + h[1] @ p["d_whh1"] + p["d_b1"]
        h[1], c[1] = cell(g1, c[1])
        g2 = h[1] @ p["d_wih2"] + h[2] @ p["d_whh2"] + p["d_b2"]
        h[2], c[2] = cell(g2, c[2])
        y = h[2] @ p["o_wh"].T + weighted @ p["o_ww"].T + p["o_b"]
        outs.append(y)
        prev = y
    return jnp.concatenate(outs, axis=0)


# -------------------------- main --------------------------

if __name__ == "__main__":
    SEQ_LEN = 8          # seq_len
    EMB_DIM = 32         # embedding_dim == encoder/decoder hidden == attention dim
    OUT_LEN = 4          # output_length (small demo value)

    key = jax.random.PRNGKey(0)
    k_params, k_x, k_y = jax.random.split(key, 3)

    params = init_params(k_params, EMB_DIM)
    x = jax.random.normal(k_x, (SEQ_LEN, 1), dtype=jnp.float32)       # time series input
    prev_y = jax.random.normal(k_y, (1, 1), dtype=jnp.float32)        # previous target scalar

    # Host-side operand packing (done once) + jitted forward.
    w_slab, a_slab = pack_params(params, EMB_DIM)
    forward = build_forward(seq_len=SEQ_LEN, emb_dim=EMB_DIM, output_length=OUT_LEN)

    out = jax.block_until_ready(forward(x, prev_y, w_slab, a_slab))
    ref = jax.block_until_ready(
        reference_forward(params, x, prev_y, SEQ_LEN, EMB_DIM, OUT_LEN))

    assert out.shape == (OUT_LEN, 1)
    # Tolerance covers explicit bf16 MXU operands + approx EUP reciprocal in the softmax.
    assert jnp.allclose(out, ref, atol=1e-2, rtol=1e-2), (out, ref)

    print("KERNEL_OK")
</pallas_src>

<mosaic_0001>
module attributes {stable_mosaic.version = 11 : i64} {
  func.func @kernel(%arg0: memref<8x1xf32, #tpu.memory_space<vmem>>, %arg1: memref<1x1xf32, #tpu.memory_space<vmem>>, %arg2: memref<416x128xf32, #tpu.memory_space<vmem>>, %arg3: memref<104x32xf32, #tpu.memory_space<vmem>>, %arg4: memref<1x4xf32, #tpu.memory_space<vmem>>) attributes {dimension_semantics = [], scalar_prefetch = 0 : i64, scratch_operands = 0 : i64, tpu.core_type = #tpu.core_type<tc>} {
    %cst = arith.constant 0.000000e+00 : f32
    %0 = vector.broadcast %cst : f32 to vector<1x32xf32>
    %c0 = arith.constant 0 : index
    %c0_0 = arith.constant 0 : index
    %1 = vector.load %arg0[%c0, %c0_0] : memref<8x1xf32, #tpu.memory_space<vmem>>, vector<8x1xf32>
    %c0_1 = arith.constant 0 : index
    %c0_2 = arith.constant 0 : index
    %2 = vector.load %arg2[%c0_1, %c0_2] : memref<416x128xf32, #tpu.memory_space<vmem>>, vector<1x128xf32>
    %3 = vector.broadcast %1 : vector<8x1xf32> to vector<8x128xf32>
    %4 = vector.broadcast %2 : vector<1x128xf32> to vector<8x128xf32>
    %5 = arith.mulf %3, %4 : vector<8x128xf32>
    %c8 = arith.constant 8 : index
    %c0_3 = arith.constant 0 : index
    %6 = vector.load %arg2[%c8, %c0_3] : memref<416x128xf32, #tpu.memory_space<vmem>>, vector<1x128xf32>
    %7 = vector.broadcast %6 : vector<1x128xf32> to vector<8x128xf32>
    %8 = arith.addf %5, %7 : vector<8x128xf32>
    %9 = vector.extract_strided_slice %8 {offsets = [0, 0], sizes = [1, 128], strides = [1, 1]} : vector<8x128xf32> to vector<1x128xf32>
    %c16 = arith.constant 16 : index
    %c0_4 = arith.constant 0 : index
    %10 = vector.load %arg2[%c16, %c0_4] : memref<416x128xf32, #tpu.memory_space<vmem>>, vector<32x128xf32>
    %11 = arith.truncf %0 : vector<1x32xf32> to vector<1x32xbf16>
    %12 = arith.truncf %10 : vector<32x128xf32> to vector<32x128xbf16>
    %cst_5 = arith.constant dense<0.000000e+00> : vector<1x128xf32>
    %13 = tpu.matmul %11, %12, %cst_5 {dimension_numbers = #tpu.dot_dimension_numbers<[1], [0], [0], [1], [0, 0, 1, 1], [], []>} : vector<1x32xbf16>, vector<32x128xbf16>, vector<1x128xf32> -> vector<1x128xf32>
    %14 = arith.addf %9, %13 : vector<1x128xf32>
    %15 = arith.negf %14 : vector<1x128xf32>
    %16 = math.exp %15 : vector<1x128xf32>
    %cst_6 = arith.constant 1.000000e+00 : f32
    %17 = vector.broadcast %cst_6 : f32 to vector<1x128xf32>
    %18 = arith.addf %17, %16 : vector<1x128xf32>
    %19 = arith.divf %17, %18 : vector<1x128xf32>
    %20 = math.tanh %14 : vector<1x128xf32>
    %21 = vector.extract_strided_slice %19 {offsets = [0, 0], sizes = [1, 32], strides = [1, 1]} : vector<1x128xf32> to vector<1x32xf32>
    %22 = vector.extract_strided_slice %19 {offsets = [0, 32], sizes = [1, 32], strides = [1, 1]} : vector<1x128xf32> to vector<1x32xf32>
    %23 = vector.extract_strided_slice %20 {offsets = [0, 64], sizes = [1, 32], strides = [1, 1]} : vector<1x128xf32> to vector<1x32xf32>
    %24 = vector.extract_strided_slice %19 {offsets = [0, 96], sizes = [1, 32], strides = [1, 1]} : vector<1x128xf32> to vector<1x32xf32>
    %25 = arith.mulf %22, %0 : vector<1x32xf32>
    %26 = arith.mulf %21, %23 : vector<1x32xf32>
    %27 = arith.addf %25, %26 : vector<1x32xf32>
    %28 = math.tanh %27 : vector<1x32xf32>
    %29 = arith.mulf %24, %28 : vector<1x32xf32>
    %c48 = arith.constant 48 : index
    %c0_7 = arith.constant 0 : index
    %30 = vector.load %arg2[%c48, %c0_7] : memref<416x128xf32, #tpu.memory_space<vmem>>, vector<32x128xf32>
    %31 = arith.truncf %29 : vector<1x32xf32> to vector<1x32xbf16>
    %32 = arith.truncf %30 : vector<32x128xf32> to vector<32x128xbf16>
    %cst_8 = arith.constant dense<0.000000e+00> : vector<1x128xf32>
    %33 = tpu.matmul %31, %32, %cst_8 {dimension_numbers = #tpu.dot_dimension_numbers<[1], [0], [0], [1], [0, 0, 1, 1], [], []>} : vector<1x32xbf16>, vector<32x128xbf16>, vector<1x128xf32> -> vector<1x128xf32>
    %c80 = arith.constant 80 : index
    %c0_9 = arith.constant 0 : index
    %34 = vector.load %arg2[%c80, %c0_9] : memref<416x128xf32, #tpu.memory_space<vmem>>, vector<32x128xf32>
    %35 = arith.truncf %0 : vector<1x32xf32> to vector<1x32xbf16>
    %36 = arith.truncf %34 : vector<32x128xf32> to vector<32x128xbf16>
    %cst_10 = arith.constant dense<0.000000e+00> : vector<1x128xf32>
    %37 = tpu.matmul %35, %36, %cst_10 {dimension_numbers = #tpu.dot_dimension_numbers<[1], [0], [0], [1], [0, 0, 1, 1], [], []>} : vector<1x32xbf16>, vector<32x128xbf16>, vector<1x128xf32> -> vector<1x128xf32>
    %38 = arith.addf %33, %37 : vector<1x128xf32>
    %c112 = arith.constant 112 : index
    %c0_11 = arith.constant 0 : index
    %39 = vector.load %arg2[%c112, %c0_11] : memref<416x128xf32, #tpu.memory_space<vmem>>, vector<1x128xf32>
    %40 = arith.addf %38, %39 : vector<1x128xf32>
    %41 = arith.negf %40 : vector<1x128xf32>
    %42 = math.exp %41 : vector<1x128xf32>
    %cst_12 = arith.constant 1.000000e+00 : f32
    %43 = vector.broadcast %cst_12 : f32 to vector<1x128xf32>
    %44 = arith.addf %43, %42 : vector<1x128xf32>
    %45 = arith.divf %43, %44 : vector<1x128xf32>
    %46 = math.tanh %40 : vector<1x128xf32>
    %47 = vector.extract_strided_slice %45 {offsets = [0, 0], sizes = [1, 32], strides = [1, 1]} : vector<1x128xf32> to vector<1x32xf32>
    %48 = vector.extract_strided_slice %45 {offsets = [0, 32], sizes = [1, 32], strides = [1, 1]} : vector<1x128xf32> to vector<1x32xf32>
    %49 = vector.extract_strided_slice %46 {offsets = [0, 64], sizes = [1, 32], strides = [1, 1]} : vector<1x128xf32> to vector<1x32xf32>
    %50 = vector.extract_strided_slice %45 {offsets = [0, 96], sizes = [1, 32], strides = [1, 1]} : vector<1x128xf32> to vector<1x32xf32>
    %51 = arith.mulf %48, %0 : vector<1x32xf32>
    %52 = arith.mulf %47, %49 : vector<1x32xf32>
    %53 = arith.addf %51, %52 : vector<1x32xf32>
    %54 = math.tanh %53 : vector<1x32xf32>
    %55 = arith.mulf %50, %54 : vector<1x32xf32>
    %c120 = arith.constant 120 : index
    %c0_13 = arith.constant 0 : index
    %56 = vector.load %arg2[%c120, %c0_13] : memref<416x128xf32, #tpu.memory_space<vmem>>, vector<32x128xf32>
    %57 = arith.truncf %55 : vector<1x32xf32> to vector<1x32xbf16>
    %58 = arith.truncf %56 : vector<32x128xf32> to vector<32x128xbf16>
    %cst_14 = arith.constant dense<0.000000e+00> : vector<1x128xf32>
    %59 = tpu.matmul %57, %58, %cst_14 {dimension_numbers = #tpu.dot_dimension_numbers<[1], [0], [0], [1], [0, 0, 1, 1], [], []>} : vector<1x32xbf16>, vector<32x128xbf16>, vector<1x128xf32> -> vector<1x128xf32>
    %c152 = arith.constant 152 : index
    %c0_15 = arith.constant 0 : index
    %60 = vector.load %arg2[%c152, %c0_15] : memref<416x128xf32, #tpu.memory_space<vmem>>, vector<32x128xf32>
    %61 = arith.truncf %0 : vector<1x32xf32> to vector<1x32xbf16>
    %62 = arith.truncf %60 : vector<32x128xf32> to vector<32x128xbf16>
    %cst_16 = arith.constant dense<0.000000e+00> : vector<1x128xf32>
    %63 = tpu.matmul %61, %62, %cst_16 {dimension_numbers = #tpu.dot_dimension_numbers<[1], [0], [0], [1], [0, 0, 1, 1], [], []>} : vector<1x32xbf16>, vector<32x128xbf16>, vector<1x128xf32> -> vector<1x128xf32>
    %64 = arith.addf %59, %63 : vector<1x128xf32>
    %c184 = arith.constant 184 : index
    %c0_17 = arith.constant 0 : index
    %65 = vector.load %arg2[%c184, %c0_17] : memref<416x128xf32, #tpu.memory_space<vmem>>, vector<1x128xf32>
    %66 = arith.addf %64, %65 : vector<1x128xf32>
    %67 = arith.negf %66 : vector<1x128xf32>
    %68 = math.exp %67 : vector<1x128xf32>
    %cst_18 = arith.constant 1.000000e+00 : f32
    %69 = vector.broadcast %cst_18 : f32 to vector<1x128xf32>
    %70 = arith.addf %69, %68 : vector<1x128xf32>
    %71 = arith.divf %69, %70 : vector<1x128xf32>
    %72 = math.tanh %66 : vector<1x128xf32>
    %73 = vector.extract_strided_slice %71 {offsets = [0, 0], sizes = [1, 32], strides = [1, 1]} : vector<1x128xf32> to vector<1x32xf32>
    %74 = vector.extract_strided_slice %71 {offsets = [0, 32], sizes = [1, 32], strides = [1, 1]} : vector<1x128xf32> to vector<1x32xf32>
    %75 = vector.extract_strided_slice %72 {offsets = [0, 64], sizes = [1, 32], strides = [1, 1]} : vector<1x128xf32> to vector<1x32xf32>
    %76 = vector.extract_strided_slice %71 {offsets = [0, 96], sizes = [1, 32], strides = [1, 1]} : vector<1x128xf32> to vector<1x32xf32>
    %77 = arith.mulf %74, %0 : vector<1x32xf32>
    %78 = arith.mulf %73, %75 : vector<1x32xf32>
    %79 = arith.addf %77, %78 : vector<1x32xf32>
    %80 = math.tanh %79 : vector<1x32xf32>
    %81 = arith.mulf %76, %80 : vector<1x32xf32>
    %c32 = arith.constant 32 : index
    %c0_19 = arith.constant 0 : index
    %82 = vector.load %arg3[%c32, %c0_19] : memref<104x32xf32, #tpu.memory_space<vmem>>, vector<32x32xf32>
    %83 = arith.truncf %81 : vector<1x32xf32> to vector<1x32xbf16>
    %84 = arith.truncf %82 : vector<32x32xf32> to vector<32x32xbf16>
    %cst_20 = arith.constant dense<0.000000e+00> : vector<1x32xf32>
    %85 = tpu.matmul %83, %84, %cst_20 {dimension_numbers = #tpu.dot_dimension_numbers<[1], [0], [0], [1], [0, 0, 1, 1], [], []>} : vector<1x32xbf16>, vector<32x32xbf16>, vector<1x32xf32> -> vector<1x32xf32>
    %c64 = arith.constant 64 : index
    %c0_21 = arith.constant 0 : index
    %86 = vector.load %arg3[%c64, %c0_21] : memref<104x32xf32, #tpu.memory_space<vmem>>, vector<1x32xf32>
    %87 = arith.addf %85, %86 : vector<1x32xf32>
    %88 = vector.extract_strided_slice %8 {offsets = [1, 0], sizes = [1, 128], strides = [1, 1]} : vector<8x128xf32> to vector<1x128xf32>
    %c16_22 = arith.constant 16 : index
    %c0_23 = arith.constant 0 : index
    %89 = vector.load %arg2[%c16_22, %c0_23] : memref<416x128xf32, #tpu.memory_space<vmem>>, vector<32x128xf32>
    %90 = arith.truncf %29 : vector<1x32xf32> to vector<1x32xbf16>
    %91 = arith.truncf %89 : vector<32x128xf32> to vector<32x128xbf16>
    %cst_24 = arith.constant dense<0.000000e+00> : vector<1x128xf32>
    %92 = tpu.matmul %90, %91, %cst_24 {dimension_numbers = #tpu.dot_dimension_numbers<[1], [0], [0], [1], [0, 0, 1, 1], [], []>} : vector<1x32xbf16>, vector<32x128xbf16>, vector<1x128xf32> -> vector<1x128xf32>
    %93 = arith.addf %88, %92 : vector<1x128xf32>
    %94 = arith.negf %93 : vector<1x128xf32>
    %95 = math.exp %94 : vector<1x128xf32>
    %cst_25 = arith.constant 1.000000e+00 : f32
    %96 = vector.broadcast %cst_25 : f32 to vector<1x128xf32>
    %97 = arith.addf %96, %95 : vector<1x128xf32>
    %98 = arith.divf %96, %97 : vector<1x128xf32>
    %99 = math.tanh %93 : vector<1x128xf32>
    %100 = vector.extract_strided_slice %98 {offsets = [0, 0], sizes = [1, 32], strides = [1, 1]} : vector<1x128xf32> to vector<1x32xf32>
    %101 = vector.extract_strided_slice %98 {offsets = [0, 32], sizes = [1, 32], strides = [1, 1]} : vector<1x128xf32> to vector<1x32xf32>
    %102 = vector.extract_strided_slice %99 {offsets = [0, 64], sizes = [1, 32], strides = [1, 1]} : vector<1x128xf32> to vector<1x32xf32>
    %103 = vector.extract_strided_slice %98 {offsets = [0, 96], sizes = [1, 32], strides = [1, 1]} : vector<1x128xf32> to vector<1x32xf32>
    %104 = arith.mulf %101, %27 : vector<1x32xf32>
    %105 = arith.mulf %100, %102 : vector<1x32xf32>
    %106 = arith.addf %104, %105 : vector<1x32xf32>
    %107 = math.tanh %106 : vector<1x32xf32>
    %108 = arith.mulf %103, %107 : vector<1x32xf32>
    %c48_26 = arith.constant 48 : index
    %c0_27 = arith.constant 0 : index
    %109 = vector.load %arg2[%c48_26, %c0_27] : memref<416x128xf32, #tpu.memory_space<vmem>>, vector<32x128xf32>
    %110 = arith.truncf %108 : vector<1x32xf32> to vector<1x32xbf16>
    %111 = arith.truncf %109 : vector<32x128xf32> to vector<32x128xbf16>
    %cst_28 = arith.constant dense<0.000000e+00> : vector<1x128xf32>
    %112 = tpu.matmul %110, %111, %cst_28 {dimension_numbers = #tpu.dot_dimension_numbers<[1], [0], [0], [1], [0, 0, 1, 1], [], []>} : vector<1x32xbf16>, vector<32x128xbf16>, vector<1x128xf32> -> vector<1x128xf32>
    %c80_29 = arith.constant 80 : index
    %c0_30 = arith.constant 0 : index
    %113 = vector.load %arg2[%c80_29, %c0_30] : memref<416x128xf32, #tpu.memory_space<vmem>>, vector<32x128xf32>
    %114 = arith.truncf %55 : vector<1x32xf32> to vector<1x32xbf16>
    %115 = arith.truncf %113 : vector<32x128xf32> to vector<32x128xbf16>
    %cst_31 = arith.constant dense<0.000000e+00> : vector<1x128xf32>
    %116 = tpu.matmul %114, %115, %cst_31 {dimension_numbers = #tpu.dot_dimension_numbers<[1], [0], [0], [1], [0, 0, 1, 1], [], []>} : vector<1x32xbf16>, vector<32x128xbf16>, vector<1x128xf32> -> vector<1x128xf32>
    %117 = arith.addf %112, %116 : vector<1x128xf32>
    %c112_32 = arith.constant 112 : index
    %c0_33 = arith.constant 0 : index
    %118 = vector.load %arg2[%c112_32, %c0_33] : memref<416x128xf32, #tpu.memory_space<vmem>>, vector<1x128xf32>
    %119 = arith.addf %117, %118 : vector<1x128xf32>
    %120 = arith.negf %119 : vector<1x128xf32>
    %121 = math.exp %120 : vector<1x128xf32>
    %cst_34 = arith.constant 1.000000e+00 : f32
    %122 = vector.broadcast %cst_34 : f32 to vector<1x128xf32>
    %123 = arith.addf %122, %121 : vector<1x128xf32>
    %124 = arith.divf %122, %123 : vector<1x128xf32>
    %125 = math.tanh %119 : vector<1x128xf32>
    %126 = vector.extract_strided_slice %124 {offsets = [0, 0], sizes = [1, 32], strides = [1, 1]} : vector<1x128xf32> to vector<1x32xf32>
    %127 = vector.extract_strided_slice %124 {offsets = [0, 32], sizes = [1, 32], strides = [1, 1]} : vector<1x128xf32> to vector<1x32xf32>
    %128 = vector.extract_strided_slice %125 {offsets = [0, 64], sizes = [1, 32], strides = [1, 1]} : vector<1x128xf32> to vector<1x32xf32>
    %129 = vector.extract_strided_slice %124 {offsets = [0, 96], sizes = [1, 32], strides = [1, 1]} : vector<1x128xf32> to vector<1x32xf32>
    %130 = arith.mulf %127, %53 : vector<1x32xf32>
    %131 = arith.mulf %126, %128 : vector<1x32xf32>
    %132 = arith.addf %130, %131 : vector<1x32xf32>
    %133 = math.tanh %132 : vector<1x32xf32>
    %134 = arith.mulf %129, %133 : vector<1x32xf32>
    %c120_35 = arith.constant 120 : index
    %c0_36 = arith.constant 0 : index
    %135 = vector.load %arg2[%c120_35, %c0_36] : memref<416x128xf32, #tpu.memory_space<vmem>>, vector<32x128xf32>
    %136 = arith.truncf %134 : vector<1x32xf32> to vector<1x32xbf16>
    %137 = arith.truncf %135 : vector<32x128xf32> to vector<32x128xbf16>
    %cst_37 = arith.constant dense<0.000000e+00> : vector<1x128xf32>
    %138 = tpu.matmul %136, %137, %cst_37 {dimension_numbers = #tpu.dot_dimension_numbers<[1], [0], [0], [1], [0, 0, 1, 1], [], []>} : vector<1x32xbf16>, vector<32x128xbf16>, vector<1x128xf32> -> vector<1x128xf32>
    %c152_38 = arith.constant 152 : index
    %c0_39 = arith.constant 0 : index
    %139 = vector.load %arg2[%c152_38, %c0_39] : memref<416x128xf32, #tpu.memory_space<vmem>>, vector<32x128xf32>
    %140 = arith.truncf %81 : vector<1x32xf32> to vector<1x32xbf16>
    %141 = arith.truncf %139 : vector<32x128xf32> to vector<32x128xbf16>
    %cst_40 = arith.constant dense<0.000000e+00> : vector<1x128xf32>
    %142 = tpu.matmul %140, %141, %cst_40 {dimension_numbers = #tpu.dot_dimension_numbers<[1], [0], [0], [1], [0, 0, 1, 1], [], []>} : vector<1x32xbf16>, vector<32x128xbf16>, vector<1x128xf32> -> vector<1x128xf32>
    %143 = arith.addf %138, %142 : vector<1x128xf32>
    %c184_41 = arith.constant 184 : index
    %c0_42 = arith.constant 0 : index
    %144 = vector.load %arg2[%c184_41, %c0_42] : memref<416x128xf32, #tpu.memory_space<vmem>>, vector<1x128xf32>
    %145 = arith.addf %143, %144 : vector<1x128xf32>
    %146 = arith.negf %145 : vector<1x128xf32>
    %147 = math.exp %146 : vector<1x128xf32>
    %cst_43 = arith.constant 1.000000e+00 : f32
    %148 = vector.broadcast %cst_43 : f32 to vector<1x128xf32>
    %149 = arith.addf %148, %147 : vector<1x128xf32>
    %150 = arith.divf %148, %149 : vector<1x128xf32>
    %151 = math.tanh %145 : vector<1x128xf32>
    %152 = vector.extract_strided_slice %150 {offsets = [0, 0], sizes = [1, 32], strides = [1, 1]} : vector<1x128xf32> to vector<1x32xf32>
    %153 = vector.extract_strided_slice %150 {offsets = [0, 32], sizes = [1, 32], strides = [1, 1]} : vector<1x128xf32> to vector<1x32xf32>
    %154 = vector.extract_strided_slice %151 {offsets = [0, 64], sizes = [1, 32], strides = [1, 1]} : vector<1x128xf32> to vector<1x32xf32>
    %155 = vector.extract_strided_slice %150 {offsets = [0, 96], sizes = [1, 32], strides = [1, 1]} : vector<1x128xf32> to vector<1x32xf32>
    %156 = arith.mulf %153, %79 : vector<1x32xf32>
    %157 = arith.mulf %152, %154 : vector<1x32xf32>
    %158 = arith.addf %156, %157 : vector<1x32xf32>
    %159 = math.tanh %158 : vector<1x32xf32>
    %160 = arith.mulf %155, %159 : vector<1x32xf32>
    %c32_44 = arith.constant 32 : index
    %c0_45 = arith.constant 0 : index
    %161 = vector.load %arg3[%c32_44, %c0_45] : memref<104x32xf32, #tpu.memory_space<vmem>>, vector<32x32xf32>
    %162 = arith.truncf %160 : vector<1x32xf32> to vector<1x32xbf16>
    %163 = arith.truncf %161 : vector<32x32xf32> to vector<32x32xbf16>
    %cst_46 = arith.constant dense<0.000000e+00> : vector<1x32xf32>
    %164 = tpu.matmul %162, %163, %cst_46 {dimension_numbers = #tpu.dot_dimension_numbers<[1], [0], [0], [1], [0, 0, 1, 1], [], []>} : vector<1x32xbf16>, vector<32x32xbf16>, vector<1x32xf32> -> vector<1x32xf32>
    %c64_47 = arith.constant 64 : index
    %c0_48 = arith.constant 0 : index
    %165 = vector.load %arg3[%c64_47, %c0_48] : memref<104x32xf32, #tpu.memory_space<vmem>>, vector<1x32xf32>
    %166 = arith.addf %164, %165 : vector<1x32xf32>
    %167 = vector.extract_strided_slice %8 {offsets = [2, 0], sizes = [1, 128], strides = [1, 1]} : vector<8x128xf32> to vector<1x128xf32>
    %c16_49 = arith.constant 16 : index
    %c0_50 = arith.constant 0 : index
    %168 = vector.load %arg2[%c16_49, %c0_50] : memref<416x128xf32, #tpu.memory_space<vmem>>, vector<32x128xf32>
    %169 = arith.truncf %108 : vector<1x32xf32> to vector<1x32xbf16>
    %170 = arith.truncf %168 : vector<32x128xf32> to vector<32x128xbf16>
    %cst_51 = arith.constant dense<0.000000e+00> : vector<1x128xf32>
    %171 = tpu.matmul %169, %170, %cst_51 {dimension_numbers = #tpu.dot_dimension_numbers<[1], [0], [0], [1], [0, 0, 1, 1], [], []>} : vector<1x32xbf16>, vector<32x128xbf16>, vector<1x128xf32> -> vector<1x128xf32>
    %172 = arith.addf %167, %171 : vector<1x128xf32>
    %173 = arith.negf %172 : vector<1x128xf32>
    %174 = math.exp %173 : vector<1x128xf32>
    %cst_52 = arith.constant 1.000000e+00 : f32
    %175 = vector.broadcast %cst_52 : f32 to vector<1x128xf32>
    %176 = arith.addf %175, %174 : vector<1x128xf32>
    %177 = arith.divf %175, %176 : vector<1x128xf32>
    %178 = math.tanh %172 : vector<1x128xf32>
    %179 = vector.extract_strided_slice %177 {offsets = [0, 0], sizes = [1, 32], strides = [1, 1]} : vector<1x128xf32> to vector<1x32xf32>
    %180 = vector.extract_strided_slice %177 {offsets = [0, 32], sizes = [1, 32], strides = [1, 1]} : vector<1x128xf32> to vector<1x32xf32>
    %181 = vector.extract_strided_slice %178 {offsets = [0, 64], sizes = [1, 32], strides = [1, 1]} : vector<1x128xf32> to vector<1x32xf32>
    %182 = vector.extract_strided_slice %177 {offsets = [0, 96], sizes = [1, 32], strides = [1, 1]} : vector<1x128xf32> to vector<1x32xf32>
    %183 = arith.mulf %180, %106 : vector<1x32xf32>
    %184 = arith.mulf %179, %181 : vector<1x32xf32>
    %185 = arith.addf %183, %184 : vector<1x32xf32>
    %186 = math.tanh %185 : vector<1x32xf32>
    %187 = arith.mulf %182, %186 : vector<1x32xf32>
    %c48_53 = arith.constant 48 : index
    %c0_54 = arith.constant 0 : index
    %188 = vector.load %arg2[%c48_53, %c0_54] : memref<416x128xf32, #tpu.memory_space<vmem>>, vector<32x128xf32>
    %189 = arith.truncf %187 : vector<1x32xf32> to vector<1x32xbf16>
    %190 = arith.truncf %188 : vector<32x128xf32> to vector<32x128xbf16>
    %cst_55 = arith.constant dense<0.000000e+00> : vector<1x128xf32>
    %191 = tpu.matmul %189, %190, %cst_55 {dimension_numbers = #tpu.dot_dimension_numbers<[1], [0], [0], [1], [0, 0, 1, 1], [], []>} : vector<1x32xbf16>, vector<32x128xbf16>, vector<1x128xf32> -> vector<1x128xf32>
    %c80_56 = arith.constant 80 : index
    %c0_57 = arith.constant 0 : index
    %192 = vector.load %arg2[%c80_56, %c0_57] : memref<416x128xf32, #tpu.memory_space<vmem>>, vector<32x128xf32>
    %193 = arith.truncf %134 : vector<1x32xf32> to vector<1x32xbf16>
    %194 = arith.truncf %192 : vector<32x128xf32> to vector<32x128xbf16>
    %cst_58 = arith.constant dense<0.000000e+00> : vector<1x128xf32>
    %195 = tpu.matmul %193, %194, %cst_58 {dimension_numbers = #tpu.dot_dimension_numbers<[1], [0], [0], [1], [0, 0, 1, 1], [], []>} : vector<1x32xbf16>, vector<32x128xbf16>, vector<1x128xf32> -> vector<1x128xf32>
    %196 = arith.addf %191, %195 : vector<1x128xf32>
    %c112_59 = arith.constant 112 : index
    %c0_60 = arith.constant 0 : index
    %197 = vector.load %arg2[%c112_59, %c0_60] : memref<416x128xf32, #tpu.memory_space<vmem>>, vector<1x128xf32>
    %198 = arith.addf %196, %197 : vector<1x128xf32>
    %199 = arith.negf %198 : vector<1x128xf32>
    %200 = math.exp %199 : vector<1x128xf32>
    %cst_61 = arith.constant 1.000000e+00 : f32
    %201 = vector.broadcast %cst_61 : f32 to vector<1x128xf32>
    %202 = arith.addf %201, %200 : vector<1x128xf32>
    %203 = arith.divf %201, %202 : vector<1x128xf32>
    %204 = math.tanh %198 : vector<1x128xf32>
    %205 = vector.extract_strided_slice %203 {offsets = [0, 0], sizes = [1, 32], strides = [1, 1]} : vector<1x128xf32> to vector<1x32xf32>
    %206 = vector.extract_strided_slice %203 {offsets = [0, 32], sizes = [1, 32], strides = [1, 1]} : vector<1x128xf32> to vector<1x32xf32>
    %207 = vector.extract_strided_slice %204 {offsets = [0, 64], sizes = [1, 32], strides = [1, 1]} : vector<1x128xf32> to vector<1x32xf32>
    %208 = vector.extract_strided_slice %203 {offsets = [0, 96], sizes = [1, 32], strides = [1, 1]} : vector<1x128xf32> to vector<1x32xf32>
    %209 = arith.mulf %206, %132 : vector<1x32xf32>
    %210 = arith.mulf %205, %207 : vector<1x32xf32>
    %211 = arith.addf %209, %210 : vector<1x32xf32>
    %212 = math.tanh %211 : vector<1x32xf32>
    %213 = arith.mulf %208, %212 : vector<1x32xf32>
    %c120_62 = arith.constant 120 : index
    %c0_63 = arith.constant 0 : index
    %214 = vector.load %arg2[%c120_62, %c0_63] : memref<416x128xf32, #tpu.memory_space<vmem>>, vector<32x128xf32>
    %215 = arith.truncf %213 : vector<1x32xf32> to vector<1x32xbf16>
    %216 = arith.truncf %214 : vector<32x128xf32> to vector<32x128xbf16>
    %cst_64 = arith.constant dense<0.000000e+00> : vector<1x128xf32>
    %217 = tpu.matmul %215, %216, %cst_64 {dimension_numbers = #tpu.dot_dimension_numbers<[1], [0], [0], [1], [0, 0, 1, 1], [], []>} : vector<1x32xbf16>, vector<32x128xbf16>, vector<1x128xf32> -> vector<1x128xf32>
    %c152_65 = arith.constant 152 : index
    %c0_66 = arith.constant 0 : index
    %218 = vector.load %arg2[%c152_65, %c0_66] : memref<416x128xf32, #tpu.memory_space<vmem>>, vector<32x128xf32>
    %219 = arith.truncf %160 : vector<1x32xf32> to vector<1x32xbf16>
    %220 = arith.truncf %218 : vector<32x128xf32> to vector<32x128xbf16>
    %cst_67 = arith.constant dense<0.000000e+00> : vector<1x128xf32>
    %221 = tpu.matmul %219, %220, %cst_67 {dimension_numbers = #tpu.dot_dimension_numbers<[1], [0], [0], [1], [0, 0, 1, 1], [], []>} : vector<1x32xbf16>, vector<32x128xbf16>, vector<1x128xf32> -> vector<1x128xf32>
    %222 = arith.addf %217, %221 : vector<1x128xf32>
    %c184_68 = arith.constant 184 : index
    %c0_69 = arith.constant 0 : index
    %223 = vector.load %arg2[%c184_68, %c0_69] : memref<416x128xf32, #tpu.memory_space<vmem>>, vector<1x128xf32>
    %224 = arith.addf %222, %223 : vector<1x128xf32>
    %225 = arith.negf %224 : vector<1x128xf32>
    %226 = math.exp %225 : vector<1x128xf32>
    %cst_70 = arith.constant 1.000000e+00 : f32
    %227 = vector.broadcast %cst_70 : f32 to vector<1x128xf32>
    %228 = arith.addf %227, %226 : vector<1x128xf32>
    %229 = arith.divf %227, %228 : vector<1x128xf32>
    %230 = math.tanh %224 : vector<1x128xf32>
    %231 = vector.extract_strided_slice %229 {offsets = [0, 0], sizes = [1, 32], strides = [1, 1]} : vector<1x128xf32> to vector<1x32xf32>
    %232 = vector.extract_strided_slice %229 {offsets = [0, 32], sizes = [1, 32], strides = [1, 1]} : vector<1x128xf32> to vector<1x32xf32>
    %233 = vector.extract_strided_slice %230 {offsets = [0, 64], sizes = [1, 32], strides = [1, 1]} : vector<1x128xf32> to vector<1x32xf32>
    %234 = vector.extract_strided_slice %229 {offsets = [0, 96], sizes = [1, 32], strides = [1, 1]} : vector<1x128xf32> to vector<1x32xf32>
    %235 = arith.mulf %232, %158 : vector<1x32xf32>
    %236 = arith.mulf %231, %233 : vector<1x32xf32>
    %237 = arith.addf %235, %236 : vector<1x32xf32>
    %238 = math.tanh %237 : vector<1x32xf32>
    %239 = arith.mulf %234, %238 : vector<1x32xf32>
    %c32_71 = arith.constant 32 : index
    %c0_72 = arith.constant 0 : index
    %240 = vector.load %arg3[%c32_71, %c0_72] : memref<104x32xf32, #tpu.memory_space<vmem>>, vector<32x32xf32>
    %241 = arith.truncf %239 : vector<1x32xf32> to vector<1x32xbf16>
    %242 = arith.truncf %240 : vector<32x32xf32> to vector<32x32xbf16>
    %cst_73 = arith.constant dense<0.000000e+00> : vector<1x32xf32>
    %243 = tpu.matmul %241, %242, %cst_73 {dimension_numbers = #tpu.dot_dimension_numbers<[1], [0], [0], [1], [0, 0, 1, 1], [], []>} : vector<1x32xbf16>, vector<32x32xbf16>, vector<1x32xf32> -> vector<1x32xf32>
    %c64_74 = arith.constant 64 : index
    %c0_75 = arith.constant 0 : index
    %244 = vector.load %arg3[%c64_74, %c0_75] : memref<104x32xf32, #tpu.memory_space<vmem>>, vector<1x32xf32>
    %245 = arith.addf %243, %244 : vector<1x32xf32>
    %246 = vector.extract_strided_slice %8 {offsets = [3, 0], sizes = [1, 128], strides = [1, 1]} : vector<8x128xf32> to vector<1x128xf32>
    %c16_76 = arith.constant 16 : index
    %c0_77 = arith.constant 0 : index
    %247 = vector.load %arg2[%c16_76, %c0_77] : memref<416x128xf32, #tpu.memory_space<vmem>>, vector<32x128xf32>
    %248 = arith.truncf %187 : vector<1x32xf32> to vector<1x32xbf16>
    %249 = arith.truncf %247 : vector<32x128xf32> to vector<32x128xbf16>
    %cst_78 = arith.constant dense<0.000000e+00> : vector<1x128xf32>
    %250 = tpu.matmul %248, %249, %cst_78 {dimension_numbers = #tpu.dot_dimension_numbers<[1], [0], [0], [1], [0, 0, 1, 1], [], []>} : vector<1x32xbf16>, vector<32x128xbf16>, vector<1x128xf32> -> vector<1x128xf32>
    %251 = arith.addf %246, %250 : vector<1x128xf32>
    %252 = arith.negf %251 : vector<1x128xf32>
    %253 = math.exp %252 : vector<1x128xf32>
    %cst_79 = arith.constant 1.000000e+00 : f32
    %254 = vector.broadcast %cst_79 : f32 to vector<1x128xf32>
    %255 = arith.addf %254, %253 : vector<1x128xf32>
    %256 = arith.divf %254, %255 : vector<1x128xf32>
    %257 = math.tanh %251 : vector<1x128xf32>
    %258 = vector.extract_strided_slice %256 {offsets = [0, 0], sizes = [1, 32], strides = [1, 1]} : vector<1x128xf32> to vector<1x32xf32>
    %259 = vector.extract_strided_slice %256 {offsets = [0, 32], sizes = [1, 32], strides = [1, 1]} : vector<1x128xf32> to vector<1x32xf32>
    %260 = vector.extract_strided_slice %257 {offsets = [0, 64], sizes = [1, 32], strides = [1, 1]} : vector<1x128xf32> to vector<1x32xf32>
    %261 = vector.extract_strided_slice %256 {offsets = [0, 96], sizes = [1, 32], strides = [1, 1]} : vector<1x128xf32> to vector<1x32xf32>
    %262 = arith.mulf %259, %185 : vector<1x32xf32>
    %263 = arith.mulf %258, %260 : vector<1x32xf32>
    %264 = arith.addf %262, %263 : vector<1x32xf32>
    %265 = math.tanh %264 : vector<1x32xf32>
    %266 = arith.mulf %261, %265 : vector<1x32xf32>
    %c48_80 = arith.constant 48 : index
    %c0_81 = arith.constant 0 : index
    %267 = vector.load %arg2[%c48_80, %c0_81] : memref<416x128xf32, #tpu.memory_space<vmem>>, vector<32x128xf32>
    %268 = arith.truncf %266 : vector<1x32xf32> to vector<1x32xbf16>
    %269 = arith.truncf %267 : vector<32x128xf32> to vector<32x128xbf16>
    %cst_82 = arith.constant dense<0.000000e+00> : vector<1x128xf32>
    %270 = tpu.matmul %268, %269, %cst_82 {dimension_numbers = #tpu.dot_dimension_numbers<[1], [0], [0], [1], [0, 0, 1, 1], [], []>} : vector<1x32xbf16>, vector<32x128xbf16>, vector<1x128xf32> -> vector<1x128xf32>
    %c80_83 = arith.constant 80 : index
    %c0_84 = arith.constant 0 : index
    %271 = vector.load %arg2[%c80_83, %c0_84] : memref<416x128xf32, #tpu.memory_space<vmem>>, vector<32x128xf32>
    %272 = arith.truncf %213 : vector<1x32xf32> to vector<1x32xbf16>
    %273 = arith.truncf %271 : vector<32x128xf32> to vector<32x128xbf16>
    %cst_85 = arith.constant dense<0.000000e+00> : vector<1x128xf32>
    %274 = tpu.matmul %272, %273, %cst_85 {dimension_numbers = #tpu.dot_dimension_numbers<[1], [0], [0], [1], [0, 0, 1, 1], [], []>} : vector<1x32xbf16>, vector<32x128xbf16>, vector<1x128xf32> -> vector<1x128xf32>
    %275 = arith.addf %270, %274 : vector<1x128xf32>
    %c112_86 = arith.constant 112 : index
    %c0_87 = arith.constant 0 : index
    %276 = vector.load %arg2[%c112_86, %c0_87] : memref<416x128xf32, #tpu.memory_space<vmem>>, vector<1x128xf32>
    %277 = arith.addf %275, %276 : vector<1x128xf32>
    %278 = arith.negf %277 : vector<1x128xf32>
    %279 = math.exp %278 : vector<1x128xf32>
    %cst_88 = arith.constant 1.000000e+00 : f32
    %280 = vector.broadcast %cst_88 : f32 to vector<1x128xf32>
    %281 = arith.addf %280, %279 : vector<1x128xf32>
    %282 = arith.divf %280, %281 : vector<1x128xf32>
    %283 = math.tanh %277 : vector<1x128xf32>
    %284 = vector.extract_strided_slice %282 {offsets = [0, 0], sizes = [1, 32], strides = [1, 1]} : vector<1x128xf32> to vector<1x32xf32>
    %285 = vector.extract_strided_slice %282 {offsets = [0, 32], sizes = [1, 32], strides = [1, 1]} : vector<1x128xf32> to vector<1x32xf32>
    %286 = vector.extract_strided_slice %283 {offsets = [0, 64], sizes = [1, 32], strides = [1, 1]} : vector<1x128xf32> to vector<1x32xf32>
    %287 = vector.extract_strided_slice %282 {offsets = [0, 96], sizes = [1, 32], strides = [1, 1]} : vector<1x128xf32> to vector<1x32xf32>
    %288 = arith.mulf %285, %211 : vector<1x32xf32>
    %289 = arith.mulf %284, %286 : vector<1x32xf32>
    %290 = arith.addf %288, %289 : vector<1x32xf32>
    %291 = math.tanh %290 : vector<1x32xf32>
    %292 = arith.mulf %287, %291 : vector<1x32xf32>
    %c120_89 = arith.constant 120 : index
    %c0_90 = arith.constant 0 : index
    %293 = vector.load %arg2[%c120_89, %c0_90] : memref<416x128xf32, #tpu.memory_space<vmem>>, vector<32x128xf32>
    %294 = arith.truncf %292 : vector<1x32xf32> to vector<1x32xbf16>
    %295 = arith.truncf %293 : vector<32x128xf32> to vector<32x128xbf16>
    %cst_91 = arith.constant dense<0.000000e+00> : vector<1x128xf32>
    %296 = tpu.matmul %294, %295, %cst_91 {dimension_numbers = #tpu.dot_dimension_numbers<[1], [0], [0], [1], [0, 0, 1, 1], [], []>} : vector<1x32xbf16>, vector<32x128xbf16>, vector<1x128xf32> -> vector<1x128xf32>
    %c152_92 = arith.constant 152 : index
    %c0_93 = arith.constant 0 : index
    %297 = vector.load %arg2[%c152_92, %c0_93] : memref<416x128xf32, #tpu.memory_space<vmem>>, vector<32x128xf32>
    %298 = arith.truncf %239 : vector<1x32xf32> to vector<1x32xbf16>
    %299 = arith.truncf %297 : vector<32x128xf32> to vector<32x128xbf16>
    %cst_94 = arith.constant dense<0.000000e+00> : vector<1x128xf32>
    %300 = tpu.matmul %298, %299, %cst_94 {dimension_numbers = #tpu.dot_dimension_numbers<[1], [0], [0], [1], [0, 0, 1, 1], [], []>} : vector<1x32xbf16>, vector<32x128xbf16>, vector<1x128xf32> -> vector<1x128xf32>
    %301 = arith.addf %296, %300 : vector<1x128xf32>
    %c184_95 = arith.constant 184 : index
    %c0_96 = arith.constant 0 : index
    %302 = vector.load %arg2[%c184_95, %c0_96] : memref<416x128xf32, #tpu.memory_space<vmem>>, vector<1x128xf32>
    %303 = arith.addf %301, %302 : vector<1x128xf32>
    %304 = arith.negf %303 : vector<1x128xf32>
    %305 = math.exp %304 : vector<1x128xf32>
    %cst_97 = arith.constant 1.000000e+00 : f32
    %306 = vector.broadcast %cst_97 : f32 to vector<1x128xf32>
    %307 = arith.addf %306, %305 : vector<1x128xf32>
    %308 = arith.divf %306, %307 : vector<1x128xf32>
    %309 = math.tanh %303 : vector<1x128xf32>
    %310 = vector.extract_strided_slice %308 {offsets = [0, 0], sizes = [1, 32], strides = [1, 1]} : vector<1x128xf32> to vector<1x32xf32>
    %311 = vector.extract_strided_slice %308 {offsets = [0, 32], sizes = [1, 32], strides = [1, 1]} : vector<1x128xf32> to vector<1x32xf32>
    %312 = vector.extract_strided_slice %309 {offsets = [0, 64], sizes = [1, 32], strides = [1, 1]} : vector<1x128xf32> to vector<1x32xf32>
    %313 = vector.extract_strided_slice %308 {offsets = [0, 96], sizes = [1, 32], strides = [1, 1]} : vector<1x128xf32> to vector<1x32xf32>
    %314 = arith.mulf %311, %237 : vector<1x32xf32>
    %315 = arith.mulf %310, %312 : vector<1x32xf32>
    %316 = arith.addf %314, %315 : vector<1x32xf32>
    %317 = math.tanh %316 : vector<1x32xf32>
    %318 = arith.mulf %313, %317 : vector<1x32xf32>
    %c32_98 = arith.constant 32 : index
    %c0_99 = arith.constant 0 : index
    %319 = vector.load %arg3[%c32_98, %c0_99] : memref<104x32xf32, #tpu.memory_space<vmem>>, vector<32x32xf32>
    %320 = arith.truncf %318 : vector<1x32xf32> to vector<1x32xbf16>
    %321 = arith.truncf %319 : vector<32x32xf32> to vector<32x32xbf16>
    %cst_100 = arith.constant dense<0.000000e+00> : vector<1x32xf32>
    %322 = tpu.matmul %320, %321, %cst_100 {dimension_numbers = #tpu.dot_dimension_numbers<[1], [0], [0], [1], [0, 0, 1, 1], [], []>} : vector<1x32xbf16>, vector<32x32xbf16>, vector<1x32xf32> -> vector<1x32xf32>
    %c64_101 = arith.constant 64 : index
    %c0_102 = arith.constant 0 : index
    %323 = vector.load %arg3[%c64_101, %c0_102] : memref<104x32xf32, #tpu.memory_space<vmem>>, vector<1x32xf32>
    %324 = arith.addf %322, %323 : vector<1x32xf32>
    %325 = vector.extract_strided_slice %8 {offsets = [4, 0], sizes = [1, 128], strides = [1, 1]} : vector<8x128xf32> to vector<1x128xf32>
    %c16_103 = arith.constant 16 : index
    %c0_104 = arith.constant 0 : index
    %326 = vector.load %arg2[%c16_103, %c0_104] : memref<416x128xf32, #tpu.memory_space<vmem>>, vector<32x128xf32>
    %327 = arith.truncf %266 : vector<1x32xf32> to vector<1x32xbf16>
    %328 = arith.truncf %326 : vector<32x128xf32> to vector<32x128xbf16>
    %cst_105 = arith.constant dense<0.000000e+00> : vector<1x128xf32>
    %329 = tpu.matmul %327, %328, %cst_105 {dimension_numbers = #tpu.dot_dimension_numbers<[1], [0], [0], [1], [0, 0, 1, 1], [], []>} : vector<1x32xbf16>, vector<32x128xbf16>, vector<1x128xf32> -> vector<1x128xf32>
    %330 = arith.addf %325, %329 : vector<1x128xf32>
    %331 = arith.negf %330 : vector<1x128xf32>
    %332 = math.exp %331 : vector<1x128xf32>
    %cst_106 = arith.constant 1.000000e+00 : f32
    %333 = vector.broadcast %cst_106 : f32 to vector<1x128xf32>
    %334 = arith.addf %333, %332 : vector<1x128xf32>
    %335 = arith.divf %333, %334 : vector<1x128xf32>
    %336 = math.tanh %330 : vector<1x128xf32>
    %337 = vector.extract_strided_slice %335 {offsets = [0, 0], sizes = [1, 32], strides = [1, 1]} : vector<1x128xf32> to vector<1x32xf32>
    %338 = vector.extract_strided_slice %335 {offsets = [0, 32], sizes = [1, 32], strides = [1, 1]} : vector<1x128xf32> to vector<1x32xf32>
    %339 = vector.extract_strided_slice %336 {offsets = [0, 64], sizes = [1, 32], strides = [1, 1]} : vector<1x128xf32> to vector<1x32xf32>
    %340 = vector.extract_strided_slice %335 {offsets = [0, 96], sizes = [1, 32], strides = [1, 1]} : vector<1x128xf32> to vector<1x32xf32>
    %341 = arith.mulf %338, %264 : vector<1x32xf32>
    %342 = arith.mulf %337, %339 : vector<1x32xf32>
    %343 = arith.addf %341, %342 : vector<1x32xf32>
    %344 = math.tanh %343 : vector<1x32xf32>
    %345 = arith.mulf %340, %344 : vector<1x32xf32>
    %c48_107 = arith.constant 48 : index
    %c0_108 = arith.constant 0 : index
    %346 = vector.load %arg2[%c48_107, %c0_108] : memref<416x128xf32, #tpu.memory_space<vmem>>, vector<32x128xf32>
    %347 = arith.truncf %345 : vector<1x32xf32> to vector<1x32xbf16>
    %348 = arith.truncf %346 : vector<32x128xf32> to vector<32x128xbf16>
    %cst_109 = arith.constant dense<0.000000e+00> : vector<1x128xf32>
    %349 = tpu.matmul %347, %348, %cst_109 {dimension_numbers = #tpu.dot_dimension_numbers<[1], [0], [0], [1], [0, 0, 1, 1], [], []>} : vector<1x32xbf16>, vector<32x128xbf16>, vector<1x128xf32> -> vector<1x128xf32>
    %c80_110 = arith.constant 80 : index
    %c0_111 = arith.constant 0 : index
    %350 = vector.load %arg2[%c80_110, %c0_111] : memref<416x128xf32, #tpu.memory_space<vmem>>, vector<32x128xf32>
    %351 = arith.truncf %292 : vector<1x32xf32> to vector<1x32xbf16>
    %352 = arith.truncf %350 : vector<32x128xf32> to vector<32x128xbf16>
    %cst_112 = arith.constant dense<0.000000e+00> : vector<1x128xf32>
    %353 = tpu.matmul %351, %352, %cst_112 {dimension_numbers = #tpu.dot_dimension_numbers<[1], [0], [0], [1], [0, 0, 1, 1], [], []>} : vector<1x32xbf16>, vector<32x128xbf16>, vector<1x128xf32> -> vector<1x128xf32>
    %354 = arith.addf %349, %353 : vector<1x128xf32>
    %c112_113 = arith.constant 112 : index
    %c0_114 = arith.constant 0 : index
    %355 = vector.load %arg2[%c112_113, %c0_114] : memref<416x128xf32, #tpu.memory_space<vmem>>, vector<1x128xf32>
    %356 = arith.addf %354, %355 : vector<1x128xf32>
    %357 = arith.negf %356 : vector<1x128xf32>
    %358 = math.exp %357 : vector<1x128xf32>
    %cst_115 = arith.constant 1.000000e+00 : f32
    %359 = vector.broadcast %cst_115 : f32 to vector<1x128xf32>
    %360 = arith.addf %359, %358 : vector<1x128xf32>
    %361 = arith.divf %359, %360 : vector<1x128xf32>
    %362 = math.tanh %356 : vector<1x128xf32>
    %363 = vector.extract_strided_slice %361 {offsets = [0, 0], sizes = [1, 32], strides = [1, 1]} : vector<1x128xf32> to vector<1x32xf32>
    %364 = vector.extract_strided_slice %361 {offsets = [0, 32], sizes = [1, 32], strides = [1, 1]} : vector<1x128xf32> to vector<1x32xf32>
    %365 = vector.extract_strided_slice %362 {offsets = [0, 64], sizes = [1, 32], strides = [1, 1]} : vector<1x128xf32> to vector<1x32xf32>
    %366 = vector.extract_strided_slice %361 {offsets = [0, 96], sizes = [1, 32], strides = [1, 1]} : vector<1x128xf32> to vector<1x32xf32>
    %367 = arith.mulf %364, %290 : vector<1x32xf32>
    %368 = arith.mulf %363, %365 : vector<1x32xf32>
    %369 = arith.addf %367, %368 : vector<1x32xf32>
    %370 = math.tanh %369 : vector<1x32xf32>
    %371 = arith.mulf %366, %370 : vector<1x32xf32>
    %c120_116 = arith.constant 120 : index
    %c0_117 = arith.constant 0 : index
    %372 = vector.load %arg2[%c120_116, %c0_117] : memref<416x128xf32, #tpu.memory_space<vmem>>, vector<32x128xf32>
    %373 = arith.truncf %371 : vector<1x32xf32> to vector<1x32xbf16>
    %374 = arith.truncf %372 : vector<32x128xf32> to vector<32x128xbf16>
    %cst_118 = arith.constant dense<0.000000e+00> : vector<1x128xf32>
    %375 = tpu.matmul %373, %374, %cst_118 {dimension_numbers = #tpu.dot_dimension_numbers<[1], [0], [0], [1], [0, 0, 1, 1], [], []>} : vector<1x32xbf16>, vector<32x128xbf16>, vector<1x128xf32> -> vector<1x128xf32>
    %c152_119 = arith.constant 152 : index
    %c0_120 = arith.constant 0 : index
    %376 = vector.load %arg2[%c152_119, %c0_120] : memref<416x128xf32, #tpu.memory_space<vmem>>, vector<32x128xf32>
    %377 = arith.truncf %318 : vector<1x32xf32> to vector<1x32xbf16>
    %378 = arith.truncf %376 : vector<32x128xf32> to vector<32x128xbf16>
    %cst_121 = arith.constant dense<0.000000e+00> : vector<1x128xf32>
    %379 = tpu.matmul %377, %378, %cst_121 {dimension_numbers = #tpu.dot_dimension_numbers<[1], [0], [0], [1], [0, 0, 1, 1], [], []>} : vector<1x32xbf16>, vector<32x128xbf16>, vector<1x128xf32> -> vector<1x128xf32>
    %380 = arith.addf %375, %379 : vector<1x128xf32>
    %c184_122 = arith.constant 184 : index
    %c0_123 = arith.constant 0 : index
    %381 = vector.load %arg2[%c184_122, %c0_123] : memref<416x128xf32, #tpu.memory_space<vmem>>, vector<1x128xf32>
    %382 = arith.addf %380, %381 : vector<1x128xf32>
    %383 = arith.negf %382 : vector<1x128xf32>
    %384 = math.exp %383 : vector<1x128xf32>
    %cst_124 = arith.constant 1.000000e+00 : f32
    %385 = vector.broadcast %cst_124 : f32 to vector<1x128xf32>
    %386 = arith.addf %385, %384 : vector<1x128xf32>
    %387 = arith.divf %385, %386 : vector<1x128xf32>
    %388 = math.tanh %382 : vector<1x128xf32>
    %389 = vector.extract_strided_slice %387 {offsets = [0, 0], sizes = [1, 32], strides = [1, 1]} : vector<1x128xf32> to vector<1x32xf32>
    %390 = vector.extract_strided_slice %387 {offsets = [0, 32], sizes = [1, 32], strides = [1, 1]} : vector<1x128xf32> to vector<1x32xf32>
    %391 = vector.extract_strided_slice %388 {offsets = [0, 64], sizes = [1, 32], strides = [1, 1]} : vector<1x128xf32> to vector<1x32xf32>
    %392 = vector.extract_strided_slice %387 {offsets = [0, 96], sizes = [1, 32], strides = [1, 1]} : vector<1x128xf32> to vector<1x32xf32>
    %393 = arith.mulf %390, %316 : vector<1x32xf32>
    %394 = arith.mulf %389, %391 : vector<1x32xf32>
    %395 = arith.addf %393, %394 : vector<1x32xf32>
    %396 = math.tanh %395 : vector<1x32xf32>
    %397 = arith.mulf %392, %396 : vector<1x32xf32>
    %c32_125 = arith.constant 32 : index
    %c0_126 = arith.constant 0 : index
    %398 = vector.load %arg3[%c32_125, %c0_126] : memref<104x32xf32, #tpu.memory_space<vmem>>, vector<32x32xf32>
    %399 = arith.truncf %397 : vector<1x32xf32> to vector<1x32xbf16>
    %400 = arith.truncf %398 : vector<32x32xf32> to vector<32x32xbf16>
    %cst_127 = arith.constant dense<0.000000e+00> : vector<1x32xf32>
    %401 = tpu.matmul %399, %400, %cst_127 {dimension_numbers = #tpu.dot_dimension_numbers<[1], [0], [0], [1], [0, 0, 1, 1], [], []>} : vector<1x32xbf16>, vector<32x32xbf16>, vector<1x32xf32> -> vector<1x32xf32>
    %c64_128 = arith.constant 64 : index
    %c0_129 = arith.constant 0 : index
    %402 = vector.load %arg3[%c64_128, %c0_129] : memref<104x32xf32, #tpu.memory_space<vmem>>, vector<1x32xf32>
    %403 = arith.addf %401, %402 : vector<1x32xf32>
    %404 = vector.extract_strided_slice %8 {offsets = [5, 0], sizes = [1, 128], strides = [1, 1]} : vector<8x128xf32> to vector<1x128xf32>
    %c16_130 = arith.constant 16 : index
    %c0_131 = arith.constant 0 : index
    %405 = vector.load %arg2[%c16_130, %c0_131] : memref<416x128xf32, #tpu.memory_space<vmem>>, vector<32x128xf32>
    %406 = arith.truncf %345 : vector<1x32xf32> to vector<1x32xbf16>
    %407 = arith.truncf %405 : vector<32x128xf32> to vector<32x128xbf16>
    %cst_132 = arith.constant dense<0.000000e+00> : vector<1x128xf32>
    %408 = tpu.matmul %406, %407, %cst_132 {dimension_numbers = #tpu.dot_dimension_numbers<[1], [0], [0], [1], [0, 0, 1, 1], [], []>} : vector<1x32xbf16>, vector<32x128xbf16>, vector<1x128xf32> -> vector<1x128xf32>
    %409 = arith.addf %404, %408 : vector<1x128xf32>
    %410 = arith.negf %409 : vector<1x128xf32>
    %411 = math.exp %410 : vector<1x128xf32>
    %cst_133 = arith.constant 1.000000e+00 : f32
    %412 = vector.broadcast %cst_133 : f32 to vector<1x128xf32>
    %413 = arith.addf %412, %411 : vector<1x128xf32>
    %414 = arith.divf %412, %413 : vector<1x128xf32>
    %415 = math.tanh %409 : vector<1x128xf32>
    %416 = vector.extract_strided_slice %414 {offsets = [0, 0], sizes = [1, 32], strides = [1, 1]} : vector<1x128xf32> to vector<1x32xf32>
    %417 = vector.extract_strided_slice %414 {offsets = [0, 32], sizes = [1, 32], strides = [1, 1]} : vector<1x128xf32> to vector<1x32xf32>
    %418 = vector.extract_strided_slice %415 {offsets = [0, 64], sizes = [1, 32], strides = [1, 1]} : vector<1x128xf32> to vector<1x32xf32>
    %419 = vector.extract_strided_slice %414 {offsets = [0, 96], sizes = [1, 32], strides = [1, 1]} : vector<1x128xf32> to vector<1x32xf32>
    %420 = arith.mulf %417, %343 : vector<1x32xf32>
    %421 = arith.mulf %416, %418 : vector<1x32xf32>
    %422 = arith.addf %420, %421 : vector<1x32xf32>
    %423 = math.tanh %422 : vector<1x32xf32>
    %424 = arith.mulf %419, %423 : vector<1x32xf32>
    %c48_134 = arith.constant 48 : index
    %c0_135 = arith.constant 0 : index
    %425 = vector.load %arg2[%c48_134, %c0_135] : memref<416x128xf32, #tpu.memory_space<vmem>>, vector<32x128xf32>
    %426 = arith.truncf %424 : vector<1x32xf32> to vector<1x32xbf16>
    %427 = arith.truncf %425 : vector<32x128xf32> to vector<32x128xbf16>
    %cst_136 = arith.constant dense<0.000000e+00> : vector<1x128xf32>
    %428 = tpu.matmul %426, %427, %cst_136 {dimension_numbers = #tpu.dot_dimension_numbers<[1], [0], [0], [1], [0, 0, 1, 1], [], []>} : vector<1x32xbf16>, vector<32x128xbf16>, vector<1x128xf32> -> vector<1x128xf32>
    %c80_137 = arith.constant 80 : index
    %c0_138 = arith.constant 0 : index
    %429 = vector.load %arg2[%c80_137, %c0_138] : memref<416x128xf32, #tpu.memory_space<vmem>>, vector<32x128xf32>
    %430 = arith.truncf %371 : vector<1x32xf32> to vector<1x32xbf16>
    %431 = arith.truncf %429 : vector<32x128xf32> to vector<32x128xbf16>
    %cst_139 = arith.constant dense<0.000000e+00> : vector<1x128xf32>
    %432 = tpu.matmul %430, %431, %cst_139 {dimension_numbers = #tpu.dot_dimension_numbers<[1], [0], [0], [1], [0, 0, 1, 1], [], []>} : vector<1x32xbf16>, vector<32x128xbf16>, vector<1x128xf32> -> vector<1x128xf32>
    %433 = arith.addf %428, %432 : vector<1x128xf32>
    %c112_140 = arith.constant 112 : index
    %c0_141 = arith.constant 0 : index
    %434 = vector.load %arg2[%c112_140, %c0_141] : memref<416x128xf32, #tpu.memory_space<vmem>>, vector<1x128xf32>
    %435 = arith.addf %433, %434 : vector<1x128xf32>
    %436 = arith.negf %435 : vector<1x128xf32>
    %437 = math.exp %436 : vector<1x128xf32>
    %cst_142 = arith.constant 1.000000e+00 : f32
    %438 = vector.broadcast %cst_142 : f32 to vector<1x128xf32>
    %439 = arith.addf %438, %437 : vector<1x128xf32>
    %440 = arith.divf %438, %439 : vector<1x128xf32>
    %441 = math.tanh %435 : vector<1x128xf32>
    %442 = vector.extract_strided_slice %440 {offsets = [0, 0], sizes = [1, 32], strides = [1, 1]} : vector<1x128xf32> to vector<1x32xf32>
    %443 = vector.extract_strided_slice %440 {offsets = [0, 32], sizes = [1, 32], strides = [1, 1]} : vector<1x128xf32> to vector<1x32xf32>
    %444 = vector.extract_strided_slice %441 {offsets = [0, 64], sizes = [1, 32], strides = [1, 1]} : vector<1x128xf32> to vector<1x32xf32>
    %445 = vector.extract_strided_slice %440 {offsets = [0, 96], sizes = [1, 32], strides = [1, 1]} : vector<1x128xf32> to vector<1x32xf32>
    %446 = arith.mulf %443, %369 : vector<1x32xf32>
    %447 = arith.mulf %442, %444 : vector<1x32xf32>
    %448 = arith.addf %446, %447 : vector<1x32xf32>
    %449 = math.tanh %448 : vector<1x32xf32>
    %450 = arith.mulf %445, %449 : vector<1x32xf32>
    %c120_143 = arith.constant 120 : index
    %c0_144 = arith.constant 0 : index
    %451 = vector.load %arg2[%c120_143, %c0_144] : memref<416x128xf32, #tpu.memory_space<vmem>>, vector<32x128xf32>
    %452 = arith.truncf %450 : vector<1x32xf32> to vector<1x32xbf16>
    %453 = arith.truncf %451 : vector<32x128xf32> to vector<32x128xbf16>
    %cst_145 = arith.constant dense<0.000000e+00> : vector<1x128xf32>
    %454 = tpu.matmul %452, %453, %cst_145 {dimension_numbers = #tpu.dot_dimension_numbers<[1], [0], [0], [1], [0, 0, 1, 1], [], []>} : vector<1x32xbf16>, vector<32x128xbf16>, vector<1x128xf32> -> vector<1x128xf32>
    %c152_146 = arith.constant 152 : index
    %c0_147 = arith.constant 0 : index
    %455 = vector.load %arg2[%c152_146, %c0_147] : memref<416x128xf32, #tpu.memory_space<vmem>>, vector<32x128xf32>
    %456 = arith.truncf %397 : vector<1x32xf32> to vector<1x32xbf16>
    %457 = arith.truncf %455 : vector<32x128xf32> to vector<32x128xbf16>
    %cst_148 = arith.constant dense<0.000000e+00> : vector<1x128xf32>
    %458 = tpu.matmul %456, %457, %cst_148 {dimension_numbers = #tpu.dot_dimension_numbers<[1], [0], [0], [1], [0, 0, 1, 1], [], []>} : vector<1x32xbf16>, vector<32x128xbf16>, vector<1x128xf32> -> vector<1x128xf32>
    %459 = arith.addf %454, %458 : vector<1x128xf32>
    %c184_149 = arith.constant 184 : index
    %c0_150 = arith.constant 0 : index
    %460 = vector.load %arg2[%c184_149, %c0_150] : memref<416x128xf32, #tpu.memory_space<vmem>>, vector<1x128xf32>
    %461 = arith.addf %459, %460 : vector<1x128xf32>
    %462 = arith.negf %461 : vector<1x128xf32>
    %463 = math.exp %462 : vector<1x128xf32>
    %cst_151 = arith.constant 1.000000e+00 : f32
    %464 = vector.broadcast %cst_151 : f32 to vector<1x128xf32>
    %465 = arith.addf %464, %463 : vector<1x128xf32>
    %466 = arith.divf %464, %465 : vector<1x128xf32>
    %467 = math.tanh %461 : vector<1x128xf32>
    %468 = vector.extract_strided_slice %466 {offsets = [0, 0], sizes = [1, 32], strides = [1, 1]} : vector<1x128xf32> to vector<1x32xf32>
    %469 = vector.extract_strided_slice %466 {offsets = [0, 32], sizes = [1, 32], strides = [1, 1]} : vector<1x128xf32> to vector<1x32xf32>
    %470 = vector.extract_strided_slice %467 {offsets = [0, 64], sizes = [1, 32], strides = [1, 1]} : vector<1x128xf32> to vector<1x32xf32>
    %471 = vector.extract_strided_slice %466 {offsets = [0, 96], sizes = [1, 32], strides = [1, 1]} : vector<1x128xf32> to vector<1x32xf32>
    %472 = arith.mulf %469, %395 : vector<1x32xf32>
    %473 = arith.mulf %468, %470 : vector<1x32xf32>
    %474 = arith.addf %472, %473 : vector<1x32xf32>
    %475 = math.tanh %474 : vector<1x32xf32>
    %476 = arith.mulf %471, %475 : vector<1x32xf32>
    %c32_152 = arith.constant 32 : index
    %c0_153 = arith.constant 0 : index
    %477 = vector.load %arg3[%c32_152, %c0_153] : memref<104x32xf32, #tpu.memory_space<vmem>>, vector<32x32xf32>
    %478 = arith.truncf %476 : vector<1x32xf32> to vector<1x32xbf16>
    %479 = arith.truncf %477 : vector<32x32xf32> to vector<32x32xbf16>
    %cst_154 = arith.constant dense<0.000000e+00> : vector<1x32xf32>
    %480 = tpu.matmul %478, %479, %cst_154 {dimension_numbers = #tpu.dot_dimension_numbers<[1], [0], [0], [1], [0, 0, 1, 1], [], []>} : vector<1x32xbf16>, vector<32x32xbf16>, vector<1x32xf32> -> vector<1x32xf32>
    %c64_155 = arith.constant 64 : index
    %c0_156 = arith.constant 0 : index
    %481 = vector.load %arg3[%c64_155, %c0_156] : memref<104x32xf32, #tpu.memory_space<vmem>>, vector<1x32xf32>
    %482 = arith.addf %480, %481 : vector<1x32xf32>
    %483 = vector.extract_strided_slice %8 {offsets = [6, 0], sizes = [1, 128], strides = [1, 1]} : vector<8x128xf32> to vector<1x128xf32>
    %c16_157 = arith.constant 16 : index
    %c0_158 = arith.constant 0 : index
    %484 = vector.load %arg2[%c16_157, %c0_158] : memref<416x128xf32, #tpu.memory_space<vmem>>, vector<32x128xf32>
    %485 = arith.truncf %424 : vector<1x32xf32> to vector<1x32xbf16>
    %486 = arith.truncf %484 : vector<32x128xf32> to vector<32x128xbf16>
    %cst_159 = arith.constant dense<0.000000e+00> : vector<1x128xf32>
    %487 = tpu.matmul %485, %486, %cst_159 {dimension_numbers = #tpu.dot_dimension_numbers<[1], [0], [0], [1], [0, 0, 1, 1], [], []>} : vector<1x32xbf16>, vector<32x128xbf16>, vector<1x128xf32> -> vector<1x128xf32>
    %488 = arith.addf %483, %487 : vector<1x128xf32>
    %489 = arith.negf %488 : vector<1x128xf32>
    %490 = math.exp %489 : vector<1x128xf32>
    %cst_160 = arith.constant 1.000000e+00 : f32
    %491 = vector.broadcast %cst_160 : f32 to vector<1x128xf32>
    %492 = arith.addf %491, %490 : vector<1x128xf32>
    %493 = arith.divf %491, %492 : vector<1x128xf32>
    %494 = math.tanh %488 : vector<1x128xf32>
    %495 = vector.extract_strided_slice %493 {offsets = [0, 0], sizes = [1, 32], strides = [1, 1]} : vector<1x128xf32> to vector<1x32xf32>
    %496 = vector.extract_strided_slice %493 {offsets = [0, 32], sizes = [1, 32], strides = [1, 1]} : vector<1x128xf32> to vector<1x32xf32>
    %497 = vector.extract_strided_slice %494 {offsets = [0, 64], sizes = [1, 32], strides = [1, 1]} : vector<1x128xf32> to vector<1x32xf32>
    %498 = vector.extract_strided_slice %493 {offsets = [0, 96], sizes = [1, 32], strides = [1, 1]} : vector<1x128xf32> to vector<1x32xf32>
    %499 = arith.mulf %496, %422 : vector<1x32xf32>
    %500 = arith.mulf %495, %497 : vector<1x32xf32>
    %501 = arith.addf %499, %500 : vector<1x32xf32>
    %502 = math.tanh %501 : vector<1x32xf32>
    %503 = arith.mulf %498, %502 : vector<1x32xf32>
    %c48_161 = arith.constant 48 : index
    %c0_162 = arith.constant 0 : index
    %504 = vector.load %arg2[%c48_161, %c0_162] : memref<416x128xf32, #tpu.memory_space<vmem>>, vector<32x128xf32>
    %505 = arith.truncf %503 : vector<1x32xf32> to vector<1x32xbf16>
    %506 = arith.truncf %504 : vector<32x128xf32> to vector<32x128xbf16>
    %cst_163 = arith.constant dense<0.000000e+00> : vector<1x128xf32>
    %507 = tpu.matmul %505, %506, %cst_163 {dimension_numbers = #tpu.dot_dimension_numbers<[1], [0], [0], [1], [0, 0, 1, 1], [], []>} : vector<1x32xbf16>, vector<32x128xbf16>, vector<1x128xf32> -> vector<1x128xf32>
    %c80_164 = arith.constant 80 : index
    %c0_165 = arith.constant 0 : index
    %508 = vector.load %arg2[%c80_164, %c0_165] : memref<416x128xf32, #tpu.memory_space<vmem>>, vector<32x128xf32>
    %509 = arith.truncf %450 : vector<1x32xf32> to vector<1x32xbf16>
    %510 = arith.truncf %508 : vector<32x128xf32> to vector<32x128xbf16>
    %cst_166 = arith.constant dense<0.000000e+00> : vector<1x128xf32>
    %511 = tpu.matmul %509, %510, %cst_166 {dimension_numbers = #tpu.dot_dimension_numbers<[1], [0], [0], [1], [0, 0, 1, 1], [], []>} : vector<1x32xbf16>, vector<32x128xbf16>, vector<1x128xf32> -> vector<1x128xf32>
    %512 = arith.addf %507, %511 : vector<1x128xf32>
    %c112_167 = arith.constant 112 : index
    %c0_168 = arith.constant 0 : index
    %513 = vector.load %arg2[%c112_167, %c0_168] : memref<416x128xf32, #tpu.memory_space<vmem>>, vector<1x128xf32>
    %514 = arith.addf %512, %513 : vector<1x128xf32>
    %515 = arith.negf %514 : vector<1x128xf32>
    %516 = math.exp %515 : vector<1x128xf32>
    %cst_169 = arith.constant 1.000000e+00 : f32
    %517 = vector.broadcast %cst_169 : f32 to vector<1x128xf32>
    %518 = arith.addf %517, %516 : vector<1x128xf32>
    %519 = arith.divf %517, %518 : vector<1x128xf32>
    %520 = math.tanh %514 : vector<1x128xf32>
    %521 = vector.extract_strided_slice %519 {offsets = [0, 0], sizes = [1, 32], strides = [1, 1]} : vector<1x128xf32> to vector<1x32xf32>
    %522 = vector.extract_strided_slice %519 {offsets = [0, 32], sizes = [1, 32], strides = [1, 1]} : vector<1x128xf32> to vector<1x32xf32>
    %523 = vector.extract_strided_slice %520 {offsets = [0, 64], sizes = [1, 32], strides = [1, 1]} : vector<1x128xf32> to vector<1x32xf32>
    %524 = vector.extract_strided_slice %519 {offsets = [0, 96], sizes = [1, 32], strides = [1, 1]} : vector<1x128xf32> to vector<1x32xf32>
    %525 = arith.mulf %522, %448 : vector<1x32xf32>
    %526 = arith.mulf %521, %523 : vector<1x32xf32>
    %527 = arith.addf %525, %526 : vector<1x32xf32>
    %528 = math.tanh %527 : vector<1x32xf32>
    %529 = arith.mulf %524, %528 : vector<1x32xf32>
    %c120_170 = arith.constant 120 : index
    %c0_171 = arith.constant 0 : index
    %530 = vector.load %arg2[%c120_170, %c0_171] : memref<416x128xf32, #tpu.memory_space<vmem>>, vector<32x128xf32>
    %531 = arith.truncf %529 : vector<1x32xf32> to vector<1x32xbf16>
    %532 = arith.truncf %530 : vector<32x128xf32> to vector<32x128xbf16>
    %cst_172 = arith.constant dense<0.000000e+00> : vector<1x128xf32>
    %533 = tpu.matmul %531, %532, %cst_172 {dimension_numbers = #tpu.dot_dimension_numbers<[1], [0], [0], [1], [0, 0, 1, 1], [], []>} : vector<1x32xbf16>, vector<32x128xbf16>, vector<1x128xf32> -> vector<1x128xf32>
    %c152_173 = arith.constant 152 : index
    %c0_174 = arith.constant 0 : index
    %534 = vector.load %arg2[%c152_173, %c0_174] : memref<416x128xf32, #tpu.memory_space<vmem>>, vector<32x128xf32>
    %535 = arith.truncf %476 : vector<1x32xf32> to vector<1x32xbf16>
    %536 = arith.truncf %534 : vector<32x128xf32> to vector<32x128xbf16>
    %cst_175 = arith.constant dense<0.000000e+00> : vector<1x128xf32>
    %537 = tpu.matmul %535, %536, %cst_175 {dimension_numbers = #tpu.dot_dimension_numbers<[1], [0], [0], [1], [0, 0, 1, 1], [], []>} : vector<1x32xbf16>, vector<32x128xbf16>, vector<1x128xf32> -> vector<1x128xf32>
    %538 = arith.addf %533, %537 : vector<1x128xf32>
    %c184_176 = arith.constant 184 : index
    %c0_177 = arith.constant 0 : index
    %539 = vector.load %arg2[%c184_176, %c0_177] : memref<416x128xf32, #tpu.memory_space<vmem>>, vector<1x128xf32>
    %540 = arith.addf %538, %539 : vector<1x128xf32>
    %541 = arith.negf %540 : vector<1x128xf32>
    %542 = math.exp %541 : vector<1x128xf32>
    %cst_178 = arith.constant 1.000000e+00 : f32
    %543 = vector.broadcast %cst_178 : f32 to vector<1x128xf32>
    %544 = arith.addf %543, %542 : vector<1x128xf32>
    %545 = arith.divf %543, %544 : vector<1x128xf32>
    %546 = math.tanh %540 : vector<1x128xf32>
    %547 = vector.extract_strided_slice %545 {offsets = [0, 0], sizes = [1, 32], strides = [1, 1]} : vector<1x128xf32> to vector<1x32xf32>
    %548 = vector.extract_strided_slice %545 {offsets = [0, 32], sizes = [1, 32], strides = [1, 1]} : vector<1x128xf32> to vector<1x32xf32>
    %549 = vector.extract_strided_slice %546 {offsets = [0, 64], sizes = [1, 32], strides = [1, 1]} : vector<1x128xf32> to vector<1x32xf32>
    %550 = vector.extract_strided_slice %545 {offsets = [0, 96], sizes = [1, 32], strides = [1, 1]} : vector<1x128xf32> to vector<1x32xf32>
    %551 = arith.mulf %548, %474 : vector<1x32xf32>
    %552 = arith.mulf %547, %549 : vector<1x32xf32>
    %553 = arith.addf %551, %552 : vector<1x32xf32>
    %554 = math.tanh %553 : vector<1x32xf32>
    %555 = arith.mulf %550, %554 : vector<1x32xf32>
    %c32_179 = arith.constant 32 : index
    %c0_180 = arith.constant 0 : index
    %556 = vector.load %arg3[%c32_179, %c0_180] : memref<104x32xf32, #tpu.memory_space<vmem>>, vector<32x32xf32>
    %557 = arith.truncf %555 : vector<1x32xf32> to vector<1x32xbf16>
    %558 = arith.truncf %556 : vector<32x32xf32> to vector<32x32xbf16>
    %cst_181 = arith.constant dense<0.000000e+00> : vector<1x32xf32>
    %559 = tpu.matmul %557, %558, %cst_181 {dimension_numbers = #tpu.dot_dimension_numbers<[1], [0], [0], [1], [0, 0, 1, 1], [], []>} : vector<1x32xbf16>, vector<32x32xbf16>, vector<1x32xf32> -> vector<1x32xf32>
    %c64_182 = arith.constant 64 : index
    %c0_183 = arith.constant 0 : index
    %560 = vector.load %arg3[%c64_182, %c0_183] : memref<104x32xf32, #tpu.memory_space<vmem>>, vector<1x32xf32>
    %561 = arith.addf %559, %560 : vector<1x32xf32>
    %562 = vector.extract_strided_slice %8 {offsets = [7, 0], sizes = [1, 128], strides = [1, 1]} : vector<8x128xf32> to vector<1x128xf32>
    %c16_184 = arith.constant 16 : index
    %c0_185 = arith.constant 0 : index
    %563 = vector.load %arg2[%c16_184, %c0_185] : memref<416x128xf32, #tpu.memory_space<vmem>>, vector<32x128xf32>
    %564 = arith.truncf %503 : vector<1x32xf32> to vector<1x32xbf16>
    %565 = arith.truncf %563 : vector<32x128xf32> to vector<32x128xbf16>
    %cst_186 = arith.constant dense<0.000000e+00> : vector<1x128xf32>
    %566 = tpu.matmul %564, %565, %cst_186 {dimension_numbers = #tpu.dot_dimension_numbers<[1], [0], [0], [1], [0, 0, 1, 1], [], []>} : vector<1x32xbf16>, vector<32x128xbf16>, vector<1x128xf32> -> vector<1x128xf32>
    %567 = arith.addf %562, %566 : vector<1x128xf32>
    %568 = arith.negf %567 : vector<1x128xf32>
    %569 = math.exp %568 : vector<1x128xf32>
    %cst_187 = arith.constant 1.000000e+00 : f32
    %570 = vector.broadcast %cst_187 : f32 to vector<1x128xf32>
    %571 = arith.addf %570, %569 : vector<1x128xf32>
    %572 = arith.divf %570, %571 : vector<1x128xf32>
    %573 = math.tanh %567 : vector<1x128xf32>
    %574 = vector.extract_strided_slice %572 {offsets = [0, 0], sizes = [1, 32], strides = [1, 1]} : vector<1x128xf32> to vector<1x32xf32>
    %575 = vector.extract_strided_slice %572 {offsets = [0, 32], sizes = [1, 32], strides = [1, 1]} : vector<1x128xf32> to vector<1x32xf32>
    %576 = vector.extract_strided_slice %573 {offsets = [0, 64], sizes = [1, 32], strides = [1, 1]} : vector<1x128xf32> to vector<1x32xf32>
    %577 = vector.extract_strided_slice %572 {offsets = [0, 96], sizes = [1, 32], strides = [1, 1]} : vector<1x128xf32> to vector<1x32xf32>
    %578 = arith.mulf %575, %501 : vector<1x32xf32>
    %579 = arith.mulf %574, %576 : vector<1x32xf32>
    %580 = arith.addf %578, %579 : vector<1x32xf32>
    %581 = math.tanh %580 : vector<1x32xf32>
    %582 = arith.mulf %577, %581 : vector<1x32xf32>
    %c48_188 = arith.constant 48 : index
    %c0_189 = arith.constant 0 : index
    %583 = vector.load %arg2[%c48_188, %c0_189] : memref<416x128xf32, #tpu.memory_space<vmem>>, vector<32x128xf32>
    %584 = arith.truncf %582 : vector<1x32xf32> to vector<1x32xbf16>
    %585 = arith.truncf %583 : vector<32x128xf32> to vector<32x128xbf16>
    %cst_190 = arith.constant dense<0.000000e+00> : vector<1x128xf32>
    %586 = tpu.matmul %584, %585, %cst_190 {dimension_numbers = #tpu.dot_dimension_numbers<[1], [0], [0], [1], [0, 0, 1, 1], [], []>} : vector<1x32xbf16>, vector<32x128xbf16>, vector<1x128xf32> -> vector<1x128xf32>
    %c80_191 = arith.constant 80 : index
    %c0_192 = arith.constant 0 : index
    %587 = vector.load %arg2[%c80_191, %c0_192] : memref<416x128xf32, #tpu.memory_space<vmem>>, vector<32x128xf32>
    %588 = arith.truncf %529 : vector<1x32xf32> to vector<1x32xbf16>
    %589 = arith.truncf %587 : vector<32x128xf32> to vector<32x128xbf16>
    %cst_193 = arith.constant dense<0.000000e+00> : vector<1x128xf32>
    %590 = tpu.matmul %588, %589, %cst_193 {dimension_numbers = #tpu.dot_dimension_numbers<[1], [0], [0], [1], [0, 0, 1, 1], [], []>} : vector<1x32xbf16>, vector<32x128xbf16>, vector<1x128xf32> -> vector<1x128xf32>
    %591 = arith.addf %586, %590 : vector<1x128xf32>
    %c112_194 = arith.constant 112 : index
    %c0_195 = arith.constant 0 : index
    %592 = vector.load %arg2[%c112_194, %c0_195] : memref<416x128xf32, #tpu.memory_space<vmem>>, vector<1x128xf32>
    %593 = arith.addf %591, %592 : vector<1x128xf32>
    %594 = arith.negf %593 : vector<1x128xf32>
    %595 = math.exp %594 : vector<1x128xf32>
    %cst_196 = arith.constant 1.000000e+00 : f32
    %596 = vector.broadcast %cst_196 : f32 to vector<1x128xf32>
    %597 = arith.addf %596, %595 : vector<1x128xf32>
    %598 = arith.divf %596, %597 : vector<1x128xf32>
    %599 = math.tanh %593 : vector<1x128xf32>
    %600 = vector.extract_strided_slice %598 {offsets = [0, 0], sizes = [1, 32], strides = [1, 1]} : vector<1x128xf32> to vector<1x32xf32>
    %601 = vector.extract_strided_slice %598 {offsets = [0, 32], sizes = [1, 32], strides = [1, 1]} : vector<1x128xf32> to vector<1x32xf32>
    %602 = vector.extract_strided_slice %599 {offsets = [0, 64], sizes = [1, 32], strides = [1, 1]} : vector<1x128xf32> to vector<1x32xf32>
    %603 = vector.extract_strided_slice %598 {offsets = [0, 96], sizes = [1, 32], strides = [1, 1]} : vector<1x128xf32> to vector<1x32xf32>
    %604 = arith.mulf %601, %527 : vector<1x32xf32>
    %605 = arith.mulf %600, %602 : vector<1x32xf32>
    %606 = arith.addf %604, %605 : vector<1x32xf32>
    %607 = math.tanh %606 : vector<1x32xf32>
    %608 = arith.mulf %603, %607 : vector<1x32xf32>
    %c120_197 = arith.constant 120 : index
    %c0_198 = arith.constant 0 : index
    %609 = vector.load %arg2[%c120_197, %c0_198] : memref<416x128xf32, #tpu.memory_space<vmem>>, vector<32x128xf32>
    %610 = arith.truncf %608 : vector<1x32xf32> to vector<1x32xbf16>
    %611 = arith.truncf %609 : vector<32x128xf32> to vector<32x128xbf16>
    %cst_199 = arith.constant dense<0.000000e+00> : vector<1x128xf32>
    %612 = tpu.matmul %610, %611, %cst_199 {dimension_numbers = #tpu.dot_dimension_numbers<[1], [0], [0], [1], [0, 0, 1, 1], [], []>} : vector<1x32xbf16>, vector<32x128xbf16>, vector<1x128xf32> -> vector<1x128xf32>
    %c152_200 = arith.constant 152 : index
    %c0_201 = arith.constant 0 : index
    %613 = vector.load %arg2[%c152_200, %c0_201] : memref<416x128xf32, #tpu.memory_space<vmem>>, vector<32x128xf32>
    %614 = arith.truncf %555 : vector<1x32xf32> to vector<1x32xbf16>
    %615 = arith.truncf %613 : vector<32x128xf32> to vector<32x128xbf16>
    %cst_202 = arith.constant dense<0.000000e+00> : vector<1x128xf32>
    %616 = tpu.matmul %614, %615, %cst_202 {dimension_numbers = #tpu.dot_dimension_numbers<[1], [0], [0], [1], [0, 0, 1, 1], [], []>} : vector<1x32xbf16>, vector<32x128xbf16>, vector<1x128xf32> -> vector<1x128xf32>
    %617 = arith.addf %612, %616 : vector<1x128xf32>
    %c184_203 = arith.constant 184 : index
    %c0_204 = arith.constant 0 : index
    %618 = vector.load %arg2[%c184_203, %c0_204] : memref<416x128xf32, #tpu.memory_space<vmem>>, vector<1x128xf32>
    %619 = arith.addf %617, %618 : vector<1x128xf32>
    %620 = arith.negf %619 : vector<1x128xf32>
    %621 = math.exp %620 : vector<1x128xf32>
    %cst_205 = arith.constant 1.000000e+00 : f32
    %622 = vector.broadcast %cst_205 : f32 to vector<1x128xf32>
    %623 = arith.addf %622, %621 : vector<1x128xf32>
    %624 = arith.divf %622, %623 : vector<1x128xf32>
    %625 = math.tanh %619 : vector<1x128xf32>
    %626 = vector.extract_strided_slice %624 {offsets = [0, 0], sizes = [1, 32], strides = [1, 1]} : vector<1x128xf32> to vector<1x32xf32>
    %627 = vector.extract_strided_slice %624 {offsets = [0, 32], sizes = [1, 32], strides = [1, 1]} : vector<1x128xf32> to vector<1x32xf32>
    %628 = vector.extract_strided_slice %625 {offsets = [0, 64], sizes = [1, 32], strides = [1, 1]} : vector<1x128xf32> to vector<1x32xf32>
    %629 = vector.extract_strided_slice %624 {offsets = [0, 96], sizes = [1, 32], strides = [1, 1]} : vector<1x128xf32> to vector<1x32xf32>
    %630 = arith.mulf %627, %553 : vector<1x32xf32>
    %631 = arith.mulf %626, %628 : vector<1x32xf32>
    %632 = arith.addf %630, %631 : vector<1x32xf32>
    %633 = math.tanh %632 : vector<1x32xf32>
    %634 = arith.mulf %629, %633 : vector<1x32xf32>
    %c32_206 = arith.constant 32 : index
    %c0_207 = arith.constant 0 : index
    %635 = vector.load %arg3[%c32_206, %c0_207] : memref<104x32xf32, #tpu.memory_space<vmem>>, vector<32x32xf32>
    %636 = arith.truncf %634 : vector<1x32xf32> to vector<1x32xbf16>
    %637 = arith.truncf %635 : vector<32x32xf32> to vector<32x32xbf16>
    %cst_208 = arith.constant dense<0.000000e+00> : vector<1x32xf32>
    %638 = tpu.matmul %636, %637, %cst_208 {dimension_numbers = #tpu.dot_dimension_numbers<[1], [0], [0], [1], [0, 0, 1, 1], [], []>} : vector<1x32xbf16>, vector<32x32xbf16>, vector<1x32xf32> -> vector<1x32xf32>
    %c64_209 = arith.constant 64 : index
    %c0_210 = arith.constant 0 : index
    %639 = vector.load %arg3[%c64_209, %c0_210] : memref<104x32xf32, #tpu.memory_space<vmem>>, vector<1x32xf32>
    %640 = arith.addf %638, %639 : vector<1x32xf32>
    %641 = tpu.concatenate %81, %160, %239, %318, %397, %476, %555, %634 in 0 : vector<1x32xf32>, vector<1x32xf32>, vector<1x32xf32>, vector<1x32xf32>, vector<1x32xf32>, vector<1x32xf32>, vector<1x32xf32>, vector<1x32xf32> -> vector<8x32xf32>
    %642 = tpu.concatenate %87, %166, %245, %324, %403, %482, %561, %640 in 0 : vector<1x32xf32>, vector<1x32xf32>, vector<1x32xf32>, vector<1x32xf32>, vector<1x32xf32>, vector<1x32xf32>, vector<1x32xf32>, vector<1x32xf32> -> vector<8x32xf32>
    %643 = arith.truncf %641 : vector<8x32xf32> to vector<8x32xbf16>
    %c96 = arith.constant 96 : index
    %c0_211 = arith.constant 0 : index
    %644 = vector.load %arg3[%c96, %c0_211] : memref<104x32xf32, #tpu.memory_space<vmem>>, vector<1x32xf32>
    %645 = vector.extract_strided_slice %644 {offsets = [0, 0], sizes = [1, 1], strides = [1, 1]} : vector<1x32xf32> to vector<1x1xf32>
    %c0_212 = arith.constant 0 : index
    %c0_213 = arith.constant 0 : index
    %646 = vector.load %arg1[%c0_212, %c0_213] : memref<1x1xf32, #tpu.memory_space<vmem>>, vector<1x1xf32>
    %c0_214 = arith.constant 0 : index
    %c0_215 = arith.constant 0 : index
    %647 = vector.load %arg3[%c0_214, %c0_215] : memref<104x32xf32, #tpu.memory_space<vmem>>, vector<32x32xf32>
    %648 = arith.truncf %634 : vector<1x32xf32> to vector<1x32xbf16>
    %649 = arith.truncf %647 : vector<32x32xf32> to vector<32x32xbf16>
    %cst_216 = arith.constant dense<0.000000e+00> : vector<1x32xf32>
    %650 = tpu.matmul %648, %649, %cst_216 {dimension_numbers = #tpu.dot_dimension_numbers<[1], [0], [0], [1], [0, 0, 1, 1], [], []>} : vector<1x32xbf16>, vector<32x32xbf16>, vector<1x32xf32> -> vector<1x32xf32>
    %651 = vector.broadcast %650 : vector<1x32xf32> to vector<8x32xf32>
    %652 = arith.addf %651, %642 : vector<8x32xf32>
    %653 = math.tanh %652 : vector<8x32xf32>
    %c72 = arith.constant 72 : index
    %c0_217 = arith.constant 0 : index
    %654 = vector.load %arg3[%c72, %c0_217] : memref<104x32xf32, #tpu.memory_space<vmem>>, vector<1x32xf32>
    %cst_218 = arith.constant dense<0.000000e+00> : vector<1x8xf32>
    %655 = tpu.matmul %654, %653, %cst_218 {dimension_numbers = #tpu.dot_dimension_numbers<[1], [1], [0], [0], [0, 0, 1, 0], [], []>} : vector<1x32xf32>, vector<8x32xf32>, vector<1x8xf32> -> vector<1x8xf32>
    %cst_219 = arith.constant dense<0xFF800000> : vector<1xf32>
    %656 = vector.multi_reduction <maximumf>, %655, %cst_219 [1] : vector<1x8xf32> to vector<1xf32>
    %657 = vector.shape_cast %656 : vector<1xf32> to vector<1x1xf32>
    %658 = vector.broadcast %657 : vector<1x1xf32> to vector<1x8xf32>
    %659 = arith.subf %655, %658 : vector<1x8xf32>
    %660 = math.exp %659 : vector<1x8xf32>
    %cst_220 = arith.constant dense<0.000000e+00> : vector<1xf32>
    %661 = vector.multi_reduction <add>, %660, %cst_220 [1] : vector<1x8xf32> to vector<1xf32>
    %662 = vector.shape_cast %661 : vector<1xf32> to vector<1x1xf32>
    %663 = tpu.reciprocal %662 {approx = true} : vector<1x1xf32> -> vector<1x1xf32>
    %664 = vector.broadcast %663 : vector<1x1xf32> to vector<1x8xf32>
    %665 = arith.mulf %660, %664 : vector<1x8xf32>
    %666 = arith.truncf %665 : vector<1x8xf32> to vector<1x8xbf16>
    %cst_221 = arith.constant dense<0.000000e+00> : vector<1x32xf32>
    %667 = tpu.matmul %666, %643, %cst_221 {dimension_numbers = #tpu.dot_dimension_numbers<[1], [0], [0], [1], [0, 0, 1, 1], [], []>} : vector<1x8xbf16>, vector<8x32xbf16>, vector<1x32xf32> -> vector<1x32xf32>
    %c192 = arith.constant 192 : index
    %c0_222 = arith.constant 0 : index
    %668 = vector.load %arg2[%c192, %c0_222] : memref<416x128xf32, #tpu.memory_space<vmem>>, vector<1x128xf32>
    %669 = vector.broadcast %646 : vector<1x1xf32> to vector<1x128xf32>
    %670 = arith.mulf %669, %668 : vector<1x128xf32>
    %c208 = arith.constant 208 : index
    %c0_223 = arith.constant 0 : index
    %671 = vector.load %arg2[%c208, %c0_223] : memref<416x128xf32, #tpu.memory_space<vmem>>, vector<32x128xf32>
    %672 = arith.truncf %667 : vector<1x32xf32> to vector<1x32xbf16>
    %673 = arith.truncf %671 : vector<32x128xf32> to vector<32x128xbf16>
    %cst_224 = arith.constant dense<0.000000e+00> : vector<1x128xf32>
    %674 = tpu.matmul %672, %673, %cst_224 {dimension_numbers = #tpu.dot_dimension_numbers<[1], [0], [0], [1], [0, 0, 1, 1], [], []>} : vector<1x32xbf16>, vector<32x128xbf16>, vector<1x128xf32> -> vector<1x128xf32>
    %675 = arith.addf %670, %674 : vector<1x128xf32>
    %c240 = arith.constant 240 : index
    %c0_225 = arith.constant 0 : index
    %676 = vector.load %arg2[%c240, %c0_225] : memref<416x128xf32, #tpu.memory_space<vmem>>, vector<32x128xf32>
    %677 = arith.truncf %582 : vector<1x32xf32> to vector<1x32xbf16>
    %678 = arith.truncf %676 : vector<32x128xf32> to vector<32x128xbf16>
    %cst_226 = arith.constant dense<0.000000e+00> : vector<1x128xf32>
    %679 = tpu.matmul %677, %678, %cst_226 {dimension_numbers = #tpu.dot_dimension_numbers<[1], [0], [0], [1], [0, 0, 1, 1], [], []>} : vector<1x32xbf16>, vector<32x128xbf16>, vector<1x128xf32> -> vector<1x128xf32>
    %680 = arith.addf %675, %679 : vector<1x128xf32>
    %c200 = arith.constant 200 : index
    %c0_227 = arith.constant 0 : index
    %681 = vector.load %arg2[%c200, %c0_227] : memref<416x128xf32, #tpu.memory_space<vmem>>, vector<1x128xf32>
    %682 = arith.addf %680, %681 : vector<1x128xf32>
    %683 = arith.negf %682 : vector<1x128xf32>
    %684 = math.exp %683 : vector<1x128xf32>
    %cst_228 = arith.constant 1.000000e+00 : f32
    %685 = vector.broadcast %cst_228 : f32 to vector<1x128xf32>
    %686 = arith.addf %685, %684 : vector<1x128xf32>
    %687 = arith.divf %685, %686 : vector<1x128xf32>
    %688 = math.tanh %682 : vector<1x128xf32>
    %689 = vector.extract_strided_slice %687 {offsets = [0, 0], sizes = [1, 32], strides = [1, 1]} : vector<1x128xf32> to vector<1x32xf32>
    %690 = vector.extract_strided_slice %687 {offsets = [0, 32], sizes = [1, 32], strides = [1, 1]} : vector<1x128xf32> to vector<1x32xf32>
    %691 = vector.extract_strided_slice %688 {offsets = [0, 64], sizes = [1, 32], strides = [1, 1]} : vector<1x128xf32> to vector<1x32xf32>
    %692 = vector.extract_strided_slice %687 {offsets = [0, 96], sizes = [1, 32], strides = [1, 1]} : vector<1x128xf32> to vector<1x32xf32>
    %693 = arith.mulf %690, %580 : vector<1x32xf32>
    %694 = arith.mulf %689, %691 : vector<1x32xf32>
    %695 = arith.addf %693, %694 : vector<1x32xf32>
    %696 = math.tanh %695 : vector<1x32xf32>
    %697 = arith.mulf %692, %696 : vector<1x32xf32>
    %c272 = arith.constant 272 : index
    %c0_229 = arith.constant 0 : index
    %698 = vector.load %arg2[%c272, %c0_229] : memref<416x128xf32, #tpu.memory_space<vmem>>, vector<32x128xf32>
    %699 = arith.truncf %697 : vector<1x32xf32> to vector<1x32xbf16>
    %700 = arith.truncf %698 : vector<32x128xf32> to vector<32x128xbf16>
    %cst_230 = arith.constant dense<0.000000e+00> : vector<1x128xf32>
    %701 = tpu.matmul %699, %700, %cst_230 {dimension_numbers = #tpu.dot_dimension_numbers<[1], [0], [0], [1], [0, 0, 1, 1], [], []>} : vector<1x32xbf16>, vector<32x128xbf16>, vector<1x128xf32> -> vector<1x128xf32>
    %c304 = arith.constant 304 : index
    %c0_231 = arith.constant 0 : index
    %702 = vector.load %arg2[%c304, %c0_231] : memref<416x128xf32, #tpu.memory_space<vmem>>, vector<32x128xf32>
    %703 = arith.truncf %608 : vector<1x32xf32> to vector<1x32xbf16>
    %704 = arith.truncf %702 : vector<32x128xf32> to vector<32x128xbf16>
    %cst_232 = arith.constant dense<0.000000e+00> : vector<1x128xf32>
    %705 = tpu.matmul %703, %704, %cst_232 {dimension_numbers = #tpu.dot_dimension_numbers<[1], [0], [0], [1], [0, 0, 1, 1], [], []>} : vector<1x32xbf16>, vector<32x128xbf16>, vector<1x128xf32> -> vector<1x128xf32>
    %706 = arith.addf %701, %705 : vector<1x128xf32>
    %c336 = arith.constant 336 : index
    %c0_233 = arith.constant 0 : index
    %707 = vector.load %arg2[%c336, %c0_233] : memref<416x128xf32, #tpu.memory_space<vmem>>, vector<1x128xf32>
    %708 = arith.addf %706, %707 : vector<1x128xf32>
    %709 = arith.negf %708 : vector<1x128xf32>
    %710 = math.exp %709 : vector<1x128xf32>
    %cst_234 = arith.constant 1.000000e+00 : f32
    %711 = vector.broadcast %cst_234 : f32 to vector<1x128xf32>
    %712 = arith.addf %711, %710 : vector<1x128xf32>
    %713 = arith.divf %711, %712 : vector<1x128xf32>
    %714 = math.tanh %708 : vector<1x128xf32>
    %715 = vector.extract_strided_slice %713 {offsets = [0, 0], sizes = [1, 32], strides = [1, 1]} : vector<1x128xf32> to vector<1x32xf32>
    %716 = vector.extract_strided_slice %713 {offsets = [0, 32], sizes = [1, 32], strides = [1, 1]} : vector<1x128xf32> to vector<1x32xf32>
    %717 = vector.extract_strided_slice %714 {offsets = [0, 64], sizes = [1, 32], strides = [1, 1]} : vector<1x128xf32> to vector<1x32xf32>
    %718 = vector.extract_strided_slice %713 {offsets = [0, 96], sizes = [1, 32], strides = [1, 1]} : vector<1x128xf32> to vector<1x32xf32>
    %719 = arith.mulf %716, %606 : vector<1x32xf32>
    %720 = arith.mulf %715, %717 : vector<1x32xf32>
    %721 = arith.addf %719, %720 : vector<1x32xf32>
    %722 = math.tanh %721 : vector<1x32xf32>
    %723 = arith.mulf %718, %722 : vector<1x32xf32>
    %c344 = arith.constant 344 : index
    %c0_235 = arith.constant 0 : index
    %724 = vector.load %arg2[%c344, %c0_235] : memref<416x128xf32, #tpu.memory_space<vmem>>, vector<32x128xf32>
    %725 = arith.truncf %723 : vector<1x32xf32> to vector<1x32xbf16>
    %726 = arith.truncf %724 : vector<32x128xf32> to vector<32x128xbf16>
    %cst_236 = arith.constant dense<0.000000e+00> : vector<1x128xf32>
    %727 = tpu.matmul %725, %726, %cst_236 {dimension_numbers = #tpu.dot_dimension_numbers<[1], [0], [0], [1], [0, 0, 1, 1], [], []>} : vector<1x32xbf16>, vector<32x128xbf16>, vector<1x128xf32> -> vector<1x128xf32>
    %c376 = arith.constant 376 : index
    %c0_237 = arith.constant 0 : index
    %728 = vector.load %arg2[%c376, %c0_237] : memref<416x128xf32, #tpu.memory_space<vmem>>, vector<32x128xf32>
    %729 = arith.truncf %634 : vector<1x32xf32> to vector<1x32xbf16>
    %730 = arith.truncf %728 : vector<32x128xf32> to vector<32x128xbf16>
    %cst_238 = arith.constant dense<0.000000e+00> : vector<1x128xf32>
    %731 = tpu.matmul %729, %730, %cst_238 {dimension_numbers = #tpu.dot_dimension_numbers<[1], [0], [0], [1], [0, 0, 1, 1], [], []>} : vector<1x32xbf16>, vector<32x128xbf16>, vector<1x128xf32> -> vector<1x128xf32>
    %732 = arith.addf %727, %731 : vector<1x128xf32>
    %c408 = arith.constant 408 : index
    %c0_239 = arith.constant 0 : index
    %733 = vector.load %arg2[%c408, %c0_239] : memref<416x128xf32, #tpu.memory_space<vmem>>, vector<1x128xf32>
    %734 = arith.addf %732, %733 : vector<1x128xf32>
    %735 = arith.negf %734 : vector<1x128xf32>
    %736 = math.exp %735 : vector<1x128xf32>
    %cst_240 = arith.constant 1.000000e+00 : f32
    %737 = vector.broadcast %cst_240 : f32 to vector<1x128xf32>
    %738 = arith.addf %737, %736 : vector<1x128xf32>
    %739 = arith.divf %737, %738 : vector<1x128xf32>
    %740 = math.tanh %734 : vector<1x128xf32>
    %741 = vector.extract_strided_slice %739 {offsets = [0, 0], sizes = [1, 32], strides = [1, 1]} : vector<1x128xf32> to vector<1x32xf32>
    %742 = vector.extract_strided_slice %739 {offsets = [0, 32], sizes = [1, 32], strides = [1, 1]} : vector<1x128xf32> to vector<1x32xf32>
    %743 = vector.extract_strided_slice %740 {offsets = [0, 64], sizes = [1, 32], strides = [1, 1]} : vector<1x128xf32> to vector<1x32xf32>
    %744 = vector.extract_strided_slice %739 {offsets = [0, 96], sizes = [1, 32], strides = [1, 1]} : vector<1x128xf32> to vector<1x32xf32>
    %745 = arith.mulf %742, %632 : vector<1x32xf32>
    %746 = arith.mulf %741, %743 : vector<1x32xf32>
    %747 = arith.addf %745, %746 : vector<1x32xf32>
    %748 = math.tanh %747 : vector<1x32xf32>
    %749 = arith.mulf %744, %748 : vector<1x32xf32>
    %c80_241 = arith.constant 80 : index
    %c0_242 = arith.constant 0 : index
    %750 = vector.load %arg3[%c80_241, %c0_242] : memref<104x32xf32, #tpu.memory_space<vmem>>, vector<1x32xf32>
    %751 = arith.mulf %749, %750 : vector<1x32xf32>
    %c88 = arith.constant 88 : index
    %c0_243 = arith.constant 0 : index
    %752 = vector.load %arg3[%c88, %c0_243] : memref<104x32xf32, #tpu.memory_space<vmem>>, vector<1x32xf32>
    %753 = arith.mulf %667, %752 : vector<1x32xf32>
    %754 = arith.addf %751, %753 : vector<1x32xf32>
    %cst_244 = arith.constant dense<0.000000e+00> : vector<1xf32>
    %755 = vector.multi_reduction <add>, %754, %cst_244 [1] : vector<1x32xf32> to vector<1xf32>
    %756 = vector.shape_cast %755 : vector<1xf32> to vector<1x1xf32>
    %757 = arith.addf %756, %645 : vector<1x1xf32>
    %c0_245 = arith.constant 0 : index
    %c0_246 = arith.constant 0 : index
    %758 = vector.load %arg3[%c0_245, %c0_246] : memref<104x32xf32, #tpu.memory_space<vmem>>, vector<32x32xf32>
    %759 = arith.truncf %749 : vector<1x32xf32> to vector<1x32xbf16>
    %760 = arith.truncf %758 : vector<32x32xf32> to vector<32x32xbf16>
    %cst_247 = arith.constant dense<0.000000e+00> : vector<1x32xf32>
    %761 = tpu.matmul %759, %760, %cst_247 {dimension_numbers = #tpu.dot_dimension_numbers<[1], [0], [0], [1], [0, 0, 1, 1], [], []>} : vector<1x32xbf16>, vector<32x32xbf16>, vector<1x32xf32> -> vector<1x32xf32>
    %762 = vector.broadcast %761 : vector<1x32xf32> to vector<8x32xf32>
    %763 = arith.addf %762, %642 : vector<8x32xf32>
    %764 = math.tanh %763 : vector<8x32xf32>
    %c72_248 = arith.constant 72 : index
    %c0_249 = arith.constant 0 : index
    %765 = vector.load %arg3[%c72_248, %c0_249] : memref<104x32xf32, #tpu.memory_space<vmem>>, vector<1x32xf32>
    %cst_250 = arith.constant dense<0.000000e+00> : vector<1x8xf32>
    %766 = tpu.matmul %765, %764, %cst_250 {dimension_numbers = #tpu.dot_dimension_numbers<[1], [1], [0], [0], [0, 0, 1, 0], [], []>} : vector<1x32xf32>, vector<8x32xf32>, vector<1x8xf32> -> vector<1x8xf32>
    %cst_251 = arith.constant dense<0xFF800000> : vector<1xf32>
    %767 = vector.multi_reduction <maximumf>, %766, %cst_251 [1] : vector<1x8xf32> to vector<1xf32>
    %768 = vector.shape_cast %767 : vector<1xf32> to vector<1x1xf32>
    %769 = vector.broadcast %768 : vector<1x1xf32> to vector<1x8xf32>
    %770 = arith.subf %766, %769 : vector<1x8xf32>
    %771 = math.exp %770 : vector<1x8xf32>
    %cst_252 = arith.constant dense<0.000000e+00> : vector<1xf32>
    %772 = vector.multi_reduction <add>, %771, %cst_252 [1] : vector<1x8xf32> to vector<1xf32>
    %773 = vector.shape_cast %772 : vector<1xf32> to vector<1x1xf32>
    %774 = tpu.reciprocal %773 {approx = true} : vector<1x1xf32> -> vector<1x1xf32>
    %775 = vector.broadcast %774 : vector<1x1xf32> to vector<1x8xf32>
    %776 = arith.mulf %771, %775 : vector<1x8xf32>
    %777 = arith.truncf %776 : vector<1x8xf32> to vector<1x8xbf16>
    %cst_253 = arith.constant dense<0.000000e+00> : vector<1x32xf32>
    %778 = tpu.matmul %777, %643, %cst_253 {dimension_numbers = #tpu.dot_dimension_numbers<[1], [0], [0], [1], [0, 0, 1, 1], [], []>} : vector<1x8xbf16>, vector<8x32xbf16>, vector<1x32xf32> -> vector<1x32xf32>
    %c192_254 = arith.constant 192 : index
    %c0_255 = arith.constant 0 : index
    %779 = vector.load %arg2[%c192_254, %c0_255] : memref<416x128xf32, #tpu.memory_space<vmem>>, vector<1x128xf32>
    %780 = vector.broadcast %757 : vector<1x1xf32> to vector<1x128xf32>
    %781 = arith.mulf %780, %779 : vector<1x128xf32>
    %c208_256 = arith.constant 208 : index
    %c0_257 = arith.constant 0 : index
    %782 = vector.load %arg2[%c208_256, %c0_257] : memref<416x128xf32, #tpu.memory_space<vmem>>, vector<32x128xf32>
    %783 = arith.truncf %778 : vector<1x32xf32> to vector<1x32xbf16>
    %784 = arith.truncf %782 : vector<32x128xf32> to vector<32x128xbf16>
    %cst_258 = arith.constant dense<0.000000e+00> : vector<1x128xf32>
    %785 = tpu.matmul %783, %784, %cst_258 {dimension_numbers = #tpu.dot_dimension_numbers<[1], [0], [0], [1], [0, 0, 1, 1], [], []>} : vector<1x32xbf16>, vector<32x128xbf16>, vector<1x128xf32> -> vector<1x128xf32>
    %786 = arith.addf %781, %785 : vector<1x128xf32>
    %c240_259 = arith.constant 240 : index
    %c0_260 = arith.constant 0 : index
    %787 = vector.load %arg2[%c240_259, %c0_260] : memref<416x128xf32, #tpu.memory_space<vmem>>, vector<32x128xf32>
    %788 = arith.truncf %697 : vector<1x32xf32> to vector<1x32xbf16>
    %789 = arith.truncf %787 : vector<32x128xf32> to vector<32x128xbf16>
    %cst_261 = arith.constant dense<0.000000e+00> : vector<1x128xf32>
    %790 = tpu.matmul %788, %789, %cst_261 {dimension_numbers = #tpu.dot_dimension_numbers<[1], [0], [0], [1], [0, 0, 1, 1], [], []>} : vector<1x32xbf16>, vector<32x128xbf16>, vector<1x128xf32> -> vector<1x128xf32>
    %791 = arith.addf %786, %790 : vector<1x128xf32>
    %c200_262 = arith.constant 200 : index
    %c0_263 = arith.constant 0 : index
    %792 = vector.load %arg2[%c200_262, %c0_263] : memref<416x128xf32, #tpu.memory_space<vmem>>, vector<1x128xf32>
    %793 = arith.addf %791, %792 : vector<1x128xf32>
    %794 = arith.negf %793 : vector<1x128xf32>
    %795 = math.exp %794 : vector<1x128xf32>
    %cst_264 = arith.constant 1.000000e+00 : f32
    %796 = vector.broadcast %cst_264 : f32 to vector<1x128xf32>
    %797 = arith.addf %796, %795 : vector<1x128xf32>
    %798 = arith.divf %796, %797 : vector<1x128xf32>
    %799 = math.tanh %793 : vector<1x128xf32>
    %800 = vector.extract_strided_slice %798 {offsets = [0, 0], sizes = [1, 32], strides = [1, 1]} : vector<1x128xf32> to vector<1x32xf32>
    %801 = vector.extract_strided_slice %798 {offsets = [0, 32], sizes = [1, 32], strides = [1, 1]} : vector<1x128xf32> to vector<1x32xf32>
    %802 = vector.extract_strided_slice %799 {offsets = [0, 64], sizes = [1, 32], strides = [1, 1]} : vector<1x128xf32> to vector<1x32xf32>
    %803 = vector.extract_strided_slice %798 {offsets = [0, 96], sizes = [1, 32], strides = [1, 1]} : vector<1x128xf32> to vector<1x32xf32>
    %804 = arith.mulf %801, %695 : vector<1x32xf32>
    %805 = arith.mulf %800, %802 : vector<1x32xf32>
    %806 = arith.addf %804, %805 : vector<1x32xf32>
    %807 = math.tanh %806 : vector<1x32xf32>
    %808 = arith.mulf %803, %807 : vector<1x32xf32>
    %c272_265 = arith.constant 272 : index
    %c0_266 = arith.constant 0 : index
    %809 = vector.load %arg2[%c272_265, %c0_266] : memref<416x128xf32, #tpu.memory_space<vmem>>, vector<32x128xf32>
    %810 = arith.truncf %808 : vector<1x32xf32> to vector<1x32xbf16>
    %811 = arith.truncf %809 : vector<32x128xf32> to vector<32x128xbf16>
    %cst_267 = arith.constant dense<0.000000e+00> : vector<1x128xf32>
    %812 = tpu.matmul %810, %811, %cst_267 {dimension_numbers = #tpu.dot_dimension_numbers<[1], [0], [0], [1], [0, 0, 1, 1], [], []>} : vector<1x32xbf16>, vector<32x128xbf16>, vector<1x128xf32> -> vector<1x128xf32>
    %c304_268 = arith.constant 304 : index
    %c0_269 = arith.constant 0 : index
    %813 = vector.load %arg2[%c304_268, %c0_269] : memref<416x128xf32, #tpu.memory_space<vmem>>, vector<32x128xf32>
    %814 = arith.truncf %723 : vector<1x32xf32> to vector<1x32xbf16>
    %815 = arith.truncf %813 : vector<32x128xf32> to vector<32x128xbf16>
    %cst_270 = arith.constant dense<0.000000e+00> : vector<1x128xf32>
    %816 = tpu.matmul %814, %815, %cst_270 {dimension_numbers = #tpu.dot_dimension_numbers<[1], [0], [0], [1], [0, 0, 1, 1], [], []>} : vector<1x32xbf16>, vector<32x128xbf16>, vector<1x128xf32> -> vector<1x128xf32>
    %817 = arith.addf %812, %816 : vector<1x128xf32>
    %c336_271 = arith.constant 336 : index
    %c0_272 = arith.constant 0 : index
    %818 = vector.load %arg2[%c336_271, %c0_272] : memref<416x128xf32, #tpu.memory_space<vmem>>, vector<1x128xf32>
    %819 = arith.addf %817, %818 : vector<1x128xf32>
    %820 = arith.negf %819 : vector<1x128xf32>
    %821 = math.exp %820 : vector<1x128xf32>
    %cst_273 = arith.constant 1.000000e+00 : f32
    %822 = vector.broadcast %cst_273 : f32 to vector<1x128xf32>
    %823 = arith.addf %822, %821 : vector<1x128xf32>
    %824 = arith.divf %822, %823 : vector<1x128xf32>
    %825 = math.tanh %819 : vector<1x128xf32>
    %826 = vector.extract_strided_slice %824 {offsets = [0, 0], sizes = [1, 32], strides = [1, 1]} : vector<1x128xf32> to vector<1x32xf32>
    %827 = vector.extract_strided_slice %824 {offsets = [0, 32], sizes = [1, 32], strides = [1, 1]} : vector<1x128xf32> to vector<1x32xf32>
    %828 = vector.extract_strided_slice %825 {offsets = [0, 64], sizes = [1, 32], strides = [1, 1]} : vector<1x128xf32> to vector<1x32xf32>
    %829 = vector.extract_strided_slice %824 {offsets = [0, 96], sizes = [1, 32], strides = [1, 1]} : vector<1x128xf32> to vector<1x32xf32>
    %830 = arith.mulf %827, %721 : vector<1x32xf32>
    %831 = arith.mulf %826, %828 : vector<1x32xf32>
    %832 = arith.addf %830, %831 : vector<1x32xf32>
    %833 = math.tanh %832 : vector<1x32xf32>
    %834 = arith.mulf %829, %833 : vector<1x32xf32>
    %c344_274 = arith.constant 344 : index
    %c0_275 = arith.constant 0 : index
    %835 = vector.load %arg2[%c344_274, %c0_275] : memref<416x128xf32, #tpu.memory_space<vmem>>, vector<32x128xf32>
    %836 = arith.truncf %834 : vector<1x32xf32> to vector<1x32xbf16>
    %837 = arith.truncf %835 : vector<32x128xf32> to vector<32x128xbf16>
    %cst_276 = arith.constant dense<0.000000e+00> : vector<1x128xf32>
    %838 = tpu.matmul %836, %837, %cst_276 {dimension_numbers = #tpu.dot_dimension_numbers<[1], [0], [0], [1], [0, 0, 1, 1], [], []>} : vector<1x32xbf16>, vector<32x128xbf16>, vector<1x128xf32> -> vector<1x128xf32>
    %c376_277 = arith.constant 376 : index
    %c0_278 = arith.constant 0 : index
    %839 = vector.load %arg2[%c376_277, %c0_278] : memref<416x128xf32, #tpu.memory_space<vmem>>, vector<32x128xf32>
    %840 = arith.truncf %749 : vector<1x32xf32> to vector<1x32xbf16>
    %841 = arith.truncf %839 : vector<32x128xf32> to vector<32x128xbf16>
    %cst_279 = arith.constant dense<0.000000e+00> : vector<1x128xf32>
    %842 = tpu.matmul %840, %841, %cst_279 {dimension_numbers = #tpu.dot_dimension_numbers<[1], [0], [0], [1], [0, 0, 1, 1], [], []>} : vector<1x32xbf16>, vector<32x128xbf16>, vector<1x128xf32> -> vector<1x128xf32>
    %843 = arith.addf %838, %842 : vector<1x128xf32>
    %c408_280 = arith.constant 408 : index
    %c0_281 = arith.constant 0 : index
    %844 = vector.load %arg2[%c408_280, %c0_281] : memref<416x128xf32, #tpu.memory_space<vmem>>, vector<1x128xf32>
    %845 = arith.addf %843, %844 : vector<1x128xf32>
    %846 = arith.negf %845 : vector<1x128xf32>
    %847 = math.exp %846 : vector<1x128xf32>
    %cst_282 = arith.constant 1.000000e+00 : f32
    %848 = vector.broadcast %cst_282 : f32 to vector<1x128xf32>
    %849 = arith.addf %848, %847 : vector<1x128xf32>
    %850 = arith.divf %848, %849 : vector<1x128xf32>
    %851 = math.tanh %845 : vector<1x128xf32>
    %852 = vector.extract_strided_slice %850 {offsets = [0, 0], sizes = [1, 32], strides = [1, 1]} : vector<1x128xf32> to vector<1x32xf32>
    %853 = vector.extract_strided_slice %850 {offsets = [0, 32], sizes = [1, 32], strides = [1, 1]} : vector<1x128xf32> to vector<1x32xf32>
    %854 = vector.extract_strided_slice %851 {offsets = [0, 64], sizes = [1, 32], strides = [1, 1]} : vector<1x128xf32> to vector<1x32xf32>
    %855 = vector.extract_strided_slice %850 {offsets = [0, 96], sizes = [1, 32], strides = [1, 1]} : vector<1x128xf32> to vector<1x32xf32>
    %856 = arith.mulf %853, %747 : vector<1x32xf32>
    %857 = arith.mulf %852, %854 : vector<1x32xf32>
    %858 = arith.addf %856, %857 : vector<1x32xf32>
    %859 = math.tanh %858 : vector<1x32xf32>
    %860 = arith.mulf %855, %859 : vector<1x32xf32>
    %c80_283 = arith.constant 80 : index
    %c0_284 = arith.constant 0 : index
    %861 = vector.load %arg3[%c80_283, %c0_284] : memref<104x32xf32, #tpu.memory_space<vmem>>, vector<1x32xf32>
    %862 = arith.mulf %860, %861 : vector<1x32xf32>
    %c88_285 = arith.constant 88 : index
    %c0_286 = arith.constant 0 : index
    %863 = vector.load %arg3[%c88_285, %c0_286] : memref<104x32xf32, #tpu.memory_space<vmem>>, vector<1x32xf32>
    %864 = arith.mulf %778, %863 : vector<1x32xf32>
    %865 = arith.addf %862, %864 : vector<1x32xf32>
    %cst_287 = arith.constant dense<0.000000e+00> : vector<1xf32>
    %866 = vector.multi_reduction <add>, %865, %cst_287 [1] : vector<1x32xf32> to vector<1xf32>
    %867 = vector.shape_cast %866 : vector<1xf32> to vector<1x1xf32>
    %868 = arith.addf %867, %645 : vector<1x1xf32>
    %c0_288 = arith.constant 0 : index
    %c0_289 = arith.constant 0 : index
    %869 = vector.load %arg3[%c0_288, %c0_289] : memref<104x32xf32, #tpu.memory_space<vmem>>, vector<32x32xf32>
    %870 = arith.truncf %860 : vector<1x32xf32> to vector<1x32xbf16>
    %871 = arith.truncf %869 : vector<32x32xf32> to vector<32x32xbf16>
    %cst_290 = arith.constant dense<0.000000e+00> : vector<1x32xf32>
    %872 = tpu.matmul %870, %871, %cst_290 {dimension_numbers = #tpu.dot_dimension_numbers<[1], [0], [0], [1], [0, 0, 1, 1], [], []>} : vector<1x32xbf16>, vector<32x32xbf16>, vector<1x32xf32> -> vector<1x32xf32>
    %873 = vector.broadcast %872 : vector<1x32xf32> to vector<8x32xf32>
    %874 = arith.addf %873, %642 : vector<8x32xf32>
    %875 = math.tanh %874 : vector<8x32xf32>
    %c72_291 = arith.constant 72 : index
    %c0_292 = arith.constant 0 : index
    %876 = vector.load %arg3[%c72_291, %c0_292] : memref<104x32xf32, #tpu.memory_space<vmem>>, vector<1x32xf32>
    %cst_293 = arith.constant dense<0.000000e+00> : vector<1x8xf32>
    %877 = tpu.matmul %876, %875, %cst_293 {dimension_numbers = #tpu.dot_dimension_numbers<[1], [1], [0], [0], [0, 0, 1, 0], [], []>} : vector<1x32xf32>, vector<8x32xf32>, vector<1x8xf32> -> vector<1x8xf32>
    %cst_294 = arith.constant dense<0xFF800000> : vector<1xf32>
    %878 = vector.multi_reduction <maximumf>, %877, %cst_294 [1] : vector<1x8xf32> to vector<1xf32>
    %879 = vector.shape_cast %878 : vector<1xf32> to vector<1x1xf32>
    %880 = vector.broadcast %879 : vector<1x1xf32> to vector<1x8xf32>
    %881 = arith.subf %877, %880 : vector<1x8xf32>
    %882 = math.exp %881 : vector<1x8xf32>
    %cst_295 = arith.constant dense<0.000000e+00> : vector<1xf32>
    %883 = vector.multi_reduction <add>, %882, %cst_295 [1] : vector<1x8xf32> to vector<1xf32>
    %884 = vector.shape_cast %883 : vector<1xf32> to vector<1x1xf32>
    %885 = tpu.reciprocal %884 {approx = true} : vector<1x1xf32> -> vector<1x1xf32>
    %886 = vector.broadcast %885 : vector<1x1xf32> to vector<1x8xf32>
    %887 = arith.mulf %882, %886 : vector<1x8xf32>
    %888 = arith.truncf %887 : vector<1x8xf32> to vector<1x8xbf16>
    %cst_296 = arith.constant dense<0.000000e+00> : vector<1x32xf32>
    %889 = tpu.matmul %888, %643, %cst_296 {dimension_numbers = #tpu.dot_dimension_numbers<[1], [0], [0], [1], [0, 0, 1, 1], [], []>} : vector<1x8xbf16>, vector<8x32xbf16>, vector<1x32xf32> -> vector<1x32xf32>
    %c192_297 = arith.constant 192 : index
    %c0_298 = arith.constant 0 : index
    %890 = vector.load %arg2[%c192_297, %c0_298] : memref<416x128xf32, #tpu.memory_space<vmem>>, vector<1x128xf32>
    %891 = vector.broadcast %868 : vector<1x1xf32> to vector<1x128xf32>
    %892 = arith.mulf %891, %890 : vector<1x128xf32>
    %c208_299 = arith.constant 208 : index
    %c0_300 = arith.constant 0 : index
    %893 = vector.load %arg2[%c208_299, %c0_300] : memref<416x128xf32, #tpu.memory_space<vmem>>, vector<32x128xf32>
    %894 = arith.truncf %889 : vector<1x32xf32> to vector<1x32xbf16>
    %895 = arith.truncf %893 : vector<32x128xf32> to vector<32x128xbf16>
    %cst_301 = arith.constant dense<0.000000e+00> : vector<1x128xf32>
    %896 = tpu.matmul %894, %895, %cst_301 {dimension_numbers = #tpu.dot_dimension_numbers<[1], [0], [0], [1], [0, 0, 1, 1], [], []>} : vector<1x32xbf16>, vector<32x128xbf16>, vector<1x128xf32> -> vector<1x128xf32>
    %897 = arith.addf %892, %896 : vector<1x128xf32>
    %c240_302 = arith.constant 240 : index
    %c0_303 = arith.constant 0 : index
    %898 = vector.load %arg2[%c240_302, %c0_303] : memref<416x128xf32, #tpu.memory_space<vmem>>, vector<32x128xf32>
    %899 = arith.truncf %808 : vector<1x32xf32> to vector<1x32xbf16>
    %900 = arith.truncf %898 : vector<32x128xf32> to vector<32x128xbf16>
    %cst_304 = arith.constant dense<0.000000e+00> : vector<1x128xf32>
    %901 = tpu.matmul %899, %900, %cst_304 {dimension_numbers = #tpu.dot_dimension_numbers<[1], [0], [0], [1], [0, 0, 1, 1], [], []>} : vector<1x32xbf16>, vector<32x128xbf16>, vector<1x128xf32> -> vector<1x128xf32>
    %902 = arith.addf %897, %901 : vector<1x128xf32>
    %c200_305 = arith.constant 200 : index
    %c0_306 = arith.constant 0 : index
    %903 = vector.load %arg2[%c200_305, %c0_306] : memref<416x128xf32, #tpu.memory_space<vmem>>, vector<1x128xf32>
    %904 = arith.addf %902, %903 : vector<1x128xf32>
    %905 = arith.negf %904 : vector<1x128xf32>
    %906 = math.exp %905 : vector<1x128xf32>
    %cst_307 = arith.constant 1.000000e+00 : f32
    %907 = vector.broadcast %cst_307 : f32 to vector<1x128xf32>
    %908 = arith.addf %907, %906 : vector<1x128xf32>
    %909 = arith.divf %907, %908 : vector<1x128xf32>
    %910 = math.tanh %904 : vector<1x128xf32>
    %911 = vector.extract_strided_slice %909 {offsets = [0, 0], sizes = [1, 32], strides = [1, 1]} : vector<1x128xf32> to vector<1x32xf32>
    %912 = vector.extract_strided_slice %909 {offsets = [0, 32], sizes = [1, 32], strides = [1, 1]} : vector<1x128xf32> to vector<1x32xf32>
    %913 = vector.extract_strided_slice %910 {offsets = [0, 64], sizes = [1, 32], strides = [1, 1]} : vector<1x128xf32> to vector<1x32xf32>
    %914 = vector.extract_strided_slice %909 {offsets = [0, 96], sizes = [1, 32], strides = [1, 1]} : vector<1x128xf32> to vector<1x32xf32>
    %915 = arith.mulf %912, %806 : vector<1x32xf32>
    %916 = arith.mulf %911, %913 : vector<1x32xf32>
    %917 = arith.addf %915, %916 : vector<1x32xf32>
    %918 = math.tanh %917 : vector<1x32xf32>
    %919 = arith.mulf %914, %918 : vector<1x32xf32>
    %c272_308 = arith.constant 272 : index
    %c0_309 = arith.constant 0 : index
    %920 = vector.load %arg2[%c272_308, %c0_309] : memref<416x128xf32, #tpu.memory_space<vmem>>, vector<32x128xf32>
    %921 = arith.truncf %919 : vector<1x32xf32> to vector<1x32xbf16>
    %922 = arith.truncf %920 : vector<32x128xf32> to vector<32x128xbf16>
    %cst_310 = arith.constant dense<0.000000e+00> : vector<1x128xf32>
    %923 = tpu.matmul %921, %922, %cst_310 {dimension_numbers = #tpu.dot_dimension_numbers<[1], [0], [0], [1], [0, 0, 1, 1], [], []>} : vector<1x32xbf16>, vector<32x128xbf16>, vector<1x128xf32> -> vector<1x128xf32>
    %c304_311 = arith.constant 304 : index
    %c0_312 = arith.constant 0 : index
    %924 = vector.load %arg2[%c304_311, %c0_312] : memref<416x128xf32, #tpu.memory_space<vmem>>, vector<32x128xf32>
    %925 = arith.truncf %834 : vector<1x32xf32> to vector<1x32xbf16>
    %926 = arith.truncf %924 : vector<32x128xf32> to vector<32x128xbf16>
    %cst_313 = arith.constant dense<0.000000e+00> : vector<1x128xf32>
    %927 = tpu.matmul %925, %926, %cst_313 {dimension_numbers = #tpu.dot_dimension_numbers<[1], [0], [0], [1], [0, 0, 1, 1], [], []>} : vector<1x32xbf16>, vector<32x128xbf16>, vector<1x128xf32> -> vector<1x128xf32>
    %928 = arith.addf %923, %927 : vector<1x128xf32>
    %c336_314 = arith.constant 336 : index
    %c0_315 = arith.constant 0 : index
    %929 = vector.load %arg2[%c336_314, %c0_315] : memref<416x128xf32, #tpu.memory_space<vmem>>, vector<1x128xf32>
    %930 = arith.addf %928, %929 : vector<1x128xf32>
    %931 = arith.negf %930 : vector<1x128xf32>
    %932 = math.exp %931 : vector<1x128xf32>
    %cst_316 = arith.constant 1.000000e+00 : f32
    %933 = vector.broadcast %cst_316 : f32 to vector<1x128xf32>
    %934 = arith.addf %933, %932 : vector<1x128xf32>
    %935 = arith.divf %933, %934 : vector<1x128xf32>
    %936 = math.tanh %930 : vector<1x128xf32>
    %937 = vector.extract_strided_slice %935 {offsets = [0, 0], sizes = [1, 32], strides = [1, 1]} : vector<1x128xf32> to vector<1x32xf32>
    %938 = vector.extract_strided_slice %935 {offsets = [0, 32], sizes = [1, 32], strides = [1, 1]} : vector<1x128xf32> to vector<1x32xf32>
    %939 = vector.extract_strided_slice %936 {offsets = [0, 64], sizes = [1, 32], strides = [1, 1]} : vector<1x128xf32> to vector<1x32xf32>
    %940 = vector.extract_strided_slice %935 {offsets = [0, 96], sizes = [1, 32], strides = [1, 1]} : vector<1x128xf32> to vector<1x32xf32>
    %941 = arith.mulf %938, %832 : vector<1x32xf32>
    %942 = arith.mulf %937, %939 : vector<1x32xf32>
    %943 = arith.addf %941, %942 : vector<1x32xf32>
    %944 = math.tanh %943 : vector<1x32xf32>
    %945 = arith.mulf %940, %944 : vector<1x32xf32>
    %c344_317 = arith.constant 344 : index
    %c0_318 = arith.constant 0 : index
    %946 = vector.load %arg2[%c344_317, %c0_318] : memref<416x128xf32, #tpu.memory_space<vmem>>, vector<32x128xf32>
    %947 = arith.truncf %945 : vector<1x32xf32> to vector<1x32xbf16>
    %948 = arith.truncf %946 : vector<32x128xf32> to vector<32x128xbf16>
    %cst_319 = arith.constant dense<0.000000e+00> : vector<1x128xf32>
    %949 = tpu.matmul %947, %948, %cst_319 {dimension_numbers = #tpu.dot_dimension_numbers<[1], [0], [0], [1], [0, 0, 1, 1], [], []>} : vector<1x32xbf16>, vector<32x128xbf16>, vector<1x128xf32> -> vector<1x128xf32>
    %c376_320 = arith.constant 376 : index
    %c0_321 = arith.constant 0 : index
    %950 = vector.load %arg2[%c376_320, %c0_321] : memref<416x128xf32, #tpu.memory_space<vmem>>, vector<32x128xf32>
    %951 = arith.truncf %860 : vector<1x32xf32> to vector<1x32xbf16>
    %952 = arith.truncf %950 : vector<32x128xf32> to vector<32x128xbf16>
    %cst_322 = arith.constant dense<0.000000e+00> : vector<1x128xf32>
    %953 = tpu.matmul %951, %952, %cst_322 {dimension_numbers = #tpu.dot_dimension_numbers<[1], [0], [0], [1], [0, 0, 1, 1], [], []>} : vector<1x32xbf16>, vector<32x128xbf16>, vector<1x128xf32> -> vector<1x128xf32>
    %954 = arith.addf %949, %953 : vector<1x128xf32>
    %c408_323 = arith.constant 408 : index
    %c0_324 = arith.constant 0 : index
    %955 = vector.load %arg2[%c408_323, %c0_324] : memref<416x128xf32, #tpu.memory_space<vmem>>, vector<1x128xf32>
    %956 = arith.addf %954, %955 : vector<1x128xf32>
    %957 = arith.negf %956 : vector<1x128xf32>
    %958 = math.exp %957 : vector<1x128xf32>
    %cst_325 = arith.constant 1.000000e+00 : f32
    %959 = vector.broadcast %cst_325 : f32 to vector<1x128xf32>
    %960 = arith.addf %959, %958 : vector<1x128xf32>
    %961 = arith.divf %959, %960 : vector<1x128xf32>
    %962 = math.tanh %956 : vector<1x128xf32>
    %963 = vector.extract_strided_slice %961 {offsets = [0, 0], sizes = [1, 32], strides = [1, 1]} : vector<1x128xf32> to vector<1x32xf32>
    %964 = vector.extract_strided_slice %961 {offsets = [0, 32], sizes = [1, 32], strides = [1, 1]} : vector<1x128xf32> to vector<1x32xf32>
    %965 = vector.extract_strided_slice %962 {offsets = [0, 64], sizes = [1, 32], strides = [1, 1]} : vector<1x128xf32> to vector<1x32xf32>
    %966 = vector.extract_strided_slice %961 {offsets = [0, 96], sizes = [1, 32], strides = [1, 1]} : vector<1x128xf32> to vector<1x32xf32>
    %967 = arith.mulf %964, %858 : vector<1x32xf32>
    %968 = arith.mulf %963, %965 : vector<1x32xf32>
    %969 = arith.addf %967, %968 : vector<1x32xf32>
    %970 = math.tanh %969 : vector<1x32xf32>
    %971 = arith.mulf %966, %970 : vector<1x32xf32>
    %c80_326 = arith.constant 80 : index
    %c0_327 = arith.constant 0 : index
    %972 = vector.load %arg3[%c80_326, %c0_327] : memref<104x32xf32, #tpu.memory_space<vmem>>, vector<1x32xf32>
    %973 = arith.mulf %971, %972 : vector<1x32xf32>
    %c88_328 = arith.constant 88 : index
    %c0_329 = arith.constant 0 : index
    %974 = vector.load %arg3[%c88_328, %c0_329] : memref<104x32xf32, #tpu.memory_space<vmem>>, vector<1x32xf32>
    %975 = arith.mulf %889, %974 : vector<1x32xf32>
    %976 = arith.addf %973, %975 : vector<1x32xf32>
    %cst_330 = arith.constant dense<0.000000e+00> : vector<1xf32>
    %977 = vector.multi_reduction <add>, %976, %cst_330 [1] : vector<1x32xf32> to vector<1xf32>
    %978 = vector.shape_cast %977 : vector<1xf32> to vector<1x1xf32>
    %979 = arith.addf %978, %645 : vector<1x1xf32>
    %c0_331 = arith.constant 0 : index
    %c0_332 = arith.constant 0 : index
    %980 = vector.load %arg3[%c0_331, %c0_332] : memref<104x32xf32, #tpu.memory_space<vmem>>, vector<32x32xf32>
    %981 = arith.truncf %971 : vector<1x32xf32> to vector<1x32xbf16>
    %982 = arith.truncf %980 : vector<32x32xf32> to vector<32x32xbf16>
    %cst_333 = arith.constant dense<0.000000e+00> : vector<1x32xf32>
    %983 = tpu.matmul %981, %982, %cst_333 {dimension_numbers = #tpu.dot_dimension_numbers<[1], [0], [0], [1], [0, 0, 1, 1], [], []>} : vector<1x32xbf16>, vector<32x32xbf16>, vector<1x32xf32> -> vector<1x32xf32>
    %984 = vector.broadcast %983 : vector<1x32xf32> to vector<8x32xf32>
    %985 = arith.addf %984, %642 : vector<8x32xf32>
    %986 = math.tanh %985 : vector<8x32xf32>
    %c72_334 = arith.constant 72 : index
    %c0_335 = arith.constant 0 : index
    %987 = vector.load %arg3[%c72_334, %c0_335] : memref<104x32xf32, #tpu.memory_space<vmem>>, vector<1x32xf32>
    %cst_336 = arith.constant dense<0.000000e+00> : vector<1x8xf32>
    %988 = tpu.matmul %987, %986, %cst_336 {dimension_numbers = #tpu.dot_dimension_numbers<[1], [1], [0], [0], [0, 0, 1, 0], [], []>} : vector<1x32xf32>, vector<8x32xf32>, vector<1x8xf32> -> vector<1x8xf32>
    %cst_337 = arith.constant dense<0xFF800000> : vector<1xf32>
    %989 = vector.multi_reduction <maximumf>, %988, %cst_337 [1] : vector<1x8xf32> to vector<1xf32>
    %990 = vector.shape_cast %989 : vector<1xf32> to vector<1x1xf32>
    %991 = vector.broadcast %990 : vector<1x1xf32> to vector<1x8xf32>
    %992 = arith.subf %988, %991 : vector<1x8xf32>
    %993 = math.exp %992 : vector<1x8xf32>
    %cst_338 = arith.constant dense<0.000000e+00> : vector<1xf32>
    %994 = vector.multi_reduction <add>, %993, %cst_338 [1] : vector<1x8xf32> to vector<1xf32>
    %995 = vector.shape_cast %994 : vector<1xf32> to vector<1x1xf32>
    %996 = tpu.reciprocal %995 {approx = true} : vector<1x1xf32> -> vector<1x1xf32>
    %997 = vector.broadcast %996 : vector<1x1xf32> to vector<1x8xf32>
    %998 = arith.mulf %993, %997 : vector<1x8xf32>
    %999 = arith.truncf %998 : vector<1x8xf32> to vector<1x8xbf16>
    %cst_339 = arith.constant dense<0.000000e+00> : vector<1x32xf32>
    %1000 = tpu.matmul %999, %643, %cst_339 {dimension_numbers = #tpu.dot_dimension_numbers<[1], [0], [0], [1], [0, 0, 1, 1], [], []>} : vector<1x8xbf16>, vector<8x32xbf16>, vector<1x32xf32> -> vector<1x32xf32>
    %c192_340 = arith.constant 192 : index
    %c0_341 = arith.constant 0 : index
    %1001 = vector.load %arg2[%c192_340, %c0_341] : memref<416x128xf32, #tpu.memory_space<vmem>>, vector<1x128xf32>
    %1002 = vector.broadcast %979 : vector<1x1xf32> to vector<1x128xf32>
    %1003 = arith.mulf %1002, %1001 : vector<1x128xf32>
    %c208_342 = arith.constant 208 : index
    %c0_343 = arith.constant 0 : index
    %1004 = vector.load %arg2[%c208_342, %c0_343] : memref<416x128xf32, #tpu.memory_space<vmem>>, vector<32x128xf32>
    %1005 = arith.truncf %1000 : vector<1x32xf32> to vector<1x32xbf16>
    %1006 = arith.truncf %1004 : vector<32x128xf32> to vector<32x128xbf16>
    %cst_344 = arith.constant dense<0.000000e+00> : vector<1x128xf32>
    %1007 = tpu.matmul %1005, %1006, %cst_344 {dimension_numbers = #tpu.dot_dimension_numbers<[1], [0], [0], [1], [0, 0, 1, 1], [], []>} : vector<1x32xbf16>, vector<32x128xbf16>, vector<1x128xf32> -> vector<1x128xf32>
    %1008 = arith.addf %1003, %1007 : vector<1x128xf32>
    %c240_345 = arith.constant 240 : index
    %c0_346 = arith.constant 0 : index
    %1009 = vector.load %arg2[%c240_345, %c0_346] : memref<416x128xf32, #tpu.memory_space<vmem>>, vector<32x128xf32>
    %1010 = arith.truncf %919 : vector<1x32xf32> to vector<1x32xbf16>
    %1011 = arith.truncf %1009 : vector<32x128xf32> to vector<32x128xbf16>
    %cst_347 = arith.constant dense<0.000000e+00> : vector<1x128xf32>
    %1012 = tpu.matmul %1010, %1011, %cst_347 {dimension_numbers = #tpu.dot_dimension_numbers<[1], [0], [0], [1], [0, 0, 1, 1], [], []>} : vector<1x32xbf16>, vector<32x128xbf16>, vector<1x128xf32> -> vector<1x128xf32>
    %1013 = arith.addf %1008, %1012 : vector<1x128xf32>
    %c200_348 = arith.constant 200 : index
    %c0_349 = arith.constant 0 : index
    %1014 = vector.load %arg2[%c200_348, %c0_349] : memref<416x128xf32, #tpu.memory_space<vmem>>, vector<1x128xf32>
    %1015 = arith.addf %1013, %1014 : vector<1x128xf32>
    %1016 = arith.negf %1015 : vector<1x128xf32>
    %1017 = math.exp %1016 : vector<1x128xf32>
    %cst_350 = arith.constant 1.000000e+00 : f32
    %1018 = vector.broadcast %cst_350 : f32 to vector<1x128xf32>
    %1019 = arith.addf %1018, %1017 : vector<1x128xf32>
    %1020 = arith.divf %1018, %1019 : vector<1x128xf32>
    %1021 = math.tanh %1015 : vector<1x128xf32>
    %1022 = vector.extract_strided_slice %1020 {offsets = [0, 0], sizes = [1, 32], strides = [1, 1]} : vector<1x128xf32> to vector<1x32xf32>
    %1023 = vector.extract_strided_slice %1020 {offsets = [0, 32], sizes = [1, 32], strides = [1, 1]} : vector<1x128xf32> to vector<1x32xf32>
    %1024 = vector.extract_strided_slice %1021 {offsets = [0, 64], sizes = [1, 32], strides = [1, 1]} : vector<1x128xf32> to vector<1x32xf32>
    %1025 = vector.extract_strided_slice %1020 {offsets = [0, 96], sizes = [1, 32], strides = [1, 1]} : vector<1x128xf32> to vector<1x32xf32>
    %1026 = arith.mulf %1023, %917 : vector<1x32xf32>
    %1027 = arith.mulf %1022, %1024 : vector<1x32xf32>
    %1028 = arith.addf %1026, %1027 : vector<1x32xf32>
    %1029 = math.tanh %1028 : vector<1x32xf32>
    %1030 = arith.mulf %1025, %1029 : vector<1x32xf32>
    %c272_351 = arith.constant 272 : index
    %c0_352 = arith.constant 0 : index
    %1031 = vector.load %arg2[%c272_351, %c0_352] : memref<416x128xf32, #tpu.memory_space<vmem>>, vector<32x128xf32>
    %1032 = arith.truncf %1030 : vector<1x32xf32> to vector<1x32xbf16>
    %1033 = arith.truncf %1031 : vector<32x128xf32> to vector<32x128xbf16>
    %cst_353 = arith.constant dense<0.000000e+00> : vector<1x128xf32>
    %1034 = tpu.matmul %1032, %1033, %cst_353 {dimension_numbers = #tpu.dot_dimension_numbers<[1], [0], [0], [1], [0, 0, 1, 1], [], []>} : vector<1x32xbf16>, vector<32x128xbf16>, vector<1x128xf32> -> vector<1x128xf32>
    %c304_354 = arith.constant 304 : index
    %c0_355 = arith.constant 0 : index
    %1035 = vector.load %arg2[%c304_354, %c0_355] : memref<416x128xf32, #tpu.memory_space<vmem>>, vector<32x128xf32>
    %1036 = arith.truncf %945 : vector<1x32xf32> to vector<1x32xbf16>
    %1037 = arith.truncf %1035 : vector<32x128xf32> to vector<32x128xbf16>
    %cst_356 = arith.constant dense<0.000000e+00> : vector<1x128xf32>
    %1038 = tpu.matmul %1036, %1037, %cst_356 {dimension_numbers = #tpu.dot_dimension_numbers<[1], [0], [0], [1], [0, 0, 1, 1], [], []>} : vector<1x32xbf16>, vector<32x128xbf16>, vector<1x128xf32> -> vector<1x128xf32>
    %1039 = arith.addf %1034, %1038 : vector<1x128xf32>
    %c336_357 = arith.constant 336 : index
    %c0_358 = arith.constant 0 : index
    %1040 = vector.load %arg2[%c336_357, %c0_358] : memref<416x128xf32, #tpu.memory_space<vmem>>, vector<1x128xf32>
    %1041 = arith.addf %1039, %1040 : vector<1x128xf32>
    %1042 = arith.negf %1041 : vector<1x128xf32>
    %1043 = math.exp %1042 : vector<1x128xf32>
    %cst_359 = arith.constant 1.000000e+00 : f32
    %1044 = vector.broadcast %cst_359 : f32 to vector<1x128xf32>
    %1045 = arith.addf %1044, %1043 : vector<1x128xf32>
    %1046 = arith.divf %1044, %1045 : vector<1x128xf32>
    %1047 = math.tanh %1041 : vector<1x128xf32>
    %1048 = vector.extract_strided_slice %1046 {offsets = [0, 0], sizes = [1, 32], strides = [1, 1]} : vector<1x128xf32> to vector<1x32xf32>
    %1049 = vector.extract_strided_slice %1046 {offsets = [0, 32], sizes = [1, 32], strides = [1, 1]} : vector<1x128xf32> to vector<1x32xf32>
    %1050 = vector.extract_strided_slice %1047 {offsets = [0, 64], sizes = [1, 32], strides = [1, 1]} : vector<1x128xf32> to vector<1x32xf32>
    %1051 = vector.extract_strided_slice %1046 {offsets = [0, 96], sizes = [1, 32], strides = [1, 1]} : vector<1x128xf32> to vector<1x32xf32>
    %1052 = arith.mulf %1049, %943 : vector<1x32xf32>
    %1053 = arith.mulf %1048, %1050 : vector<1x32xf32>
    %1054 = arith.addf %1052, %1053 : vector<1x32xf32>
    %1055 = math.tanh %1054 : vector<1x32xf32>
    %1056 = arith.mulf %1051, %1055 : vector<1x32xf32>
    %c344_360 = arith.constant 344 : index
    %c0_361 = arith.constant 0 : index
    %1057 = vector.load %arg2[%c344_360, %c0_361] : memref<416x128xf32, #tpu.memory_space<vmem>>, vector<32x128xf32>
    %1058 = arith.truncf %1056 : vector<1x32xf32> to vector<1x32xbf16>
    %1059 = arith.truncf %1057 : vector<32x128xf32> to vector<32x128xbf16>
    %cst_362 = arith.constant dense<0.000000e+00> : vector<1x128xf32>
    %1060 = tpu.matmul %1058, %1059, %cst_362 {dimension_numbers = #tpu.dot_dimension_numbers<[1], [0], [0], [1], [0, 0, 1, 1], [], []>} : vector<1x32xbf16>, vector<32x128xbf16>, vector<1x128xf32> -> vector<1x128xf32>
    %c376_363 = arith.constant 376 : index
    %c0_364 = arith.constant 0 : index
    %1061 = vector.load %arg2[%c376_363, %c0_364] : memref<416x128xf32, #tpu.memory_space<vmem>>, vector<32x128xf32>
    %1062 = arith.truncf %971 : vector<1x32xf32> to vector<1x32xbf16>
    %1063 = arith.truncf %1061 : vector<32x128xf32> to vector<32x128xbf16>
    %cst_365 = arith.constant dense<0.000000e+00> : vector<1x128xf32>
    %1064 = tpu.matmul %1062, %1063, %cst_365 {dimension_numbers = #tpu.dot_dimension_numbers<[1], [0], [0], [1], [0, 0, 1, 1], [], []>} : vector<1x32xbf16>, vector<32x128xbf16>, vector<1x128xf32> -> vector<1x128xf32>
    %1065 = arith.addf %1060, %1064 : vector<1x128xf32>
    %c408_366 = arith.constant 408 : index
    %c0_367 = arith.constant 0 : index
    %1066 = vector.load %arg2[%c408_366, %c0_367] : memref<416x128xf32, #tpu.memory_space<vmem>>, vector<1x128xf32>
    %1067 = arith.addf %1065, %1066 : vector<1x128xf32>
    %1068 = arith.negf %1067 : vector<1x128xf32>
    %1069 = math.exp %1068 : vector<1x128xf32>
    %cst_368 = arith.constant 1.000000e+00 : f32
    %1070 = vector.broadcast %cst_368 : f32 to vector<1x128xf32>
    %1071 = arith.addf %1070, %1069 : vector<1x128xf32>
    %1072 = arith.divf %1070, %1071 : vector<1x128xf32>
    %1073 = math.tanh %1067 : vector<1x128xf32>
    %1074 = vector.extract_strided_slice %1072 {offsets = [0, 0], sizes = [1, 32], strides = [1, 1]} : vector<1x128xf32> to vector<1x32xf32>
    %1075 = vector.extract_strided_slice %1072 {offsets = [0, 32], sizes = [1, 32], strides = [1, 1]} : vector<1x128xf32> to vector<1x32xf32>
    %1076 = vector.extract_strided_slice %1073 {offsets = [0, 64], sizes = [1, 32], strides = [1, 1]} : vector<1x128xf32> to vector<1x32xf32>
    %1077 = vector.extract_strided_slice %1072 {offsets = [0, 96], sizes = [1, 32], strides = [1, 1]} : vector<1x128xf32> to vector<1x32xf32>
    %1078 = arith.mulf %1075, %969 : vector<1x32xf32>
    %1079 = arith.mulf %1074, %1076 : vector<1x32xf32>
    %1080 = arith.addf %1078, %1079 : vector<1x32xf32>
    %1081 = math.tanh %1080 : vector<1x32xf32>
    %1082 = arith.mulf %1077, %1081 : vector<1x32xf32>
    %c80_369 = arith.constant 80 : index
    %c0_370 = arith.constant 0 : index
    %1083 = vector.load %arg3[%c80_369, %c0_370] : memref<104x32xf32, #tpu.memory_space<vmem>>, vector<1x32xf32>
    %1084 = arith.mulf %1082, %1083 : vector<1x32xf32>
    %c88_371 = arith.constant 88 : index
    %c0_372 = arith.constant 0 : index
    %1085 = vector.load %arg3[%c88_371, %c0_372] : memref<104x32xf32, #tpu.memory_space<vmem>>, vector<1x32xf32>
    %1086 = arith.mulf %1000, %1085 : vector<1x32xf32>
    %1087 = arith.addf %1084, %1086 : vector<1x32xf32>
    %cst_373 = arith.constant dense<0.000000e+00> : vector<1xf32>
    %1088 = vector.multi_reduction <add>, %1087, %cst_373 [1] : vector<1x32xf32> to vector<1xf32>
    %1089 = vector.shape_cast %1088 : vector<1xf32> to vector<1x1xf32>
    %1090 = arith.addf %1089, %645 : vector<1x1xf32>
    %1091 = tpu.concatenate %757, %868, %979, %1090 in 1 : vector<1x1xf32>, vector<1x1xf32>, vector<1x1xf32>, vector<1x1xf32> -> vector<1x4xf32>
    %c0_374 = arith.constant 0 : index
    %c0_375 = arith.constant 0 : index
    %1092 = vector.load %arg4[%c0_374, %c0_375] : memref<1x4xf32, #tpu.memory_space<vmem>>, vector<1x4xf32>
    tpu.vector_store %arg4[%c0_374, %c0_375], %1091 {strides = array<i32>} : memref<1x4xf32, #tpu.memory_space<vmem>>, vector<1x4xf32>,
    return
  }
}

</mosaic_0001>

<bundles_post_ra>
// kernel: forward.1
= control target key start
LH: loop header
LB: loop body
LE: loop exit
PB: predicated region body
PF: predicated region fallthrough
CT: control target
= control target key end

     0   :  { %s7907_s0 = inlined_call_operand.vmem [shape: f32[8,1], index: 0, kind: input, shape index: {}]   ;;  %s7908_s1 = inlined_call_operand.<no memory space> [shape: f32[1,1], index: 1, kind: input, shape index: {}]   ;;  %s7909_s2 = inlined_call_operand.hbm [shape: f32[416,128], index: 2, kind: input, shape index: {}]   ;;  %s7910_s3 = inlined_call_operand.vmem [shape: f32[104,32], index: 3, kind: input, shape index: {}]   ;;  %s7911_s4 = inlined_call_operand.hbm [shape: f32[1,4], index: 4, kind: output, shape index: {}]  }
   0x1   :  { %v9_v0 = vstv %s7908_s1 }
   0x2   :  { %10 = vst [vmem:[#allocation2] sm:$0x1] %v9_v0 }
   0x3   :  { %11 = vsyncpa [#allocation4], 0 }
   0x4   :  { %12 = vsyncpa [#allocation5], 0  ;;  %s6555_s17 = smov [#allocation3]   ;;  %s6507_s21 = scalar_lea.hbm %s7909_s2, 6656 }
   0x5   :  { %s22_s18 = sshll.u32 %s6555_s17, 4  ;;  %p6508_p0 = scmp.ne.s32.totalorder %s7909_s2, %s6507_s21  ;;  %s23_s18 = int_to_ptr.vmem [resolvable:$true] %s22_s18 }
   0x6   :  { %p6511_p1 = scmp.lt.u32.totalorder %s6507_s21, %s7909_s2 }
   0x8   :  { %p6513_p2 = pnand %p6511_p1, %p6508_p0 }
   0xa   :  { %6516 = shalt.err (!%p6513_p2)
}
   0xb   :  { %s6517_s1 = scalar_lea.vmem %s23_s18, 6656  ;;  %p6522_p4 = scmp.lt.s32.totalorder %s23_s18, %s23_s18 }
   0xc   :  { %p6518_p3 = scmp.ne.s32.totalorder %s23_s18, %s6517_s1  ;;  %p6523_p5 = scmp.lt.s32.totalorder %s6517_s1, %s6517_s1 }
   0xe   :  { %p6524_p6 = por %p6523_p5, %p6522_p4 }
  0x10   :  { %p6525_p7 = pnand %p6524_p6, %p6518_p3 }
  0x12   :  { %6528 = shalt.err (!%p6525_p7)
}
  0x13   :  { %s6556_s26 = smov 128   ;;  %s6557_s27 = smov 8  }
  0x14   :  { %28 = dma.hbm_to_vmem [thread:$0]  %s7909_s2, 6656, %s23_s18, [#allocation4], %s6556_s26, %s6556_s26, %s6557_s27  }
  0x15   :  { %6551 = dma.done.wait [#allocation4], 6656  }
  0x16   :  { %6552 = vsyncadd [#allocation4], 4294960640  ;;  %v6558_v1 = vmov 0.0   ;;  %vm6559_vm0 = vmmov 0   ;;  %v6560_v2 = vmov 0   ;;  %v53_v3 = vld [vmem:[#allocation3 + $0x10] sm:$0xff] }
  0x17   :  { %5519 = vmatprep.subr.bf16.mxu0 %v6558_v1  ;;  %5523 = vmatprep.mubr.msk.bf16.mxu0 %vm6559_vm0, %v6558_v1  ;;  %v54_v4 = vld [vmem:[#allocation3 + $0x18] sm:$0xff]  ;;  %v55_v5 = vld [vmem:[#allocation3 + $0x20] sm:$0xff]  ;;  %v56_v7 = vld [vmem:[#allocation3 + $0x28] sm:$0xff]  ;;  %s6562_s5 = smov 32   ;;  %vm59_vm1 = vcmask 261120   ;;  %vm2861_vm2 = vcmask 1040384  }
  0x18   :  { %6184 = vset.pattern.permute.xlu0 %v6560_v2  ;;  %5527 = vmatprep.subr.bf16.mxu1 %v6558_v1  ;;  %v6616_v6 = vpack.c.bf16 %v54_v4, %v53_v3  ;;  %v35_v8 = vld [vmem:[%s7907_s0] sm:$0xff]  ;;  %v6622_v9 = vpack.c.bf16 %v56_v7, %v55_v5  ;;  %v5153_v13 = vld [vmem:[#allocation3 + $0x8] ss:$0 sm:$0xff]  ;;  %s6561_s0 = smov 64   ;;  %v135_v30 = vld [vmem:[#allocation3 + $0x50] sm:$0xff]  ;;  %vm2863_vm3 = vcmask 1041408  }
  0x19   :  { %5531 = vmatprep.mubr.msk.bf16.mxu1 %vm6559_vm0, %v6558_v1  ;;  %6185 = vset.pattern.permute.xlu1 %v6560_v2  ;;  %v5152_v10 = vld [vmem:[#allocation3] ss:$0 sm:$0xff]  ;;  %v136_v31 = vld [vmem:[#allocation3 + $0x58] sm:$0xff]  ;;  %v128_v32 = vld [vmem:[#allocation3 + $0x30] sm:$0xff]  ;;  %vm2865_vm4 = vcmask 1042432   ;;  %vm2867_vm5 = vcmask 1043456  }
  0x1a   :  { %39 = vperm.xlu0 %6184, %v35_v8   ;;  %5520 = vmatpush3.bf16.msra.mxu0 %v6616_v6  ;;  %v6638_v33 = vpack.c.bf16 %v136_v31, %v135_v30  ;;  %v129_v34 = vld [vmem:[#allocation3 + $0x38] sm:$0xff]  ;;  %v137_v35 = vld [vmem:[#allocation3 + $0x60] sm:$0xff]  ;;  %v138_v36 = vld [vmem:[#allocation3 + $0x68] sm:$0xff]  ;;  %vm2869_vm6 = vcmask 1044480   ;;  %vm2871_vm7 = vcmask 1045504   ;;  %vm2873_vm8 = vcmask 1046528  }
  0x1b   :  { %5521 = vmatprep.subr.bf16.mxu0 %v6558_v1  ;;  %v6640_v37 = vpack.c.bf16 %v129_v34, %v128_v32  ;;  %v130_v38 = vld [vmem:[#allocation3 + $0x40] sm:$0xff]  ;;  %v131_v39 = vld [vmem:[#allocation3 + $0x48] sm:$0xff]  ;;  %v6643_v40 = vpack.c.bf16 %v138_v36, %v137_v35  ;;  %v6665_v52 = vld [vmem:[#allocation3 + $0x70] sm:$0x1]  ;;  %vm3035_vm9 = vcmask 57344   ;;  %vm3051_vm10 = vcmask 64512  }
  0x1c   :  { %5528 = vmatpush3.bf16.msra.mxu1 %v6638_v33  ;;  %v6647_v41 = vpack.c.bf16 %v131_v39, %v130_v38  ;;  %v260_v7 = vld [vmem:[#allocation3 + $0x98] sm:$0xff]  ;;  %v261_v8 = vld [vmem:[#allocation3 + $0xa0] sm:$0xff]  ;;  %s6563_s29 = smov 96   ;;  %vm3503_vm11 = vcmask 253952   ;;  %s6564_s10 = smov 1   ;;  %vm5129_vm12 = vcmask 7168  }
  0x1d   :  { %5529 = vmatprep.subr.bf16.mxu1 %v6558_v1  ;;  %v6712_v31 = vld [vmem:[#allocation3 + $0xb8] sm:$0x1]  ;;  %s6565_s11 = smov 2   ;;  %vm5131_vm13 = vcmask 15360   ;;  %vm5133_vm14 = vcmask 23552   ;;  %vm5135_vm15 = vcmask 24576  }
  0x1e   :  { %5522 = vmatpush3.bf16.msra.mxu0 %v6622_v9 }
  0x1f   :  { %5535 = vmatprep.subr.bf16.mxu0 %v6558_v1 }
  0x20   :  { %5530 = vmatpush3.bf16.msra.mxu1 %v6643_v40 }
  0x21   :  { %5524 = vmatmul.mubr.bf16.vlgmr.msra.gmra.mrb[0].mxu0 %v6560_v2  ;;  %5543 = vmatprep.subr.bf16.mxu1 %v6558_v1 }
  0x22   :  { %5539 = vmatprep.mubr.msk.bf16.mxu0 %vm6559_vm0, %v6558_v1  ;;  %5536 = vmatpush3.bf16.msra.mxu0 %v6640_v37 }
  0x23   :  { %5537 = vmatprep.subr.bf16.mxu0 %v6558_v1  ;;  %5532 = vmatmul.mubr.bf16.vlgmr.msra.gmra.mrb[0].mxu1 %v6560_v2 }
  0x24   :  { %5547 = vmatprep.mubr.msk.bf16.mxu1 %vm6559_vm0, %v6558_v1 }
  0x26   :  { %5538 = vmatpush3.bf16.msra.mxu0 %v6647_v41 }
  0x27   :  { %5551 = vmatprep.subr.bf16.mxu0 %v6558_v1 }
  0x99   :  { %v40_v11 = vpop.permute.xlu0 %39 }
  0x9a   :  { %v46_v12 = vmul.f32 %v5152_v10, %v40_v11  ;;  %v253_v10 = vld [vmem:[#allocation3 + $0x78] sm:$0xff]  ;;  %v6673_v11 = vpack.c.bf16 %v261_v8, %v260_v7 }
  0x9c   :  { %v6630_v14 = vadd.f32 %v5153_v13, %v46_v12  ;;  %v254_v12 = vld [vmem:[#allocation3 + $0x80] sm:$0xff]  ;;  %v262_v13 = vld [vmem:[#allocation3 + $0xa8] sm:$0xff]  ;;  %5544 = vmatpush3.bf16.msra.mxu1 %v6673_v11 }
  0x9d   :  { %5545 = vmatprep.subr.bf16.mxu1 %v6558_v1 }
  0xf4   :  { %v97_v15 = vpop.f32.mrb[0].mxu0 }
  0xf5   :  { %v103_v16 = vadd.f32 %v97_v15, %v6630_v14  ;;  %v5525_v17 = vpop.f32.mrb[1].mxu0  ;;  %v263_v15 = vld [vmem:[#allocation3 + $0xb0] sm:$0xff] }
  0xf6   :  { %v100_v18 = vpop.f32.mrb[2].mxu0  ;;  %v175_v46 = vpop.f32.mrb[0].mxu1  ;;  %v255_v17 = vld [vmem:[#allocation3 + $0x88] sm:$0xff] }
  0xf7   :  { %6186 = vtanh.f32 %v103_v16  ;;  %v5526_v19 = vpop.f32.mrb[3].mxu0  ;;  %v5154_v21 = vmul.f32 -1.442695, %v103_v16  ;;  %v5533_v47 = vpop.f32.mrb[1].mxu1  ;;  %v6675_v16 = vpack.c.bf16 %v254_v12, %v253_v10  ;;  %v256_v18 = vld [vmem:[#allocation3 + $0x90] sm:$0xff]  ;;  %v378_v12 = vld [vmem:[%s7910_s3 + $0x20] sm:$0xff] }
  0xf8   :  { %v178_v48 = vpop.f32.mrb[2].mxu1  ;;  %v6678_v19 = vpack.c.bf16 %v263_v15, %v262_v13  ;;  %v379_v13 = vld [vmem:[%s7910_s3 + $0x28] sm:$0xff] }
  0xf9   :  { %6188 = vpow2.f32 %v5154_v21  ;;  %v5534_v49 = vpop.f32.mrb[3].mxu1  ;;  %v6737_v15 = vpack.c.bf16 %v379_v13, %v378_v12 }
  0xfa   :  { %5546 = vmatpush3.bf16.msra.mxu1 %v6678_v19 }
  0xfb   :  { %5559 = vmatprep.subr.bf16.mxu1 %v6558_v1 }
  0xfd   :  { %5548 = vmatmul.mubr.bf16.vlgmr.msra.gmra.mrb[4].mxu1 %v6560_v2 }
  0xfe   :  { %5563 = vmatprep.mubr.msk.bf16.mxu1 %vm6559_vm0, %v6558_v1  ;;  %5560 = vmatpush3.bf16.msra.mxu1 %v6737_v15 }
  0xff   :  { %5561 = vmatprep.subr.bf16.mxu1 %v6558_v1 }
 0x101   :  { %v6187_v20 = vpop.eup %6186 }
 0x102   :  { %113 = vrot.lane.b32.xlu0 %v6187_v20, %s6561_s0  ;;  %v6682_v20 = vpack.c.bf16 %v256_v18, %v255_v17  ;;  %v381_v17 = vld [vmem:[%s7910_s3 + $0x38] sm:$0xff] }
 0x103   :  { %v6189_v22 = vpop.eup %6188 }
 0x104   :  { %v107_v23 = vadd.f32 1.0, %v6189_v22 }
 0x106   :  { %6190 = vrcp.f32 %v107_v23 }
 0x110   :  { %v6191_v24 = vpop.eup %6190 }
 0x111   :  { %v111_v27 = vmul.f32 0.0, %v6191_v24 }
 0x174   :  { %v114_v25 = vpop.permute.xlu0 %113 }
 0x175   :  { %v116_v26 = vmul.f32 %v6191_v24, %v114_v25 }
 0x177   :  { %118 = vrot.lane.b32.xlu1 %v116_v26, %s6562_s5 }
 0x1d0   :  { %v300_v25 = vpop.f32.mrb[4].mxu1 }
 0x1d1   :  { %v5549_v26 = vpop.f32.mrb[5].mxu1 }
 0x1e9   :  { %v119_v28 = vpop.permute.xlu1 %118 }
 0x1ea   :  { %v6635_v29 = vadd.f32 %v119_v28, %v111_v27  ;;  %v303_v27 = vpop.f32.mrb[6].mxu1 }
 0x1eb   :  { %v5550_v28 = vpop.f32.mrb[7].mxu1 }
 0x1ec   :  { %6192 = vtanh.f32 %v6635_v29 }
 0x1f6   :  { %v6193_v42 = vpop.eup %6192 }
 0x1f7   :  { %124 = vrot.lane.b32.xlu1 %v6193_v42, %s6561_s0 }
 0x269   :  { %v125_v43 = vpop.permute.xlu1 %124 }
 0x26a   :  { %v127_v44 = vmul.f32 %v6191_v24, %v125_v43 }
 0x26c   :  { %v132_v45 = vpack.c.bf16 %v127_v44, %v127_v44 }
 0x26e   :  { %182 = vrot.lane.b32.xlu0 %v132_v45, %s6562_s5 }
 0x2e0   :  { %v6659_v50 = vpop.permute.xlu0 %182 }
 0x2e1   :  { %5540 = vmatmul.mubr.msk.bf16.vlgmr.msra.gmra.mrb[4].mxu0 %vm59_vm1, %v6659_v50 }
 0x2e2   :  { %5555 = vmatprep.mubr.msk.bf16.mxu0 %vm6559_vm0, %v6558_v1  ;;  %5552 = vmatpush3.bf16.msra.mxu0 %v6675_v16 }
 0x2e3   :  { %5553 = vmatprep.subr.bf16.mxu0 %v6558_v1 }
 0x2e6   :  { %5554 = vmatpush3.bf16.msra.mxu0 %v6682_v20 }
 0x2e7   :  { %5567 = vmatprep.subr.bf16.mxu0 %v6558_v1 }
 0x3b4   :  { %v221_v51 = vpop.f32.mrb[4].mxu0 }
 0x3b5   :  { %v222_v53 = vadd.f32 %v221_v51, %v175_v46  ;;  %v5541_v54 = vpop.f32.mrb[5].mxu0 }
 0x3b6   :  { %v224_v55 = vpop.f32.mrb[6].mxu0 }
 0x3b7   :  { %v228_v56 = vadd.f32 %v6665_v52, %v222_v53  ;;  %v5542_v57 = vpop.f32.mrb[7].mxu0 }
 0x3b9   :  { %6194 = vtanh.f32 %v228_v56  ;;  %v5156_v59 = vmul.f32 -1.442695, %v228_v56 }
 0x3bb   :  { %6196 = vpow2.f32 %v5156_v59 }
 0x3c3   :  { %v6195_v58 = vpop.eup %6194 }
 0x3c4   :  { %238 = vrot.lane.b32.xlu1 %v6195_v58, %s6561_s0 }
 0x3c5   :  { %v6197_v60 = vpop.eup %6196 }
 0x3c6   :  { %v232_v61 = vadd.f32 1.0, %v6197_v60 }
 0x3c8   :  { %6198 = vrcp.f32 %v232_v61 }
 0x3d2   :  { %v6199_v62 = vpop.eup %6198 }
 0x3d3   :  { %v236_v3 = vmul.f32 0.0, %v6199_v62 }
 0x436   :  { %v239_v63 = vpop.permute.xlu1 %238 }
 0x437   :  { %v241_v0 = vmul.f32 %v6199_v62, %v239_v63 }
 0x439   :  { %243 = vrot.lane.b32.xlu0 %v241_v0, %s6562_s5 }
 0x4ab   :  { %v244_v4 = vpop.permute.xlu0 %243 }
 0x4ac   :  { %v6670_v5 = vadd.f32 %v244_v4, %v236_v3  ;;  %v484_v3 = vrot.slane %v6635_v29, 7  ;;  %v380_v29 = vld [vmem:[%s7910_s3 + $0x30] sm:$0xff] }
 0x4ad   :  { %v6743_v18 = vpack.c.bf16 %v381_v17, %v380_v29 }
 0x4ae   :  { %6200 = vtanh.f32 %v6670_v5 }
 0x4af   :  { %5562 = vmatpush3.bf16.msra.mxu1 %v6743_v18 }
 0x4b0   :  { %5575 = vmatprep.subr.bf16.mxu1 %v6558_v1 }
 0x4b8   :  { %v6201_v21 = vpop.eup %6200 }
 0x4b9   :  { %249 = vrot.lane.b32.xlu1 %v6201_v21, %s6561_s0 }
 0x52b   :  { %v250_v22 = vpop.permute.xlu1 %249 }
 0x52c   :  { %v252_v23 = vmul.f32 %v6199_v62, %v250_v22 }
 0x52e   :  { %v257_v24 = vpack.c.bf16 %v252_v23, %v252_v23 }
 0x530   :  { %307 = vrot.lane.b32.xlu0 %v257_v24, %s6562_s5 }
 0x5a2   :  { %v6694_v30 = vpop.permute.xlu0 %307 }
 0x5a3   :  { %5556 = vmatmul.mubr.msk.bf16.vlgmr.msra.gmra.mrb[8].mxu0 %vm59_vm1, %v6694_v30 }
 0x5a4   :  { %5568 = vmatpush3.bf16.msra.mxu0 %v6616_v6  ;;  %5571 = vmatprep.mubr.msk.bf16.mxu0 %vm6559_vm0, %v6558_v1 }
 0x5a5   :  { %5569 = vmatprep.subr.bf16.mxu0 %v6558_v1 }
 0x5a8   :  { %5570 = vmatpush3.bf16.msra.mxu0 %v6622_v9 }
 0x5a9   :  { %5583 = vmatprep.subr.bf16.mxu0 %v6558_v1 }
 0x5ab   :  { %5572 = vmatmul.mubr.msk.bf16.vlgmr.msra.gmra.mrb[12].mxu0 %vm59_vm1, %v6659_v50 }
 0x5ac   :  { %5584 = vmatpush3.bf16.msra.mxu0 %v6640_v37  ;;  %5587 = vmatprep.mubr.msk.bf16.mxu0 %vm6559_vm0, %v6558_v1 }
 0x5ad   :  { %5585 = vmatprep.subr.bf16.mxu0 %v6558_v1 }
 0x5b0   :  { %5586 = vmatpush3.bf16.msra.mxu0 %v6647_v41 }
 0x5b1   :  { %5599 = vmatprep.subr.bf16.mxu0 %v6558_v1 }
 0x676   :  { %v346_v2 = vpop.f32.mrb[8].mxu0 }
 0x677   :  { %v347_v32 = vadd.f32 %v346_v2, %v300_v25  ;;  %v5557_v34 = vpop.f32.mrb[9].mxu0 }
 0x678   :  { %v349_v35 = vpop.f32.mrb[10].mxu0 }
 0x679   :  { %v353_v36 = vadd.f32 %v6712_v31, %v347_v32  ;;  %v5558_v38 = vpop.f32.mrb[11].mxu0 }
 0x67b   :  { %6202 = vtanh.f32 %v353_v36  ;;  %v5158_v49 = vmul.f32 -1.442695, %v353_v36 }
 0x67e   :  { %v466_v39 = vpop.f32.mrb[12].mxu0 }
 0x67f   :  { %v473_v42 = vrot.slane %v466_v39, 7  ;;  %v5573_v43 = vpop.f32.mrb[13].mxu0 }
 0x680   :  { %v469_v44 = vpop.f32.mrb[14].mxu0 }
 0x681   :  { %v475_v45 = vadd.f32 %v473_v42, %v6630_v14  ;;  %v5574_v46 = vpop.f32.mrb[15].mxu0 }
 0x683   :  { %6204 = vtanh.f32 %v475_v45  ;;  %v5161_v50 = vmul.f32 -1.442695, %v475_v45 }
 0x684   :  { %6206 = vpow2.f32 %v5158_v49 }
 0x685   :  { %v6203_v47 = vpop.eup %6202  ;;  %6208 = vpow2.f32 %v5161_v50 }
 0x686   :  { %363 = vrot.lane.b32.xlu1 %v6203_v47, %s6561_s0 }
 0x68d   :  { %v6205_v48 = vpop.eup %6204 }
 0x68e   :  { %488 = vrot.lane.b32.xlu0 %v6205_v48, %s6561_s0  ;;  %v6207_v51 = vpop.eup %6206 }
 0x68f   :  { %v357_v53 = vadd.f32 1.0, %v6207_v51  ;;  %v6209_v54 = vpop.eup %6208 }
 0x690   :  { %v479_v55 = vadd.f32 1.0, %v6209_v54 }
 0x691   :  { %6210 = vrcp.f32 %v357_v53 }
 0x692   :  { %6212 = vrcp.f32 %v479_v55 }
 0x69b   :  { %v6211_v56 = vpop.eup %6210 }
 0x69c   :  { %v6213_v59 = vpop.eup %6212  ;;  %v361_v62 = vmul.f32 0.0, %v6211_v56 }
 0x69d   :  { %v486_v4 = vmul.f32 %v6213_v59, %v484_v3 }
 0x6f8   :  { %v364_v57 = vpop.permute.xlu1 %363 }
 0x6f9   :  { %v366_v58 = vmul.f32 %v6211_v56, %v364_v57 }
 0x6fb   :  { %368 = vrot.lane.b32.xlu1 %v366_v58, %s6562_s5 }
 0x700   :  { %v489_v60 = vpop.permute.xlu0 %488 }
 0x701   :  { %v491_v61 = vmul.f32 %v6213_v59, %v489_v60 }
 0x703   :  { %493 = vrot.lane.b32.xlu0 %v491_v61, %s6562_s5 }
 0x76d   :  { %v369_v63 = vpop.permute.xlu1 %368 }
 0x76e   :  { %v6720_v0 = vadd.f32 %v369_v63, %v361_v62 }
 0x770   :  { %6214 = vtanh.f32 %v6720_v0 }
 0x775   :  { %v494_v7 = vpop.permute.xlu0 %493 }
 0x776   :  { %v6724_v8 = vadd.f32 %v494_v7, %v486_v4 }
 0x778   :  { %6216 = vtanh.f32 %v6724_v8 }
 0x77a   :  { %v6215_v10 = vpop.eup %6214 }
 0x77b   :  { %374 = vrot.lane.b32.xlu1 %v6215_v10, %s6561_s0 }
 0x782   :  { %v6217_v21 = vpop.eup %6216 }
 0x783   :  { %499 = vrot.lane.b32.xlu0 %v6217_v21, %s6561_s0 }
 0x7ed   :  { %v375_v22 = vpop.permute.xlu1 %374 }
 0x7ee   :  { %v6749_v23 = vmul.f32 %v6211_v56, %v375_v22 }
 0x7f0   :  { %v382_v24 = vpack.c.bf16 %v6749_v23, %v6749_v23 }
 0x7f2   :  { %387 = vrot.lane.b32.xlu1 %v382_v24, %s6562_s5 }
 0x7f5   :  { %v500_v25 = vpop.permute.xlu0 %499 }
 0x7f6   :  { %v502_v26 = vmul.f32 %v6213_v59, %v500_v25 }
 0x7f8   :  { %v503_v27 = vpack.c.bf16 %v502_v26, %v502_v26 }
 0x7fa   :  { %v545_v28 = vshrl.u32 %v503_v27, 16 }
 0x7fc   :  { %547 = vrot.lane.b32.xlu0 %v545_v28, %s6562_s5 }
 0x864   :  { %v388_v2 = vpop.permute.xlu1 %387 }
 0x865   :  { %5564 = vmatmul.mubr.msk.bf16.vlgmr.msra.gmra.mrb[8].mxu1 %vm59_vm1, %v388_v2 }
 0x866   :  { %5576 = vmatpush3.bf16.msra.mxu1 %v6638_v33  ;;  %5579 = vmatprep.mubr.msk.bf16.mxu1 %vm6559_vm0, %v6558_v1 }
 0x867   :  { %5577 = vmatprep.subr.bf16.mxu1 %v6558_v1 }
 0x86a   :  { %5578 = vmatpush3.bf16.msra.mxu1 %v6643_v40 }
 0x86b   :  { %5591 = vmatprep.subr.bf16.mxu1 %v6558_v1 }
 0x86d   :  { %5580 = vmatmul.mubr.msk.bf16.vlgmr.msra.gmra.mrb[12].mxu1 %vm59_vm1, %v6694_v30 }
 0x86e   :  { %5592 = vmatpush3.bf16.msra.mxu1 %v6673_v11  ;;  %v6765_v32 = vpop.permute.xlu0 %547  ;;  %5595 = vmatprep.mubr.msk.bf16.mxu1 %vm6559_vm0, %v6558_v1 }
 0x86f   :  { %5588 = vmatmul.mubr.msk.bf16.vlgmr.msra.gmra.mrb[16].mxu0 %vm59_vm1, %v6765_v32  ;;  %5593 = vmatprep.subr.bf16.mxu1 %v6558_v1 }
 0x870   :  { %5600 = vmatpush3.bf16.msra.mxu0 %v6675_v16  ;;  %5603 = vmatprep.mubr.msk.bf16.mxu0 %vm6559_vm0, %v6558_v1 }
 0x871   :  { %5601 = vmatprep.subr.bf16.mxu0 %v6558_v1 }
 0x872   :  { %5594 = vmatpush3.bf16.msra.mxu1 %v6678_v19 }
 0x873   :  { %5607 = vmatprep.subr.bf16.mxu1 %v6558_v1 }
 0x874   :  { %5602 = vmatpush3.bf16.msra.mxu0 %v6682_v20 }
 0x875   :  { %5596 = vmatmul.mubr.msk.bf16.vlgmr.msra.gmra.mrb[16].mxu1 %vm59_vm1, %v388_v2  ;;  %5615 = vmatprep.subr.bf16.mxu0 %v6558_v1 }
 0x876   :  { %5608 = vmatpush3.bf16.msra.mxu1 %v6737_v15  ;;  %5611 = vmatprep.mubr.msk.bf16.mxu1 %vm6559_vm0, %v6558_v1 }
 0x877   :  { %5609 = vmatprep.subr.bf16.mxu1 %v6558_v1 }
 0x87a   :  { %5610 = vmatpush3.bf16.msra.mxu1 %v6743_v18 }
 0x87b   :  { %5623 = vmatprep.subr.bf16.mxu1 %v6558_v1 }
 0x938   :  { %v6787_v30 = vpop.f32.mrb[8].mxu1 }
 0x939   :  { %v5565_v34 = vpop.f32.mrb[9].mxu1 }
 0x93a   :  { %v429_v35 = vpop.f32.mrb[10].mxu1 }
 0x93b   :  { %v5566_v36 = vpop.f32.mrb[11].mxu1 }
 0x940   :  { %v538_v38 = vpop.f32.mrb[12].mxu1 }
 0x941   :  { %v5581_v39 = vpop.f32.mrb[13].mxu1 }
 0x942   :  { %v541_v42 = vpop.f32.mrb[14].mxu1  ;;  %v586_v43 = vpop.f32.mrb[16].mxu0 }
 0x943   :  { %v587_v44 = vadd.f32 %v586_v43, %v538_v38  ;;  %v5582_v45 = vpop.f32.mrb[15].mxu1  ;;  %v5589_v46 = vpop.f32.mrb[17].mxu0 }
 0x944   :  { %v589_v47 = vpop.f32.mrb[18].mxu0 }
 0x945   :  { %v592_v48 = vadd.f32 %v587_v44, %v6665_v52  ;;  %v5590_v49 = vpop.f32.mrb[19].mxu0 }
 0x947   :  { %6218 = vtanh.f32 %v592_v48  ;;  %v5164_v56 = vmul.f32 -1.442695, %v592_v48 }
 0x948   :  { %v652_v50 = vpop.f32.mrb[16].mxu1 }
 0x949   :  { %v5597_v51 = vpop.f32.mrb[17].mxu1  ;;  %6220 = vpow2.f32 %v5164_v56 }
 0x94a   :  { %v655_v53 = vpop.f32.mrb[18].mxu1 }
 0x94b   :  { %v5598_v54 = vpop.f32.mrb[19].mxu1 }
 0x951   :  { %v6219_v55 = vpop.eup %6218 }
 0x952   :  { %602 = vrot.lane.b32.xlu1 %v6219_v55, %s6561_s0  ;;  %v828_v55 = vrot.slane %v6724_v8, 7 }
 0x953   :  { %v6221_v57 = vpop.eup %6220 }
 0x954   :  { %v596_v58 = vadd.f32 1.0, %v6221_v57 }
 0x956   :  { %6222 = vrcp.f32 %v596_v58 }
 0x960   :  { %v6223_v59 = vpop.eup %6222 }
 0x961   :  { %v600_v62 = vmul.f32 %v6223_v59, %v6670_v5 }
 0x9c4   :  { %v603_v60 = vpop.permute.xlu1 %602 }
 0x9c5   :  { %v605_v61 = vmul.f32 %v6223_v59, %v603_v60 }
 0x9c7   :  { %607 = vrot.lane.b32.xlu0 %v605_v61, %s6562_s5 }
 0xa39   :  { %v608_v63 = vpop.permute.xlu0 %607 }
 0xa3a   :  { %v6793_v3 = vadd.f32 %v608_v63, %v600_v62 }
 0xa3c   :  { %6224 = vtanh.f32 %v6793_v3 }
 0xa46   :  { %v6225_v4 = vpop.eup %6224 }
 0xa47   :  { %613 = vrot.lane.b32.xlu1 %v6225_v4, %s6561_s0 }
 0xab9   :  { %v614_v7 = vpop.permute.xlu1 %613 }
 0xaba   :  { %v616_v10 = vmul.f32 %v6223_v59, %v614_v7 }
 0xabc   :  { %v617_v12 = vpack.c.bf16 %v616_v10, %v616_v10 }
 0xabe   :  { %659 = vrot.lane.b32.xlu0 %v617_v12, %s6562_s5 }
 0xb30   :  { %v6798_v13 = vpop.permute.xlu0 %659 }
 0xb31   :  { %5604 = vmatmul.mubr.msk.bf16.vlgmr.msra.gmra.mrb[20].mxu0 %vm59_vm1, %v6798_v13 }
 0xb32   :  { %5616 = vmatpush3.bf16.msra.mxu0 %v6616_v6  ;;  %5619 = vmatprep.mubr.msk.bf16.mxu0 %vm6559_vm0, %v6558_v1 }
 0xb33   :  { %5617 = vmatprep.subr.bf16.mxu0 %v6558_v1 }
 0xb36   :  { %5618 = vmatpush3.bf16.msra.mxu0 %v6622_v9 }
 0xb37   :  { %5631 = vmatprep.subr.bf16.mxu0 %v6558_v1 }
 0xb39   :  { %5620 = vmatmul.mubr.msk.bf16.vlgmr.msra.gmra.mrb[24].mxu0 %vm59_vm1, %v6765_v32 }
 0xb3a   :  { %5632 = vmatpush3.bf16.msra.mxu0 %v6640_v37  ;;  %5635 = vmatprep.mubr.msk.bf16.mxu0 %vm6559_vm0, %v6558_v1 }
 0xb3b   :  { %5633 = vmatprep.subr.bf16.mxu0 %v6558_v1 }
 0xb3e   :  { %5634 = vmatpush3.bf16.msra.mxu0 %v6647_v41 }
 0xb3f   :  { %5647 = vmatprep.subr.bf16.mxu0 %v6558_v1 }
 0xc04   :  { %v698_v5 = vpop.f32.mrb[20].mxu0 }
 0xc05   :  { %v699_v29 = vadd.f32 %v698_v5, %v652_v50  ;;  %v5605_v17 = vpop.f32.mrb[21].mxu0 }
 0xc06   :  { %v701_v21 = vpop.f32.mrb[22].mxu0 }
 0xc07   :  { %v704_v22 = vadd.f32 %v699_v29, %v6712_v31  ;;  %v5606_v24 = vpop.f32.mrb[23].mxu0 }
 0xc09   :  { %6226 = vtanh.f32 %v704_v22  ;;  %v5167_v36 = vmul.f32 -1.442695, %v704_v22 }
 0xc0c   :  { %v810_v25 = vpop.f32.mrb[24].mxu0 }
 0xc0d   :  { %v817_v26 = vrot.slane %v810_v25, 6  ;;  %v5621_v27 = vpop.f32.mrb[25].mxu0 }
 0xc0e   :  { %v813_v28 = vpop.f32.mrb[26].mxu0 }
 0xc0f   :  { %v819_v2 = vadd.f32 %v817_v26, %v6630_v14  ;;  %v5622_v32 = vpop.f32.mrb[27].mxu0 }
 0xc11   :  { %6228 = vtanh.f32 %v819_v2  ;;  %v5170_v38 = vmul.f32 -1.442695, %v819_v2 }
 0xc12   :  { %6230 = vpow2.f32 %v5167_v36 }
 0xc13   :  { %v6227_v34 = vpop.eup %6226  ;;  %6232 = vpow2.f32 %v5170_v38 }
 0xc14   :  { %714 = vrot.lane.b32.xlu1 %v6227_v34, %s6561_s0 }
 0xc1b   :  { %v6229_v35 = vpop.eup %6228 }
 0xc1c   :  { %832 = vrot.lane.b32.xlu0 %v6229_v35, %s6561_s0  ;;  %v6231_v39 = vpop.eup %6230 }
 0xc1d   :  { %v708_v42 = vadd.f32 1.0, %v6231_v39  ;;  %v6233_v43 = vpop.eup %6232 }
 0xc1e   :  { %v823_v44 = vadd.f32 1.0, %v6233_v43 }
 0xc1f   :  { %6234 = vrcp.f32 %v708_v42 }
 0xc20   :  { %6236 = vrcp.f32 %v823_v44 }
 0xc29   :  { %v6235_v45 = vpop.eup %6234 }
 0xc2a   :  { %v6237_v48 = vpop.eup %6236  ;;  %v712_v51 = vmul.f32 %v6235_v45, %v6720_v0 }
 0xc2b   :  { %v830_v56 = vmul.f32 %v6237_v48, %v828_v55 }
 0xc86   :  { %v715_v46 = vpop.permute.xlu1 %714 }
 0xc87   :  { %v717_v47 = vmul.f32 %v6235_v45, %v715_v46 }
 0xc89   :  { %719 = vrot.lane.b32.xlu1 %v717_v47, %s6562_s5 }
 0xc8e   :  { %v833_v49 = vpop.permute.xlu0 %832 }
 0xc8f   :  { %v835_v50 = vmul.f32 %v6237_v48, %v833_v49 }
 0xc91   :  { %837 = vrot.lane.b32.xlu0 %v835_v50, %s6562_s5 }
 0xcfb   :  { %v720_v53 = vpop.permute.xlu1 %719 }
 0xcfc   :  { %v6823_v54 = vadd.f32 %v720_v53, %v712_v51 }
 0xcfe   :  { %6238 = vtanh.f32 %v6823_v54 }
 0xd03   :  { %v838_v57 = vpop.permute.xlu0 %837 }
 0xd04   :  { %v6827_v58 = vadd.f32 %v838_v57, %v830_v56 }
 0xd06   :  { %6240 = vtanh.f32 %v6827_v58 }
 0xd08   :  { %v6239_v59 = vpop.eup %6238 }
 0xd09   :  { %725 = vrot.lane.b32.xlu1 %v6239_v59, %s6561_s0 }
 0xd10   :  { %v6241_v60 = vpop.eup %6240 }
 0xd11   :  { %843 = vrot.lane.b32.xlu0 %v6241_v60, %s6561_s0 }
 0xd7b   :  { %v726_v0 = vpop.permute.xlu1 %725 }
 0xd7c   :  { %v6832_v61 = vmul.f32 %v6235_v45, %v726_v0 }
 0xd7e   :  { %v729_v62 = vpack.c.bf16 %v6832_v61, %v6832_v61 }
 0xd80   :  { %731 = vrot.lane.b32.xlu1 %v729_v62, %s6562_s5 }
 0xd83   :  { %v844_v8 = vpop.permute.xlu0 %843 }
 0xd84   :  { %v846_v63 = vmul.f32 %v6237_v48, %v844_v8 }
 0xd86   :  { %v847_v4 = vpack.c.bf16 %v846_v63, %v846_v63 }
 0xd88   :  { %v889_v7 = vrot.slane %v847_v4, 1 }
 0xd8a   :  { %890 = vrot.lane.b32.xlu0 %v889_v7, %s6562_s5 }
 0xdf2   :  { %v732_v10 = vpop.permute.xlu1 %731 }
 0xdf3   :  { %5612 = vmatmul.mubr.msk.bf16.vlgmr.msra.gmra.mrb[20].mxu1 %vm59_vm1, %v732_v10 }
 0xdf4   :  { %5624 = vmatpush3.bf16.msra.mxu1 %v6638_v33  ;;  %5627 = vmatprep.mubr.msk.bf16.mxu1 %vm6559_vm0, %v6558_v1 }
 0xdf5   :  { %5625 = vmatprep.subr.bf16.mxu1 %v6558_v1 }
 0xdf8   :  { %5626 = vmatpush3.bf16.msra.mxu1 %v6643_v40 }
 0xdf9   :  { %5639 = vmatprep.subr.bf16.mxu1 %v6558_v1 }
 0xdfb   :  { %5628 = vmatmul.mubr.msk.bf16.vlgmr.msra.gmra.mrb[24].mxu1 %vm59_vm1, %v6798_v13  ;;  %v6873_v13 = vld [vmem:[%s7910_s3 + $0x40] sm:$0x1] }
 0xdfc   :  { %5640 = vmatpush3.bf16.msra.mxu1 %v6673_v11  ;;  %v6848_v12 = vpop.permute.xlu0 %890  ;;  %5643 = vmatprep.mubr.msk.bf16.mxu1 %vm6559_vm0, %v6558_v1  ;;  %v427_v22 = vadd.f32 %v6787_v30, %v6873_v13 }
 0xdfd   :  { %5636 = vmatmul.mubr.msk.bf16.vlgmr.msra.gmra.mrb[28].mxu0 %vm59_vm1, %v6848_v12  ;;  %5641 = vmatprep.subr.bf16.mxu1 %v6558_v1 }
 0xdfe   :  { %5648 = vmatpush3.bf16.msra.mxu0 %v6675_v16  ;;  %5651 = vmatprep.mubr.msk.bf16.mxu0 %vm6559_vm0, %v6558_v1 }
 0xdff   :  { %5649 = vmatprep.subr.bf16.mxu0 %v6558_v1 }
 0xe00   :  { %5642 = vmatpush3.bf16.msra.mxu1 %v6678_v19 }
 0xe01   :  { %5655 = vmatprep.subr.bf16.mxu1 %v6558_v1 }
 0xe02   :  { %5650 = vmatpush3.bf16.msra.mxu0 %v6682_v20 }
 0xe03   :  { %5644 = vmatmul.mubr.msk.bf16.vlgmr.msra.gmra.mrb[28].mxu1 %vm59_vm1, %v732_v10  ;;  %5663 = vmatprep.subr.bf16.mxu0 %v6558_v1 }
 0xe04   :  { %5656 = vmatpush3.bf16.msra.mxu1 %v6737_v15  ;;  %5659 = vmatprep.mubr.msk.bf16.mxu1 %vm6559_vm0, %v6558_v1 }
 0xe05   :  { %5657 = vmatprep.subr.bf16.mxu1 %v6558_v1 }
 0xe08   :  { %5658 = vmatpush3.bf16.msra.mxu1 %v6743_v18 }
 0xe09   :  { %5671 = vmatprep.subr.bf16.mxu1 %v6558_v1 }
 0xec6   :  { %v770_v5 = vpop.f32.mrb[20].mxu1 }
 0xec7   :  { %v771_v29 = vadd.f32 %v770_v5, %v6873_v13  ;;  %v5613_v17 = vpop.f32.mrb[21].mxu1 }
 0xec8   :  { %v773_v21 = vpop.f32.mrb[22].mxu1 }
 0xec9   :  { %v2876_v24 = vrot.slane %v771_v29, 7  ;;  %v5614_v25 = vpop.f32.mrb[23].mxu1 }
 0xecb   :  { %v6879_v26 = vsel %vm2861_vm2, %v427_v22, %v2876_v24 }
 0xece   :  { %v882_v27 = vpop.f32.mrb[24].mxu1 }
 0xecf   :  { %v5629_v28 = vpop.f32.mrb[25].mxu1 }
 0xed0   :  { %v885_v2 = vpop.f32.mrb[26].mxu1  ;;  %v929_v32 = vpop.f32.mrb[28].mxu0 }
 0xed1   :  { %v930_v34 = vadd.f32 %v929_v32, %v882_v27  ;;  %v5630_v35 = vpop.f32.mrb[27].mxu1  ;;  %v5637_v36 = vpop.f32.mrb[29].mxu0 }
 0xed2   :  { %v932_v38 = vpop.f32.mrb[30].mxu0 }
 0xed3   :  { %v935_v39 = vadd.f32 %v930_v34, %v6665_v52  ;;  %v5638_v42 = vpop.f32.mrb[31].mxu0 }
 0xed5   :  { %6242 = vtanh.f32 %v935_v39  ;;  %v5173_v47 = vmul.f32 -1.442695, %v935_v39 }
 0xed6   :  { %v995_v43 = vpop.f32.mrb[28].mxu1 }
 0xed7   :  { %v5645_v30 = vpop.f32.mrb[29].mxu1  ;;  %6244 = vpow2.f32 %v5173_v47 }
 0xed8   :  { %v998_v44 = vpop.f32.mrb[30].mxu1 }
 0xed9   :  { %v5646_v45 = vpop.f32.mrb[31].mxu1 }
 0xedf   :  { %v6243_v46 = vpop.eup %6242 }
 0xee0   :  { %945 = vrot.lane.b32.xlu1 %v6243_v46, %s6561_s0 }
 0xee1   :  { %v6245_v48 = vpop.eup %6244 }
 0xee2   :  { %v939_v49 = vadd.f32 1.0, %v6245_v48  ;;  %v1171_v48 = vrot.slane %v6827_v58, 7 }
 0xee4   :  { %6246 = vrcp.f32 %v939_v49 }
 0xeee   :  { %v6247_v50 = vpop.eup %6246 }
 0xeef   :  { %v943_v55 = vmul.f32 %v6247_v50, %v6793_v3 }
 0xf52   :  { %v946_v51 = vpop.permute.xlu1 %945 }
 0xf53   :  { %v948_v53 = vmul.f32 %v6247_v50, %v946_v51 }
 0xf55   :  { %950 = vrot.lane.b32.xlu0 %v948_v53, %s6562_s5 }
 0xfc7   :  { %v951_v56 = vpop.permute.xlu0 %950 }
 0xfc8   :  { %v6885_v57 = vadd.f32 %v951_v56, %v943_v55 }
 0xfca   :  { %6248 = vtanh.f32 %v6885_v57 }
 0xfd4   :  { %v6249_v59 = vpop.eup %6248 }
 0xfd5   :  { %956 = vrot.lane.b32.xlu1 %v6249_v59, %s6561_s0 }
0x1047   :  { %v957_v60 = vpop.permute.xlu1 %956 }
0x1048   :  { %v959_v0 = vmul.f32 %v6247_v50, %v957_v60 }
0x104a   :  { %v960_v62 = vpack.c.bf16 %v959_v0, %v959_v0 }
0x104c   :  { %1002 = vrot.lane.b32.xlu0 %v960_v62, %s6562_s5 }
0x10be   :  { %v6890_v8 = vpop.permute.xlu0 %1002 }
0x10bf   :  { %5652 = vmatmul.mubr.msk.bf16.vlgmr.msra.gmra.mrb[32].mxu0 %vm59_vm1, %v6890_v8 }
0x10c0   :  { %5664 = vmatpush3.bf16.msra.mxu0 %v6616_v6  ;;  %5667 = vmatprep.mubr.msk.bf16.mxu0 %vm6559_vm0, %v6558_v1 }
0x10c1   :  { %5665 = vmatprep.subr.bf16.mxu0 %v6558_v1 }
0x10c4   :  { %5666 = vmatpush3.bf16.msra.mxu0 %v6622_v9 }
0x10c5   :  { %5679 = vmatprep.subr.bf16.mxu0 %v6558_v1 }
0x10c7   :  { %5668 = vmatmul.mubr.msk.bf16.vlgmr.msra.gmra.mrb[36].mxu0 %vm59_vm1, %v6848_v12 }
0x10c8   :  { %5680 = vmatpush3.bf16.msra.mxu0 %v6640_v37  ;;  %5683 = vmatprep.mubr.msk.bf16.mxu0 %vm6559_vm0, %v6558_v1 }
0x10c9   :  { %5681 = vmatprep.subr.bf16.mxu0 %v6558_v1 }
0x10cc   :  { %5682 = vmatpush3.bf16.msra.mxu0 %v6647_v41 }
0x10cd   :  { %5695 = vmatprep.subr.bf16.mxu0 %v6558_v1 }
0x1192   :  { %v1041_v3 = vpop.f32.mrb[32].mxu0 }
0x1193   :  { %v1042_v63 = vadd.f32 %v1041_v3, %v995_v43  ;;  %v5653_v4 = vpop.f32.mrb[33].mxu0 }
0x1194   :  { %v1044_v7 = vpop.f32.mrb[34].mxu0 }
0x1195   :  { %v1047_v10 = vadd.f32 %v1042_v63, %v6712_v31  ;;  %v5654_v5 = vpop.f32.mrb[35].mxu0 }
0x1197   :  { %6250 = vtanh.f32 %v1047_v10  ;;  %v5176_v28 = vmul.f32 -1.442695, %v1047_v10 }
0x119a   :  { %v1153_v12 = vpop.f32.mrb[36].mxu0 }
0x119b   :  { %v1160_v29 = vrot.slane %v1153_v12, 5  ;;  %v5669_v17 = vpop.f32.mrb[37].mxu0 }
0x119c   :  { %v1156_v21 = vpop.f32.mrb[38].mxu0 }
0x119d   :  { %v1162_v22 = vadd.f32 %v1160_v29, %v6630_v14  ;;  %v5670_v24 = vpop.f32.mrb[39].mxu0 }
0x119f   :  { %6252 = vtanh.f32 %v1162_v22  ;;  %v5179_v2 = vmul.f32 -1.442695, %v1162_v22 }
0x11a0   :  { %6254 = vpow2.f32 %v5176_v28 }
0x11a1   :  { %v6251_v25 = vpop.eup %6250  ;;  %6256 = vpow2.f32 %v5179_v2 }
0x11a2   :  { %1057 = vrot.lane.b32.xlu1 %v6251_v25, %s6561_s0 }
0x11a9   :  { %v6253_v27 = vpop.eup %6252 }
0x11aa   :  { %1175 = vrot.lane.b32.xlu0 %v6253_v27, %s6561_s0  ;;  %v6255_v32 = vpop.eup %6254 }
0x11ab   :  { %v1051_v34 = vadd.f32 1.0, %v6255_v32  ;;  %v6257_v35 = vpop.eup %6256 }
0x11ac   :  { %v1166_v36 = vadd.f32 1.0, %v6257_v35 }
0x11ad   :  { %6258 = vrcp.f32 %v1051_v34 }
0x11ae   :  { %6260 = vrcp.f32 %v1166_v36 }
0x11b7   :  { %v6259_v38 = vpop.eup %6258 }
0x11b8   :  { %v6261_v43 = vpop.eup %6260  ;;  %v1055_v45 = vmul.f32 %v6259_v38, %v6823_v54  ;;  %v2841_v54 = vrot.slane %v6832_v61, 7 }
0x11b9   :  { %v1173_v49 = vmul.f32 %v6261_v43, %v1171_v48 }
0x11ba   :  { %v2862_v58 = vsel %vm2861_vm2, %v6749_v23, %v2841_v54 }
0x1214   :  { %v1058_v39 = vpop.permute.xlu1 %1057 }
0x1215   :  { %v1060_v42 = vmul.f32 %v6259_v38, %v1058_v39 }
0x1217   :  { %1062 = vrot.lane.b32.xlu1 %v1060_v42, %s6562_s5 }
0x121c   :  { %v1176_v30 = vpop.permute.xlu0 %1175 }
0x121d   :  { %v1178_v44 = vmul.f32 %v6261_v43, %v1176_v30 }
0x121f   :  { %1180 = vrot.lane.b32.xlu0 %v1178_v44, %s6562_s5 }
0x1289   :  { %v1063_v46 = vpop.permute.xlu1 %1062 }
0x128a   :  { %v6915_v47 = vadd.f32 %v1063_v46, %v1055_v45 }
0x128c   :  { %6262 = vtanh.f32 %v6915_v47 }
0x1291   :  { %v1181_v50 = vpop.permute.xlu0 %1180 }
0x1292   :  { %v6919_v51 = vadd.f32 %v1181_v50, %v1173_v49 }
0x1294   :  { %6264 = vtanh.f32 %v6919_v51 }
0x1296   :  { %v6263_v53 = vpop.eup %6262 }
0x1297   :  { %1068 = vrot.lane.b32.xlu1 %v6263_v53, %s6561_s0 }
0x129e   :  { %v6265_v55 = vpop.eup %6264 }
0x129f   :  { %1186 = vrot.lane.b32.xlu0 %v6265_v55, %s6561_s0 }
0x1309   :  { %v1069_v56 = vpop.permute.xlu1 %1068 }
0x130a   :  { %v1071_v59 = vmul.f32 %v6259_v38, %v1069_v56 }
0x130c   :  { %v1072_v60 = vpack.c.bf16 %v1071_v59, %v1071_v59  ;;  %v2844_v0 = vrot.slane %v1071_v59, 6 }
0x130e   :  { %1074 = vrot.lane.b32.xlu1 %v1072_v60, %s6562_s5  ;;  %v6929_v62 = vsel %vm2863_vm3, %v2862_v58, %v2844_v0 }
0x1311   :  { %v1187_v3 = vpop.permute.xlu0 %1186 }
0x1312   :  { %v1189_v63 = vmul.f32 %v6261_v43, %v1187_v3 }
0x1314   :  { %v1190_v4 = vpack.c.bf16 %v1189_v63, %v1189_v63 }
0x1316   :  { %v1232_v7 = vshrl.u32 %v1190_v4, 16 }
0x1318   :  { %v1234_v10 = vrot.slane %v1232_v7, 1 }
0x131a   :  { %1235 = vrot.lane.b32.xlu0 %v1234_v10, %s6562_s5 }
0x1380   :  { %v1075_v61 = vpop.permute.xlu1 %1074 }
0x1381   :  { %5660 = vmatmul.mubr.msk.bf16.vlgmr.msra.gmra.mrb[32].mxu1 %vm59_vm1, %v1075_v61 }
0x1382   :  { %5672 = vmatpush3.bf16.msra.mxu1 %v6638_v33  ;;  %5675 = vmatprep.mubr.msk.bf16.mxu1 %vm6559_vm0, %v6558_v1 }
0x1383   :  { %5673 = vmatprep.subr.bf16.mxu1 %v6558_v1 }
0x1386   :  { %5674 = vmatpush3.bf16.msra.mxu1 %v6643_v40 }
0x1387   :  { %5687 = vmatprep.subr.bf16.mxu1 %v6558_v1 }
0x1389   :  { %5676 = vmatmul.mubr.msk.bf16.vlgmr.msra.gmra.mrb[36].mxu1 %vm59_vm1, %v6890_v8 }
0x138a   :  { %5688 = vmatpush3.bf16.msra.mxu1 %v6673_v11  ;;  %5691 = vmatprep.mubr.msk.bf16.mxu1 %vm6559_vm0, %v6558_v1 }
0x138b   :  { %5689 = vmatprep.subr.bf16.mxu1 %v6558_v1 }
0x138c   :  { %v6945_v23 = vpop.permute.xlu0 %1235 }
0x138d   :  { %5684 = vmatmul.mubr.msk.bf16.vlgmr.msra.gmra.mrb[40].mxu0 %vm59_vm1, %v6945_v23 }
0x138e   :  { %5690 = vmatpush3.bf16.msra.mxu1 %v6678_v19  ;;  %5696 = vmatpush3.bf16.msra.mxu0 %v6675_v16 }
0x138f   :  { %5697 = vmatprep.subr.bf16.mxu0 %v6558_v1  ;;  %5699 = vmatprep.mubr.msk.bf16.mxu0 %vm6559_vm0, %v6558_v1 }
0x1390   :  { %5703 = vmatprep.subr.bf16.mxu1 %v6558_v1 }
0x1391   :  { %5692 = vmatmul.mubr.msk.bf16.vlgmr.msra.gmra.mrb[40].mxu1 %vm59_vm1, %v1075_v61 }
0x1392   :  { %5698 = vmatpush3.bf16.msra.mxu0 %v6682_v20  ;;  %5704 = vmatpush3.bf16.msra.mxu1 %v6737_v15 }
0x1393   :  { %5711 = vmatprep.subr.bf16.mxu0 %v6558_v1  ;;  %5705 = vmatprep.subr.bf16.mxu1 %v6558_v1 }
0x1394   :  { %5707 = vmatprep.mubr.msk.bf16.mxu1 %vm6559_vm0, %v6558_v1 }
0x1396   :  { %5706 = vmatpush3.bf16.msra.mxu1 %v6743_v18 }
0x1397   :  { %5719 = vmatprep.subr.bf16.mxu1 %v6558_v1 }
0x1454   :  { %v1113_v8 = vpop.f32.mrb[32].mxu1 }
0x1455   :  { %v1114_v5 = vadd.f32 %v1113_v8, %v6873_v13  ;;  %v5661_v12 = vpop.f32.mrb[33].mxu1 }
0x1456   :  { %v1116_v29 = vpop.f32.mrb[34].mxu1 }
0x1457   :  { %v2879_v17 = vrot.slane %v1114_v5, 6  ;;  %v5662_v21 = vpop.f32.mrb[35].mxu1 }
0x1459   :  { %v6967_v22 = vsel %vm2863_vm3, %v6879_v26, %v2879_v17 }
0x145c   :  { %v1225_v24 = vpop.f32.mrb[36].mxu1 }
0x145d   :  { %v5677_v25 = vpop.f32.mrb[37].mxu1 }
0x145e   :  { %v1228_v27 = vpop.f32.mrb[38].mxu1 }
0x145f   :  { %v5678_v28 = vpop.f32.mrb[39].mxu1 }
0x1460   :  { %v1274_v2 = vpop.f32.mrb[40].mxu0 }
0x1461   :  { %v1275_v32 = vadd.f32 %v1274_v2, %v1225_v24  ;;  %v5685_v34 = vpop.f32.mrb[41].mxu0 }
0x1462   :  { %v1277_v35 = vpop.f32.mrb[42].mxu0 }
0x1463   :  { %v1280_v36 = vadd.f32 %v1275_v32, %v6665_v52  ;;  %v5686_v38 = vpop.f32.mrb[43].mxu0 }
0x1464   :  { %v1340_v39 = vpop.f32.mrb[40].mxu1 }
0x1465   :  { %6266 = vtanh.f32 %v1280_v36  ;;  %v5693_v42 = vpop.f32.mrb[41].mxu1  ;;  %v5182_v26 = vmul.f32 -1.442695, %v1280_v36 }
0x1466   :  { %v1343_v43 = vpop.f32.mrb[42].mxu1 }
0x1467   :  { %v5694_v30 = vpop.f32.mrb[43].mxu1  ;;  %6268 = vpow2.f32 %v5182_v26 }
0x1468   :  { %v1516_v30 = vrot.slane %v6919_v51, 7 }
0x146f   :  { %v6267_v44 = vpop.eup %6266 }
0x1470   :  { %1290 = vrot.lane.b32.xlu1 %v6267_v44, %s6561_s0 }
0x1471   :  { %v6269_v45 = vpop.eup %6268 }
0x1472   :  { %v1284_v46 = vadd.f32 1.0, %v6269_v45 }
0x1474   :  { %6270 = vrcp.f32 %v1284_v46 }
0x147e   :  { %v6271_v48 = vpop.eup %6270 }
0x147f   :  { %v1288_v52 = vmul.f32 %v6271_v48, %v6885_v57 }
0x14e2   :  { %v1291_v49 = vpop.permute.xlu1 %1290 }
0x14e3   :  { %v1293_v50 = vmul.f32 %v6271_v48, %v1291_v49 }
0x14e5   :  { %1295 = vrot.lane.b32.xlu0 %v1293_v50, %s6562_s5 }
0x1557   :  { %v1296_v53 = vpop.permute.xlu0 %1295 }
0x1558   :  { %v6973_v55 = vadd.f32 %v1296_v53, %v1288_v52 }
0x155a   :  { %6272 = vtanh.f32 %v6973_v55 }
0x1564   :  { %v6273_v54 = vpop.eup %6272 }
0x1565   :  { %1301 = vrot.lane.b32.xlu1 %v6273_v54, %s6561_s0 }
0x15d7   :  { %v1302_v56 = vpop.permute.xlu1 %1301 }
0x15d8   :  { %v1304_v59 = vmul.f32 %v6271_v48, %v1302_v56 }
0x15da   :  { %v1305_v60 = vpack.c.bf16 %v1304_v59, %v1304_v59 }
0x15dc   :  { %1347 = vrot.lane.b32.xlu0 %v1305_v60, %s6562_s5 }
0x164e   :  { %v6978_v0 = vpop.permute.xlu0 %1347 }
0x164f   :  { %5700 = vmatmul.mubr.msk.bf16.vlgmr.msra.gmra.mrb[44].mxu0 %vm59_vm1, %v6978_v0 }
0x1650   :  { %5712 = vmatpush3.bf16.msra.mxu0 %v6616_v6  ;;  %5715 = vmatprep.mubr.msk.bf16.mxu0 %vm6559_vm0, %v6558_v1 }
0x1651   :  { %5713 = vmatprep.subr.bf16.mxu0 %v6558_v1 }
0x1654   :  { %5714 = vmatpush3.bf16.msra.mxu0 %v6622_v9 }
0x1655   :  { %5727 = vmatprep.subr.bf16.mxu0 %v6558_v1 }
0x1657   :  { %5716 = vmatmul.mubr.msk.bf16.vlgmr.msra.gmra.mrb[48].mxu0 %vm59_vm1, %v6945_v23 }
0x1658   :  { %5728 = vmatpush3.bf16.msra.mxu0 %v6640_v37  ;;  %5731 = vmatprep.mubr.msk.bf16.mxu0 %vm6559_vm0, %v6558_v1 }
0x1659   :  { %5729 = vmatprep.subr.bf16.mxu0 %v6558_v1 }
0x165c   :  { %5730 = vmatpush3.bf16.msra.mxu0 %v6647_v41 }
0x165d   :  { %5743 = vmatprep.subr.bf16.mxu0 %v6558_v1 }
0x1722   :  { %v1386_v57 = vpop.f32.mrb[44].mxu0 }
0x1723   :  { %v1387_v58 = vadd.f32 %v1386_v57, %v1340_v39  ;;  %v5701_v3 = vpop.f32.mrb[45].mxu0 }
0x1724   :  { %v1389_v63 = vpop.f32.mrb[46].mxu0 }
0x1725   :  { %v1392_v4 = vadd.f32 %v1387_v58, %v6712_v31  ;;  %v5702_v7 = vpop.f32.mrb[47].mxu0 }
0x1727   :  { %6274 = vtanh.f32 %v1392_v4  ;;  %v5185_v21 = vmul.f32 -1.442695, %v1392_v4 }
0x172a   :  { %v1498_v10 = vpop.f32.mrb[48].mxu0 }
0x172b   :  { %v1505_v61 = vrot.slane %v1498_v10, 4  ;;  %v5717_v23 = vpop.f32.mrb[49].mxu0 }
0x172c   :  { %v1501_v8 = vpop.f32.mrb[50].mxu0 }
0x172d   :  { %v1507_v5 = vadd.f32 %v1505_v61, %v6630_v14  ;;  %v5718_v12 = vpop.f32.mrb[51].mxu0 }
0x172f   :  { %6276 = vtanh.f32 %v1507_v5  ;;  %v5188_v24 = vmul.f32 -1.442695, %v1507_v5 }
0x1730   :  { %6278 = vpow2.f32 %v5185_v21  ;;  %v7055_v21 = vld [vmem:[#allocation3 + $0x70] sm:$0x1] }
0x1731   :  { %v6275_v29 = vpop.eup %6274  ;;  %6280 = vpow2.f32 %v5188_v24 }
0x1732   :  { %1402 = vrot.lane.b32.xlu1 %v6275_v29, %s6561_s0 }
0x1739   :  { %v6277_v17 = vpop.eup %6276 }
0x173a   :  { %1520 = vrot.lane.b32.xlu0 %v6277_v17, %s6561_s0  ;;  %v6279_v31 = vpop.eup %6278 }
0x173b   :  { %v1396_v25 = vadd.f32 1.0, %v6279_v31  ;;  %v6281_v27 = vpop.eup %6280 }
0x173c   :  { %v1511_v28 = vadd.f32 1.0, %v6281_v27 }
0x173d   :  { %6282 = vrcp.f32 %v1396_v25 }
0x173e   :  { %6284 = vrcp.f32 %v1511_v28 }
0x1747   :  { %v6283_v2 = vpop.eup %6282 }
0x1748   :  { %v6285_v35 = vpop.eup %6284  ;;  %v1400_v39 = vmul.f32 %v6283_v2, %v6915_v47 }
0x1749   :  { %v1518_v44 = vmul.f32 %v6285_v35, %v1516_v30 }
0x17a4   :  { %v1403_v32 = vpop.permute.xlu1 %1402 }
0x17a5   :  { %v1405_v34 = vmul.f32 %v6283_v2, %v1403_v32 }
0x17a7   :  { %1407 = vrot.lane.b32.xlu1 %v1405_v34, %s6562_s5 }
0x17ac   :  { %v1521_v36 = vpop.permute.xlu0 %1520 }
0x17ad   :  { %v1523_v38 = vmul.f32 %v6285_v35, %v1521_v36 }
0x17af   :  { %1525 = vrot.lane.b32.xlu0 %v1523_v38, %s6562_s5 }
0x1819   :  { %v1408_v42 = vpop.permute.xlu1 %1407 }
0x181a   :  { %v7003_v43 = vadd.f32 %v1408_v42, %v1400_v39 }
0x181c   :  { %6286 = vtanh.f32 %v7003_v43 }
0x1821   :  { %v1526_v26 = vpop.permute.xlu0 %1525 }
0x1822   :  { %v7007_v45 = vadd.f32 %v1526_v26, %v1518_v44 }
0x1824   :  { %6288 = vtanh.f32 %v7007_v45 }
0x1826   :  { %v6287_v46 = vpop.eup %6286 }
0x1827   :  { %1413 = vrot.lane.b32.xlu1 %v6287_v46, %s6561_s0 }
0x182e   :  { %v6289_v48 = vpop.eup %6288 }
0x182f   :  { %1531 = vrot.lane.b32.xlu0 %v6289_v48, %s6561_s0 }
0x1899   :  { %v1414_v47 = vpop.permute.xlu1 %1413 }
0x189a   :  { %v1416_v49 = vmul.f32 %v6283_v2, %v1414_v47 }
0x189c   :  { %v1417_v50 = vpack.c.bf16 %v1416_v49, %v1416_v49  ;;  %v2847_v52 = vrot.slane %v1416_v49, 5 }
0x189e   :  { %1419 = vrot.lane.b32.xlu1 %v1417_v50, %s6562_s5  ;;  %v7015_v51 = vsel %vm2865_vm4, %v6929_v62, %v2847_v52 }
0x18a1   :  { %v1532_v53 = vpop.permute.xlu0 %1531 }
0x18a2   :  { %v1534_v54 = vmul.f32 %v6285_v35, %v1532_v53 }
0x18a4   :  { %v1535_v56 = vpack.c.bf16 %v1534_v54, %v1534_v54  ;;  %v7084_v54 = vld [vmem:[#allocation3 + $0xb8] sm:$0x1] }
0x18a6   :  { %v1577_v59 = vrot.slane %v1535_v56, 2 }
0x18a8   :  { %1578 = vrot.lane.b32.xlu0 %v1577_v59, %s6562_s5 }
0x1910   :  { %v1420_v60 = vpop.permute.xlu1 %1419 }
0x1911   :  { %5708 = vmatmul.mubr.msk.bf16.vlgmr.msra.gmra.mrb[44].mxu1 %vm59_vm1, %v1420_v60 }
0x1912   :  { %5720 = vmatpush3.bf16.msra.mxu1 %v6638_v33  ;;  %5723 = vmatprep.mubr.msk.bf16.mxu1 %vm6559_vm0, %v6558_v1 }
0x1913   :  { %5721 = vmatprep.subr.bf16.mxu1 %v6558_v1 }
0x1916   :  { %5722 = vmatpush3.bf16.msra.mxu1 %v6643_v40 }
0x1917   :  { %5735 = vmatprep.subr.bf16.mxu1 %v6558_v1 }
0x1919   :  { %5724 = vmatmul.mubr.msk.bf16.vlgmr.msra.gmra.mrb[48].mxu1 %vm59_vm1, %v6978_v0 }
0x191a   :  { %5736 = vmatpush3.bf16.msra.mxu1 %v6673_v11  ;;  %v7028_v62 = vpop.permute.xlu0 %1578  ;;  %5739 = vmatprep.mubr.msk.bf16.mxu1 %vm6559_vm0, %v6558_v1 }
0x191b   :  { %5732 = vmatmul.mubr.msk.bf16.vlgmr.msra.gmra.mrb[52].mxu0 %vm59_vm1, %v7028_v62  ;;  %5737 = vmatprep.subr.bf16.mxu1 %v6558_v1 }
0x191c   :  { %5744 = vmatpush3.bf16.msra.mxu0 %v6675_v16  ;;  %5747 = vmatprep.mubr.msk.bf16.mxu0 %vm6559_vm0, %v6558_v1 }
0x191d   :  { %5745 = vmatprep.subr.bf16.mxu0 %v6558_v1 }
0x191e   :  { %5738 = vmatpush3.bf16.msra.mxu1 %v6678_v19 }
0x191f   :  { %5751 = vmatprep.subr.bf16.mxu1 %v6558_v1 }
0x1920   :  { %5746 = vmatpush3.bf16.msra.mxu0 %v6682_v20 }
0x1921   :  { %5740 = vmatmul.mubr.msk.bf16.vlgmr.msra.gmra.mrb[52].mxu1 %vm59_vm1, %v1420_v60  ;;  %5759 = vmatprep.subr.bf16.mxu0 %v6558_v1 }
0x1922   :  { %5752 = vmatpush3.bf16.msra.mxu1 %v6737_v15  ;;  %5755 = vmatprep.mubr.msk.bf16.mxu1 %vm6559_vm0, %v6558_v1 }
0x1923   :  { %5753 = vmatprep.subr.bf16.mxu1 %v6558_v1 }
0x1926   :  { %5754 = vmatpush3.bf16.msra.mxu1 %v6743_v18 }
0x1927   :  { %5767 = vmatprep.subr.bf16.mxu1 %v6558_v1 }
0x19e4   :  { %v1458_v0 = vpop.f32.mrb[44].mxu1 }
0x19e5   :  { %v1459_v57 = vadd.f32 %v1458_v0, %v6873_v13  ;;  %v5709_v58 = vpop.f32.mrb[45].mxu1 }
0x19e6   :  { %v1461_v3 = vpop.f32.mrb[46].mxu1 }
0x19e7   :  { %v2882_v63 = vrot.slane %v1459_v57, 5  ;;  %v5710_v4 = vpop.f32.mrb[47].mxu1 }
0x19e9   :  { %v7053_v7 = vsel %vm2865_vm4, %v6967_v22, %v2882_v63 }
0x19ec   :  { %v1570_v10 = vpop.f32.mrb[48].mxu1 }
0x19ed   :  { %v5725_v61 = vpop.f32.mrb[49].mxu1 }
0x19ee   :  { %v1573_v23 = vpop.f32.mrb[50].mxu1  ;;  %v1617_v8 = vpop.f32.mrb[52].mxu0 }
0x19ef   :  { %v1618_v5 = vadd.f32 %v1617_v8, %v1570_v10  ;;  %v5726_v12 = vpop.f32.mrb[51].mxu1  ;;  %v5733_v29 = vpop.f32.mrb[53].mxu0 }
0x19f0   :  { %v1620_v17 = vpop.f32.mrb[54].mxu0 }
0x19f1   :  { %v1623_v24 = vadd.f32 %v7055_v21, %v1618_v5  ;;  %v5734_v31 = vpop.f32.mrb[55].mxu0 }
0x19f3   :  { %6290 = vtanh.f32 %v1623_v24  ;;  %v5191_v32 = vmul.f32 -1.442695, %v1623_v24 }
0x19f4   :  { %v1683_v25 = vpop.f32.mrb[52].mxu1 }
0x19f5   :  { %v5741_v27 = vpop.f32.mrb[53].mxu1  ;;  %6292 = vpow2.f32 %v5191_v32  ;;  %v1859_v32 = vrot.slane %v7007_v45, 7 }
0x19f6   :  { %v1686_v28 = vpop.f32.mrb[54].mxu1 }
0x19f7   :  { %v5742_v2 = vpop.f32.mrb[55].mxu1 }
0x19fd   :  { %v6291_v22 = vpop.eup %6290 }
0x19fe   :  { %1633 = vrot.lane.b32.xlu1 %v6291_v22, %s6561_s0 }
0x19ff   :  { %v6293_v34 = vpop.eup %6292 }
0x1a00   :  { %v1627_v35 = vadd.f32 1.0, %v6293_v34 }
0x1a02   :  { %6294 = vrcp.f32 %v1627_v35 }
0x1a0c   :  { %v6295_v36 = vpop.eup %6294 }
0x1a0d   :  { %v1631_v42 = vmul.f32 %v6295_v36, %v6973_v55 }
0x1a70   :  { %v1634_v38 = vpop.permute.xlu1 %1633 }
0x1a71   :  { %v1636_v39 = vmul.f32 %v6295_v36, %v1634_v38 }
0x1a73   :  { %1638 = vrot.lane.b32.xlu0 %v1636_v39, %s6562_s5 }
0x1ae5   :  { %v1639_v30 = vpop.permute.xlu0 %1638 }
0x1ae6   :  { %v7061_v44 = vadd.f32 %v1639_v30, %v1631_v42 }
0x1ae8   :  { %6296 = vtanh.f32 %v7061_v44 }
0x1af2   :  { %v6297_v26 = vpop.eup %6296 }
0x1af3   :  { %1644 = vrot.lane.b32.xlu1 %v6297_v26, %s6561_s0 }
0x1b65   :  { %v1645_v46 = vpop.permute.xlu1 %1644 }
0x1b66   :  { %v1647_v48 = vmul.f32 %v6295_v36, %v1645_v46 }
0x1b68   :  { %v1648_v47 = vpack.c.bf16 %v1647_v48, %v1647_v48 }
0x1b6a   :  { %1690 = vrot.lane.b32.xlu0 %v1648_v47, %s6562_s5 }
0x1bdc   :  { %v7066_v49 = vpop.permute.xlu0 %1690 }
0x1bdd   :  { %5748 = vmatmul.mubr.msk.bf16.vlgmr.msra.gmra.mrb[56].mxu0 %vm59_vm1, %v7066_v49 }
0x1bde   :  { %5760 = vmatpush3.bf16.msra.mxu0 %v6616_v6  ;;  %5763 = vmatprep.mubr.msk.bf16.mxu0 %vm6559_vm0, %v6558_v1 }
0x1bdf   :  { %5761 = vmatprep.subr.bf16.mxu0 %v6558_v1 }
0x1be2   :  { %5762 = vmatpush3.bf16.msra.mxu0 %v6622_v9 }
0x1be3   :  { %5775 = vmatprep.subr.bf16.mxu0 %v6558_v1 }
0x1be5   :  { %5764 = vmatmul.mubr.msk.bf16.vlgmr.msra.gmra.mrb[60].mxu0 %vm59_vm1, %v7028_v62 }
0x1be6   :  { %5776 = vmatpush3.bf16.msra.mxu0 %v6640_v37  ;;  %5779 = vmatprep.mubr.msk.bf16.mxu0 %vm6559_vm0, %v6558_v1 }
0x1be7   :  { %5777 = vmatprep.subr.bf16.mxu0 %v6558_v1 }
0x1bea   :  { %5778 = vmatpush3.bf16.msra.mxu0 %v6647_v41 }
0x1beb   :  { %5791 = vmatprep.subr.bf16.mxu0 %v6558_v1 }
0x1cb0   :  { %v1729_v55 = vpop.f32.mrb[56].mxu0 }
0x1cb1   :  { %v1730_v50 = vadd.f32 %v1729_v55, %v1683_v25  ;;  %v5749_v52 = vpop.f32.mrb[57].mxu0 }
0x1cb2   :  { %v1732_v53 = vpop.f32.mrb[58].mxu0 }
0x1cb3   :  { %v1735_v56 = vadd.f32 %v7084_v54, %v1730_v50  ;;  %v5750_v59 = vpop.f32.mrb[59].mxu0 }
0x1cb5   :  { %6298 = vtanh.f32 %v1735_v56  ;;  %v5194_v10 = vmul.f32 -1.442695, %v1735_v56 }
0x1cb8   :  { %v1841_v60 = vpop.f32.mrb[60].mxu0 }
0x1cb9   :  { %v1848_v62 = vrot.slane %v1841_v60, 3  ;;  %v5765_v0 = vpop.f32.mrb[61].mxu0 }
0x1cba   :  { %v1844_v57 = vpop.f32.mrb[62].mxu0 }
0x1cbb   :  { %v1850_v58 = vadd.f32 %v1848_v62, %v6630_v14  ;;  %v5766_v3 = vpop.f32.mrb[63].mxu0 }
0x1cbd   :  { %6300 = vtanh.f32 %v1850_v58  ;;  %v5197_v61 = vmul.f32 -1.442695, %v1850_v58 }
0x1cbe   :  { %6302 = vpow2.f32 %v5194_v10 }
0x1cbf   :  { %v6299_v63 = vpop.eup %6298  ;;  %6304 = vpow2.f32 %v5197_v61 }
0x1cc0   :  { %1745 = vrot.lane.b32.xlu1 %v6299_v63, %s6561_s0 }
0x1cc7   :  { %v6301_v4 = vpop.eup %6300 }
0x1cc8   :  { %1863 = vrot.lane.b32.xlu0 %v6301_v4, %s6561_s0  ;;  %v6303_v23 = vpop.eup %6302 }
0x1cc9   :  { %v1739_v8 = vadd.f32 1.0, %v6303_v23  ;;  %v6305_v5 = vpop.eup %6304 }
0x1cca   :  { %v1854_v12 = vadd.f32 1.0, %v6305_v5 }
0x1ccb   :  { %6306 = vrcp.f32 %v1739_v8 }
0x1ccc   :  { %6308 = vrcp.f32 %v1854_v12 }
0x1cd5   :  { %v6307_v29 = vpop.eup %6306 }
0x1cd6   :  { %v6309_v31 = vpop.eup %6308  ;;  %v1743_v28 = vmul.f32 %v6307_v29, %v7003_v43 }
0x1cd7   :  { %v1861_v34 = vmul.f32 %v6309_v31, %v1859_v32 }
0x1d32   :  { %v1746_v17 = vpop.permute.xlu1 %1745 }
0x1d33   :  { %v1748_v24 = vmul.f32 %v6307_v29, %v1746_v17 }
0x1d35   :  { %1750 = vrot.lane.b32.xlu1 %v1748_v24, %s6562_s5 }
0x1d3a   :  { %v1864_v25 = vpop.permute.xlu0 %1863 }
0x1d3b   :  { %v1866_v27 = vmul.f32 %v6309_v31, %v1864_v25 }
0x1d3d   :  { %1868 = vrot.lane.b32.xlu0 %v1866_v27, %s6562_s5 }
0x1da7   :  { %v1751_v2 = vpop.permute.xlu1 %1750 }
0x1da8   :  { %v7093_v22 = vadd.f32 %v1751_v2, %v1743_v28 }
0x1daa   :  { %6310 = vtanh.f32 %v7093_v22 }
0x1daf   :  { %v1869_v35 = vpop.permute.xlu0 %1868 }
0x1db0   :  { %v7097_v36 = vadd.f32 %v1869_v35, %v1861_v34 }
0x1db2   :  { %6312 = vtanh.f32 %v7097_v36 }
0x1db4   :  { %v6311_v38 = vpop.eup %6310 }
0x1db5   :  { %1756 = vrot.lane.b32.xlu1 %v6311_v38, %s6561_s0 }
0x1dbc   :  { %v6313_v39 = vpop.eup %6312 }
0x1dbd   :  { %1874 = vrot.lane.b32.xlu0 %v6313_v39, %s6561_s0 }
0x1e27   :  { %v1757_v43 = vpop.permute.xlu1 %1756 }
0x1e28   :  { %v1759_v42 = vmul.f32 %v6307_v29, %v1757_v43 }
0x1e2a   :  { %v1760_v30 = vpack.c.bf16 %v1759_v42, %v1759_v42  ;;  %v2850_v26 = vrot.slane %v1759_v42, 4 }
0x1e2c   :  { %1762 = vrot.lane.b32.xlu1 %v1760_v30, %s6562_s5  ;;  %v7105_v45 = vsel %vm2867_vm5, %v7015_v51, %v2850_v26 }
0x1e2f   :  { %v1875_v46 = vpop.permute.xlu0 %1874 }
0x1e30   :  { %v1877_v48 = vmul.f32 %v6309_v31, %v1875_v46 }
0x1e32   :  { %v1878_v47 = vpack.c.bf16 %v1877_v48, %v1877_v48 }
0x1e34   :  { %v1920_v55 = vshrl.u32 %v1878_v47, 16 }
0x1e36   :  { %v1922_v50 = vrot.slane %v1920_v55, 2 }
0x1e38   :  { %1923 = vrot.lane.b32.xlu0 %v1922_v50, %s6562_s5 }
0x1e9e   :  { %v1763_v52 = vpop.permute.xlu1 %1762 }
0x1e9f   :  { %5756 = vmatmul.mubr.msk.bf16.vlgmr.msra.gmra.mrb[56].mxu1 %vm59_vm1, %v1763_v52 }
0x1ea0   :  { %5768 = vmatpush3.bf16.msra.mxu1 %v6638_v33  ;;  %5771 = vmatprep.mubr.msk.bf16.mxu1 %vm6559_vm0, %v6558_v1 }
0x1ea1   :  { %5769 = vmatprep.subr.bf16.mxu1 %v6558_v1 }
0x1ea4   :  { %5770 = vmatpush3.bf16.msra.mxu1 %v6643_v40 }
0x1ea5   :  { %5783 = vmatprep.subr.bf16.mxu1 %v6558_v1 }
0x1ea7   :  { %5772 = vmatmul.mubr.msk.bf16.vlgmr.msra.gmra.mrb[60].mxu1 %vm59_vm1, %v7066_v49 }
0x1ea8   :  { %5784 = vmatpush3.bf16.msra.mxu1 %v6673_v11  ;;  %5787 = vmatprep.mubr.msk.bf16.mxu1 %vm6559_vm0, %v6558_v1 }
0x1ea9   :  { %5785 = vmatprep.subr.bf16.mxu1 %v6558_v1 }
0x1eaa   :  { %v7121_v51 = vpop.permute.xlu0 %1923 }
0x1eab   :  { %5780 = vmatmul.mubr.msk.bf16.vlgmr.msra.gmra.mrb[64].mxu0 %vm59_vm1, %v7121_v51 }
0x1eac   :  { %5786 = vmatpush3.bf16.msra.mxu1 %v6678_v19  ;;  %5792 = vmatpush3.bf16.msra.mxu0 %v6675_v16 }
0x1ead   :  { %5793 = vmatprep.subr.bf16.mxu0 %v6558_v1  ;;  %5795 = vmatprep.mubr.msk.bf16.mxu0 %vm6559_vm0, %v6558_v1 }
0x1eae   :  { %5799 = vmatprep.subr.bf16.mxu1 %v6558_v1 }
0x1eaf   :  { %5788 = vmatmul.mubr.msk.bf16.vlgmr.msra.gmra.mrb[64].mxu1 %vm59_vm1, %v1763_v52 }
0x1eb0   :  { %5794 = vmatpush3.bf16.msra.mxu0 %v6682_v20  ;;  %5800 = vmatpush3.bf16.msra.mxu1 %v6737_v15 }
0x1eb1   :  { %5807 = vmatprep.subr.bf16.mxu0 %v6558_v1  ;;  %5801 = vmatprep.subr.bf16.mxu1 %v6558_v1 }
0x1eb2   :  { %5803 = vmatprep.mubr.msk.bf16.mxu1 %vm6559_vm0, %v6558_v1 }
0x1eb4   :  { %5802 = vmatpush3.bf16.msra.mxu1 %v6743_v18 }
0x1eb5   :  { %5815 = vmatprep.subr.bf16.mxu1 %v6558_v1 }
0x1f72   :  { %v1801_v49 = vpop.f32.mrb[56].mxu1 }
0x1f73   :  { %v1802_v53 = vadd.f32 %v1801_v49, %v6873_v13  ;;  %v5757_v56 = vpop.f32.mrb[57].mxu1 }
0x1f74   :  { %v1804_v59 = vpop.f32.mrb[58].mxu1 }
0x1f75   :  { %v2885_v60 = vrot.slane %v1802_v53, 4  ;;  %v5758_v62 = vpop.f32.mrb[59].mxu1 }
0x1f77   :  { %v7143_v0 = vsel %vm2867_vm5, %v7053_v7, %v2885_v60 }
0x1f7a   :  { %v1913_v57 = vpop.f32.mrb[60].mxu1 }
0x1f7b   :  { %v5773_v58 = vpop.f32.mrb[61].mxu1 }
0x1f7c   :  { %v1916_v3 = vpop.f32.mrb[62].mxu1 }
0x1f7d   :  { %v5774_v63 = vpop.f32.mrb[63].mxu1 }
0x1f7e   :  { %v1962_v4 = vpop.f32.mrb[64].mxu0 }
0x1f7f   :  { %v1963_v10 = vadd.f32 %v1962_v4, %v1913_v57  ;;  %v5781_v61 = vpop.f32.mrb[65].mxu0 }
0x1f80   :  { %v1965_v23 = vpop.f32.mrb[66].mxu0 }
0x1f81   :  { %v1968_v8 = vadd.f32 %v7055_v21, %v1963_v10  ;;  %v5782_v5 = vpop.f32.mrb[67].mxu0 }
0x1f82   :  { %v2028_v13 = vpop.f32.mrb[64].mxu1 }
0x1f83   :  { %6314 = vtanh.f32 %v1968_v8  ;;  %v5789_v12 = vpop.f32.mrb[65].mxu1  ;;  %v5200_v7 = vmul.f32 -1.442695, %v1968_v8 }
0x1f84   :  { %v2031_v29 = vpop.f32.mrb[66].mxu1 }
0x1f85   :  { %v5790_v17 = vpop.f32.mrb[67].mxu1  ;;  %6316 = vpow2.f32 %v5200_v7 }
0x1f8d   :  { %v6315_v24 = vpop.eup %6314 }
0x1f8e   :  { %1978 = vrot.lane.b32.xlu1 %v6315_v24, %s6561_s0  ;;  %v2204_v24 = vrot.slane %v7097_v36, 7 }
0x1f8f   :  { %v6317_v31 = vpop.eup %6316 }
0x1f90   :  { %v1972_v25 = vadd.f32 1.0, %v6317_v31 }
0x1f92   :  { %6318 = vrcp.f32 %v1972_v25 }
0x1f9c   :  { %v6319_v27 = vpop.eup %6318 }
0x1f9d   :  { %v1976_v32 = vmul.f32 %v6319_v27, %v7061_v44 }
0x2000   :  { %v1979_v28 = vpop.permute.xlu1 %1978 }
0x2001   :  { %v1981_v2 = vmul.f32 %v6319_v27, %v1979_v28 }
0x2003   :  { %1983 = vrot.lane.b32.xlu0 %v1981_v2, %s6562_s5 }
0x2075   :  { %v1984_v34 = vpop.permute.xlu0 %1983 }
0x2076   :  { %v7149_v35 = vadd.f32 %v1984_v34, %v1976_v32 }
0x2078   :  { %6320 = vtanh.f32 %v7149_v35 }
0x2082   :  { %v6321_v38 = vpop.eup %6320 }
0x2083   :  { %1989 = vrot.lane.b32.xlu1 %v6321_v38, %s6561_s0 }
0x20f5   :  { %v1990_v39 = vpop.permute.xlu1 %1989 }
0x20f6   :  { %v1992_v43 = vmul.f32 %v6319_v27, %v1990_v39 }
0x20f8   :  { %v1993_v42 = vpack.c.bf16 %v1992_v43, %v1992_v43 }
0x20fa   :  { %2035 = vrot.lane.b32.xlu0 %v1993_v42, %s6562_s5 }
0x216c   :  { %v7154_v30 = vpop.permute.xlu0 %2035 }
0x216d   :  { %5796 = vmatmul.mubr.msk.bf16.vlgmr.msra.gmra.mrb[68].mxu0 %vm59_vm1, %v7154_v30 }
0x216e   :  { %5808 = vmatpush3.bf16.msra.mxu0 %v6616_v6  ;;  %5811 = vmatprep.mubr.msk.bf16.mxu0 %vm6559_vm0, %v6558_v1 }
0x216f   :  { %5809 = vmatprep.subr.bf16.mxu0 %v6558_v1 }
0x2172   :  { %5810 = vmatpush3.bf16.msra.mxu0 %v6622_v9 }
0x2173   :  { %5823 = vmatprep.subr.bf16.mxu0 %v6558_v1 }
0x2175   :  { %5812 = vmatmul.mubr.msk.bf16.vlgmr.msra.gmra.mrb[72].mxu0 %vm59_vm1, %v7121_v51 }
0x2176   :  { %5824 = vmatpush3.bf16.msra.mxu0 %v6640_v37  ;;  %5827 = vmatprep.mubr.msk.bf16.mxu0 %vm6559_vm0, %v6558_v1 }
0x2177   :  { %5825 = vmatprep.subr.bf16.mxu0 %v6558_v1 }
0x217a   :  { %5826 = vmatpush3.bf16.msra.mxu0 %v6647_v41 }
0x217b   :  { %5839 = vmatprep.subr.bf16.mxu0 %v6558_v1 }
0x2240   :  { %v2074_v44 = vpop.f32.mrb[68].mxu0 }
0x2241   :  { %v2075_v26 = vadd.f32 %v2074_v44, %v2028_v13  ;;  %v5797_v46 = vpop.f32.mrb[69].mxu0 }
0x2242   :  { %v2077_v48 = vpop.f32.mrb[70].mxu0 }
0x2243   :  { %v2080_v47 = vadd.f32 %v7084_v54, %v2075_v26  ;;  %v5798_v55 = vpop.f32.mrb[71].mxu0  ;;  %v7229_v26 = vld [vmem:[%s7910_s3 + $0x40] sm:$0x1] }
0x2245   :  { %6322 = vtanh.f32 %v2080_v47  ;;  %v5203_v62 = vmul.f32 -1.442695, %v2080_v47 }
0x2248   :  { %v2186_v50 = vpop.f32.mrb[72].mxu0 }
0x2249   :  { %v2193_v52 = vrot.slane %v2186_v50, 2  ;;  %v5813_v51 = vpop.f32.mrb[73].mxu0 }
0x224a   :  { %v2189_v49 = vpop.f32.mrb[74].mxu0 }
0x224b   :  { %v2195_v53 = vadd.f32 %v2193_v52, %v6630_v14  ;;  %v5814_v56 = vpop.f32.mrb[75].mxu0 }
0x224d   :  { %6324 = vtanh.f32 %v2195_v53  ;;  %v5206_v57 = vmul.f32 -1.442695, %v2195_v53 }
0x224e   :  { %6326 = vpow2.f32 %v5203_v62 }
0x224f   :  { %v6323_v59 = vpop.eup %6322  ;;  %6328 = vpow2.f32 %v5206_v57 }
0x2250   :  { %2090 = vrot.lane.b32.xlu1 %v6323_v59, %s6561_s0 }
0x2257   :  { %v6325_v60 = vpop.eup %6324 }
0x2258   :  { %2208 = vrot.lane.b32.xlu0 %v6325_v60, %s6561_s0  ;;  %v6327_v58 = vpop.eup %6326 }
0x2259   :  { %v2084_v3 = vadd.f32 1.0, %v6327_v58  ;;  %v6329_v63 = vpop.eup %6328 }
0x225a   :  { %v2199_v4 = vadd.f32 1.0, %v6329_v63 }
0x225b   :  { %6330 = vrcp.f32 %v2084_v3 }
0x225c   :  { %6332 = vrcp.f32 %v2199_v4 }
0x2265   :  { %v6331_v10 = vpop.eup %6330 }
0x2266   :  { %v6333_v8 = vpop.eup %6332  ;;  %v2088_v12 = vmul.f32 %v6331_v10, %v7093_v22 }
0x2267   :  { %v2206_v7 = vmul.f32 %v6333_v8, %v2204_v24 }
0x22c2   :  { %v2091_v61 = vpop.permute.xlu1 %2090 }
0x22c3   :  { %v2093_v23 = vmul.f32 %v6331_v10, %v2091_v61 }
0x22c5   :  { %2095 = vrot.lane.b32.xlu1 %v2093_v23, %s6562_s5 }
0x22ca   :  { %v2209_v5 = vpop.permute.xlu0 %2208 }
0x22cb   :  { %v2211_v13 = vmul.f32 %v6333_v8, %v2209_v5 }
0x22cd   :  { %2213 = vrot.lane.b32.xlu0 %v2211_v13, %s6562_s5 }
0x2337   :  { %v2096_v29 = vpop.permute.xlu1 %2095 }
0x2338   :  { %v7179_v17 = vadd.f32 %v2096_v29, %v2088_v12 }
0x233a   :  { %6334 = vtanh.f32 %v7179_v17 }
0x233f   :  { %v2214_v31 = vpop.permute.xlu0 %2213 }
0x2340   :  { %v7183_v25 = vadd.f32 %v2214_v31, %v2206_v7 }
0x2342   :  { %6336 = vtanh.f32 %v7183_v25 }
0x2344   :  { %v6335_v27 = vpop.eup %6334 }
0x2345   :  { %2101 = vrot.lane.b32.xlu1 %v6335_v27, %s6561_s0 }
0x234c   :  { %v6337_v28 = vpop.eup %6336 }
0x234d   :  { %2219 = vrot.lane.b32.xlu0 %v6337_v28, %s6561_s0 }
0x23b7   :  { %v2102_v22 = vpop.permute.xlu1 %2101 }
0x23b8   :  { %v2104_v2 = vmul.f32 %v6331_v10, %v2102_v22 }
0x23ba   :  { %v2105_v32 = vpack.c.bf16 %v2104_v2, %v2104_v2  ;;  %v2853_v34 = vrot.slane %v2104_v2, 3 }
0x23bc   :  { %2107 = vrot.lane.b32.xlu1 %v2105_v32, %s6562_s5  ;;  %v7191_v36 = vsel %vm2869_vm6, %v7105_v45, %v2853_v34 }
0x23bf   :  { %v2220_v38 = vpop.permute.xlu0 %2219 }
0x23c0   :  { %v2222_v39 = vmul.f32 %v6333_v8, %v2220_v38 }
0x23c2   :  { %v2223_v43 = vpack.c.bf16 %v2222_v39, %v2222_v39 }
0x23c4   :  { %v2265_v42 = vrot.slane %v2223_v43, 3 }
0x23c6   :  { %2266 = vrot.lane.b32.xlu0 %v2265_v42, %s6562_s5 }
0x242e   :  { %v2108_v44 = vpop.permute.xlu1 %2107 }
0x242f   :  { %5804 = vmatmul.mubr.msk.bf16.vlgmr.msra.gmra.mrb[68].mxu1 %vm59_vm1, %v2108_v44 }
0x2430   :  { %5816 = vmatpush3.bf16.msra.mxu1 %v6638_v33  ;;  %5819 = vmatprep.mubr.msk.bf16.mxu1 %vm6559_vm0, %v6558_v1 }
0x2431   :  { %5817 = vmatprep.subr.bf16.mxu1 %v6558_v1 }
0x2434   :  { %5818 = vmatpush3.bf16.msra.mxu1 %v6643_v40 }
0x2435   :  { %5831 = vmatprep.subr.bf16.mxu1 %v6558_v1 }
0x2437   :  { %5820 = vmatmul.mubr.msk.bf16.vlgmr.msra.gmra.mrb[72].mxu1 %vm59_vm1, %v7154_v30 }
0x2438   :  { %5832 = vmatpush3.bf16.msra.mxu1 %v6673_v11  ;;  %v7204_v45 = vpop.permute.xlu0 %2266  ;;  %5835 = vmatprep.mubr.msk.bf16.mxu1 %vm6559_vm0, %v6558_v1 }
0x2439   :  { %5828 = vmatmul.mubr.msk.bf16.vlgmr.msra.gmra.mrb[76].mxu0 %vm59_vm1, %v7204_v45  ;;  %5833 = vmatprep.subr.bf16.mxu1 %v6558_v1 }
0x243a   :  { %5840 = vmatpush3.bf16.msra.mxu0 %v6675_v16  ;;  %5843 = vmatprep.mubr.msk.bf16.mxu0 %vm6559_vm0, %v6558_v1 }
0x243b   :  { %5841 = vmatprep.subr.bf16.mxu0 %v6558_v1 }
0x243c   :  { %5834 = vmatpush3.bf16.msra.mxu1 %v6678_v19 }
0x243d   :  { %5847 = vmatprep.subr.bf16.mxu1 %v6558_v1 }
0x243e   :  { %5842 = vmatpush3.bf16.msra.mxu0 %v6682_v20 }
0x243f   :  { %5836 = vmatmul.mubr.msk.bf16.vlgmr.msra.gmra.mrb[76].mxu1 %vm59_vm1, %v2108_v44  ;;  %5855 = vmatprep.subr.bf16.mxu0 %v6558_v1 }
0x2440   :  { %5848 = vmatpush3.bf16.msra.mxu1 %v6737_v15  ;;  %5851 = vmatprep.mubr.msk.bf16.mxu1 %vm6559_vm0, %v6558_v1 }
0x2441   :  { %5849 = vmatprep.subr.bf16.mxu1 %v6558_v1 }
0x2444   :  { %5850 = vmatpush3.bf16.msra.mxu1 %v6743_v18 }
0x2445   :  { %5863 = vmatprep.subr.bf16.mxu1 %v6558_v1 }
0x2502   :  { %v2146_v30 = vpop.f32.mrb[68].mxu1 }
0x2503   :  { %v2147_v46 = vadd.f32 %v7229_v26, %v2146_v30  ;;  %v5805_v48 = vpop.f32.mrb[69].mxu1 }
0x2504   :  { %v2149_v47 = vpop.f32.mrb[70].mxu1 }
0x2505   :  { %v2888_v55 = vrot.slane %v2147_v46, 3  ;;  %v5806_v50 = vpop.f32.mrb[71].mxu1 }
0x2507   :  { %v7234_v52 = vsel %vm2869_vm6, %v7143_v0, %v2888_v55 }
0x250a   :  { %v2258_v51 = vpop.f32.mrb[72].mxu1 }
0x250b   :  { %v5821_v49 = vpop.f32.mrb[73].mxu1 }
0x250c   :  { %v2261_v53 = vpop.f32.mrb[74].mxu1  ;;  %v2305_v56 = vpop.f32.mrb[76].mxu0 }
0x250d   :  { %v2306_v59 = vadd.f32 %v2305_v56, %v2258_v51  ;;  %v5822_v60 = vpop.f32.mrb[75].mxu1  ;;  %v5829_v62 = vpop.f32.mrb[77].mxu0 }
0x250e   :  { %v2308_v57 = vpop.f32.mrb[78].mxu0 }
0x250f   :  { %v2311_v58 = vadd.f32 %v7055_v21, %v2306_v59  ;;  %v5830_v3 = vpop.f32.mrb[79].mxu0 }
0x2511   :  { %6338 = vtanh.f32 %v2311_v58  ;;  %v5209_v0 = vmul.f32 -1.442695, %v2311_v58 }
0x2512   :  { %v2371_v63 = vpop.f32.mrb[76].mxu1 }
0x2513   :  { %v5837_v4 = vpop.f32.mrb[77].mxu1  ;;  %6340 = vpow2.f32 %v5209_v0 }
0x2514   :  { %v2374_v10 = vpop.f32.mrb[78].mxu1 }
0x2515   :  { %v5838_v61 = vpop.f32.mrb[79].mxu1 }
0x251b   :  { %v6339_v23 = vpop.eup %6338 }
0x251c   :  { %2321 = vrot.lane.b32.xlu1 %v6339_v23, %s6561_s0 }
0x251d   :  { %v6341_v8 = vpop.eup %6340 }
0x251e   :  { %v2315_v5 = vadd.f32 1.0, %v6341_v8 }
0x2520   :  { %6342 = vrcp.f32 %v2315_v5 }
0x252a   :  { %v6343_v13 = vpop.eup %6342 }
0x252b   :  { %v2319_v24 = vmul.f32 %v6343_v13, %v7149_v35 }
0x258e   :  { %v2322_v12 = vpop.permute.xlu1 %2321 }
0x258f   :  { %v2324_v29 = vmul.f32 %v6343_v13, %v2322_v12 }
0x2591   :  { %2326 = vrot.lane.b32.xlu0 %v2324_v29, %s6562_s5 }
0x2603   :  { %v2327_v7 = vpop.permute.xlu0 %2326 }
0x2604   :  { %v7240_v31 = vadd.f32 %v2327_v7, %v2319_v24 }
0x2606   :  { %6344 = vtanh.f32 %v7240_v31 }
0x2610   :  { %v6345_v27 = vpop.eup %6344 }
0x2611   :  { %2332 = vrot.lane.b32.xlu1 %v6345_v27, %s6561_s0 }
0x2683   :  { %v2333_v28 = vpop.permute.xlu1 %2332 }
0x2684   :  { %v2335_v22 = vmul.f32 %v6343_v13, %v2333_v28 }
0x2686   :  { %v2336_v2 = vpack.c.bf16 %v2335_v22, %v2335_v22 }
0x2688   :  { %2378 = vrot.lane.b32.xlu0 %v2336_v2, %s6562_s5 }
0x26fa   :  { %v7245_v32 = vpop.permute.xlu0 %2378 }
0x26fb   :  { %5844 = vmatmul.mubr.msk.bf16.vlgmr.msra.gmra.mrb[80].mxu0 %vm59_vm1, %v7245_v32 }
0x26fc   :  { %5856 = vmatpush3.bf16.msra.mxu0 %v6616_v6  ;;  %5859 = vmatprep.mubr.msk.bf16.mxu0 %vm6559_vm0, %v6558_v1 }
0x26fd   :  { %5857 = vmatprep.subr.bf16.mxu0 %v6558_v1 }
0x2700   :  { %5858 = vmatpush3.bf16.msra.mxu0 %v6622_v9 }
0x2701   :  { %5871 = vmatprep.subr.bf16.mxu0 %v6558_v1 }
0x2703   :  { %5860 = vmatmul.mubr.msk.bf16.vlgmr.msra.gmra.mrb[84].mxu0 %vm59_vm1, %v7204_v45 }
0x2704   :  { %5872 = vmatpush3.bf16.msra.mxu0 %v6640_v37  ;;  %5875 = vmatprep.mubr.msk.bf16.mxu0 %vm6559_vm0, %v6558_v1 }
0x2705   :  { %5873 = vmatprep.subr.bf16.mxu0 %v6558_v1 }
0x2708   :  { %5874 = vmatpush3.bf16.msra.mxu0 %v6647_v41 }
0x2709   :  { %5887 = vmatprep.subr.bf16.mxu0 %v6558_v1 }
0x27ce   :  { %v2417_v6 = vpop.f32.mrb[80].mxu0 }
0x27cf   :  { %v2418_v35 = vadd.f32 %v2417_v6, %v2371_v63  ;;  %v5845_v34 = vpop.f32.mrb[81].mxu0  ;;  %v2547_v63 = vrot.slane %v7183_v25, 7 }
0x27d0   :  { %v2420_v9 = vpop.f32.mrb[82].mxu0 }
0x27d1   :  { %v2423_v38 = vadd.f32 %v7084_v54, %v2418_v35  ;;  %v5846_v39 = vpop.f32.mrb[83].mxu0 }
0x27d3   :  { %6346 = vtanh.f32 %v2423_v38  ;;  %v5212_v48 = vmul.f32 -1.442695, %v2423_v38 }
0x27d6   :  { %v2529_v43 = vpop.f32.mrb[84].mxu0 }
0x27d7   :  { %v2536_v42 = vrot.slane %v2529_v43, 1  ;;  %v5861_v37 = vpop.f32.mrb[85].mxu0 }
0x27d8   :  { %v2532_v44 = vpop.f32.mrb[86].mxu0 }
0x27d9   :  { %v2538_v45 = vadd.f32 %v2536_v42, %v6630_v14  ;;  %v5862_v30 = vpop.f32.mrb[87].mxu0 }
0x27db   :  { %6348 = vtanh.f32 %v2538_v45  ;;  %v5215_v47 = vmul.f32 -1.442695, %v2538_v45 }
0x27dc   :  { %6350 = vpow2.f32 %v5212_v48 }
0x27dd   :  { %v6347_v46 = vpop.eup %6346  ;;  %6352 = vpow2.f32 %v5215_v47 }
0x27de   :  { %2433 = vrot.lane.b32.xlu1 %v6347_v46, %s6561_s0 }
0x27e5   :  { %v6349_v41 = vpop.eup %6348 }
0x27e6   :  { %2551 = vrot.lane.b32.xlu0 %v6349_v41, %s6561_s0  ;;  %v6351_v55 = vpop.eup %6350 }
0x27e7   :  { %v2427_v50 = vadd.f32 1.0, %v6351_v55  ;;  %v6353_v51 = vpop.eup %6352 }
0x27e8   :  { %v2542_v49 = vadd.f32 1.0, %v6353_v51 }
0x27e9   :  { %6354 = vrcp.f32 %v2427_v50 }
0x27ea   :  { %6356 = vrcp.f32 %v2542_v49 }
0x27f3   :  { %v6355_v53 = vpop.eup %6354 }
0x27f4   :  { %v6357_v59 = vpop.eup %6356  ;;  %v2431_v57 = vmul.f32 %v6355_v53, %v7179_v17 }
0x27f5   :  { %v2549_v4 = vmul.f32 %v6357_v59, %v2547_v63 }
0x2850   :  { %v2434_v14 = vpop.permute.xlu1 %2433 }
0x2851   :  { %v2436_v56 = vmul.f32 %v6355_v53, %v2434_v14 }
0x2853   :  { %2438 = vrot.lane.b32.xlu1 %v2436_v56, %s6562_s5 }
0x2858   :  { %v2552_v60 = vpop.permute.xlu0 %2551 }
0x2859   :  { %v2554_v62 = vmul.f32 %v6357_v59, %v2552_v60 }
0x285b   :  { %2556 = vrot.lane.b32.xlu0 %v2554_v62, %s6562_s5 }
0x28c5   :  { %v2439_v58 = vpop.permute.xlu1 %2438 }
0x28c6   :  { %v7270_v3 = vadd.f32 %v2439_v58, %v2431_v57 }
0x28c8   :  { %6358 = vtanh.f32 %v7270_v3 }
0x28cd   :  { %v2557_v10 = vpop.permute.xlu0 %2556 }
0x28ce   :  { %v7274_v61 = vadd.f32 %v2557_v10, %v2549_v4 }
0x28d0   :  { %6360 = vtanh.f32 %v7274_v61 }
0x28d2   :  { %v6359_v23 = vpop.eup %6358 }
0x28d3   :  { %2444 = vrot.lane.b32.xlu1 %v6359_v23, %s6561_s0 }
0x28da   :  { %v6361_v0 = vpop.eup %6360 }
0x28db   :  { %2562 = vrot.lane.b32.xlu0 %v6361_v0, %s6561_s0 }
0x2945   :  { %v2445_v17 = vpop.permute.xlu1 %2444 }
0x2946   :  { %v2447_v8 = vmul.f32 %v6355_v53, %v2445_v17 }
0x2948   :  { %v2448_v5 = vpack.c.bf16 %v2447_v8, %v2447_v8  ;;  %v2856_v13 = vrot.slane %v2447_v8, 2 }
0x294a   :  { %v7281_v25 = vsel %vm2871_vm7, %v7191_v36, %v2856_v13  ;;  %2450 = vrot.lane.b32.xlu1 %v2448_v5, %s6562_s5 }
0x294d   :  { %v2563_v12 = vpop.permute.xlu0 %2562 }
0x294e   :  { %v2565_v29 = vmul.f32 %v6357_v59, %v2563_v12 }
0x2950   :  { %v2566_v24 = vpack.c.bf16 %v2565_v29, %v2565_v29  ;;  %v2907_v29 = vld [vmem:[%s7910_s3 + $0x8] sm:$0xff] }
0x2952   :  { %v2608_v7 = vshrl.u32 %v2566_v24, 16  ;;  %v2908_v24 = vld [vmem:[%s7910_s3 + $0x10] sm:$0xff] }
0x2954   :  { %v2610_v27 = vrot.slane %v2608_v7, 3 }
0x2956   :  { %2611 = vrot.lane.b32.xlu0 %v2610_v27, %s6562_s5 }
0x29bc   :  { %v2451_v28 = vpop.permute.xlu1 %2450 }
0x29bd   :  { %5852 = vmatmul.mubr.msk.bf16.vlgmr.msra.gmra.mrb[80].mxu1 %vm59_vm1, %v2451_v28 }
0x29be   :  { %5864 = vmatpush3.bf16.msra.mxu1 %v6638_v33  ;;  %5867 = vmatprep.mubr.msk.bf16.mxu1 %vm6559_vm0, %v6558_v1 }
0x29bf   :  { %5865 = vmatprep.subr.bf16.mxu1 %v6558_v1 }
0x29c2   :  { %5866 = vmatpush3.bf16.msra.mxu1 %v6643_v40 }
0x29c3   :  { %5879 = vmatprep.subr.bf16.mxu1 %v6558_v1 }
0x29c5   :  { %5868 = vmatmul.mubr.msk.bf16.vlgmr.msra.gmra.mrb[84].mxu1 %vm59_vm1, %v7245_v32 }
0x29c6   :  { %5880 = vmatpush3.bf16.msra.mxu1 %v6673_v11  ;;  %5883 = vmatprep.mubr.msk.bf16.mxu1 %vm6559_vm0, %v6558_v1 }
0x29c7   :  { %5881 = vmatprep.subr.bf16.mxu1 %v6558_v1 }
0x29c8   :  { %v7298_v33 = vpop.permute.xlu0 %2611 }
0x29c9   :  { %5876 = vmatmul.mubr.msk.bf16.vlgmr.msra.gmra.mrb[88].mxu0 %vm59_vm1, %v7298_v33 }
0x29ca   :  { %5882 = vmatpush3.bf16.msra.mxu1 %v6678_v19  ;;  %5888 = vmatpush3.bf16.msra.mxu0 %v6675_v16 }
0x29cb   :  { %5889 = vmatprep.subr.bf16.mxu0 %v6558_v1  ;;  %5891 = vmatprep.mubr.msk.bf16.mxu0 %vm6559_vm0, %v6558_v1 }
0x29cc   :  { %5895 = vmatprep.subr.bf16.mxu1 %v6558_v1 }
0x29cd   :  { %5884 = vmatmul.mubr.msk.bf16.vlgmr.msra.gmra.mrb[88].mxu1 %vm59_vm1, %v2451_v28 }
0x29ce   :  { %5890 = vmatpush3.bf16.msra.mxu0 %v6682_v20  ;;  %5896 = vmatpush3.bf16.msra.mxu1 %v6737_v15 }
0x29cf   :  { %5903 = vmatprep.subr.bf16.mxu0 %v6558_v1  ;;  %5897 = vmatprep.subr.bf16.mxu1 %v6558_v1 }
0x29d0   :  { %5899 = vmatprep.mubr.msk.bf16.mxu1 %vm6559_vm0, %v6558_v1 }
0x29d2   :  { %5898 = vmatpush3.bf16.msra.mxu1 %v6743_v18 }
0x29d3   :  { %5911 = vmatprep.subr.mxu1 %v6558_v1 }
0x2a90   :  { %v2489_v40 = vpop.f32.mrb[80].mxu1 }
0x2a91   :  { %v2490_v11 = vadd.f32 %v7229_v26, %v2489_v40  ;;  %v5853_v16 = vpop.f32.mrb[81].mxu1 }
0x2a92   :  { %v2492_v19 = vpop.f32.mrb[82].mxu1 }
0x2a93   :  { %v2891_v36 = vrot.slane %v2490_v11, 2  ;;  %v5854_v20 = vpop.f32.mrb[83].mxu1 }
0x2a95   :  { %v7320_v15 = vsel %vm2871_vm7, %v7234_v52, %v2891_v36 }
0x2a98   :  { %v2601_v22 = vpop.f32.mrb[84].mxu1 }
0x2a99   :  { %v5869_v2 = vpop.f32.mrb[85].mxu1 }
0x2a9a   :  { %v2604_v32 = vpop.f32.mrb[86].mxu1 }
0x2a9b   :  { %v5870_v6 = vpop.f32.mrb[87].mxu1 }
0x2a9c   :  { %v2650_v35 = vpop.f32.mrb[88].mxu0 }
0x2a9d   :  { %v2651_v34 = vadd.f32 %v2650_v35, %v2601_v22  ;;  %v5877_v18 = vpop.f32.mrb[89].mxu0  ;;  %v2952_v22 = vlaneseq }
0x2a9e   :  { %v2653_v9 = vpop.f32.mrb[90].mxu0 }
0x2a9f   :  { %v2656_v38 = vadd.f32 %v7055_v21, %v2651_v34  ;;  %v5878_v39 = vpop.f32.mrb[91].mxu0  ;;  %v2953_v2 = vshrl.u32 %v2952_v22, 7 }
0x2aa0   :  { %v2716_v43 = vpop.f32.mrb[88].mxu1 }
0x2aa1   :  { %6362 = vtanh.f32 %v2656_v38  ;;  %v5885_v42 = vpop.f32.mrb[89].mxu1  ;;  %v5218_v52 = vmul.f32 -1.442695, %v2656_v38  ;;  %v7378_v6 = vsub.s32 0, %v2953_v2  ;;  %v3368_v2 = vld [vmem:[#allocation3 + $0x178] sm:$0xff] }
0x2aa2   :  { %v2719_v37 = vpop.f32.mrb[90].mxu1 }
0x2aa3   :  { %v5886_v44 = vpop.f32.mrb[91].mxu1  ;;  %6364 = vpow2.f32 %v5218_v52 }
0x2aab   :  { %v6363_v45 = vpop.eup %6362 }
0x2aac   :  { %2666 = vrot.lane.b32.xlu1 %v6363_v45, %s6561_s0 }
0x2aad   :  { %v6365_v30 = vpop.eup %6364 }
0x2aae   :  { %v2660_v46 = vadd.f32 1.0, %v6365_v30 }
0x2ab0   :  { %6366 = vrcp.f32 %v2660_v46 }
0x2aba   :  { %v6367_v41 = vpop.eup %6366 }
0x2abb   :  { %v2664_v21 = vmul.f32 %v6367_v41, %v7240_v31 }
0x2b1e   :  { %v2667_v48 = vpop.permute.xlu1 %2666 }
0x2b1f   :  { %v2669_v47 = vmul.f32 %v6367_v41, %v2667_v48 }
0x2b21   :  { %2671 = vrot.lane.b32.xlu0 %v2669_v47, %s6562_s5 }
0x2b93   :  { %v2672_v55 = vpop.permute.xlu0 %2671 }
0x2b94   :  { %v7326_v50 = vadd.f32 %v2672_v55, %v2664_v21 }
0x2b96   :  { %6368 = vtanh.f32 %v7326_v50 }
0x2ba0   :  { %v6369_v51 = vpop.eup %6368 }
0x2ba1   :  { %2677 = vrot.lane.b32.xlu1 %v6369_v51, %s6561_s0 }
0x2c13   :  { %v2678_v49 = vpop.permute.xlu1 %2677 }
0x2c14   :  { %v2680_v53 = vmul.f32 %v6367_v41, %v2678_v49  ;;  %v3109_v49 = vld [vmem:[#allocation3 + $0xd0] sm:$0xff] }
0x2c16   :  { %v2681_v14 = vpack.c.bf16 %v2680_v53, %v2680_v53  ;;  %v3110_v53 = vld [vmem:[#allocation3 + $0xd8] sm:$0xff] }
0x2c18   :  { %2723 = vrot.lane.b32.xlu0 %v2681_v14, %s6562_s5  ;;  %v7401_v14 = vpack.c.bf16 %v3110_v53, %v3109_v49 }
0x2c8a   :  { %v7331_v56 = vpop.permute.xlu0 %2723 }
0x2c8b   :  { %5892 = vmatmul.mubr.msk.bf16.vlgmr.msra.gmra.mrb[92].mxu0 %vm59_vm1, %v7331_v56 }
0x2c8c   :  { %5907 = vmatprep.mubr.msk.bf16.mxu0 %vm6559_vm0, %v6558_v1 }
0x2d5e   :  { %v2762_v31 = vpop.f32.mrb[92].mxu0 }
0x2d5f   :  { %v2763_v59 = vadd.f32 %v2762_v31, %v2716_v43  ;;  %v5893_v60 = vpop.f32.mrb[93].mxu0 }
0x2d60   :  { %v2765_v62 = vpop.f32.mrb[94].mxu0 }
0x2d61   :  { %v2768_v57 = vadd.f32 %v7084_v54, %v2763_v59  ;;  %v5894_v58 = vpop.f32.mrb[95].mxu0  ;;  %v2906_v54 = vld [vmem:[%s7910_s3] sm:$0xff]  ;;  %v3160_v62 = vld [vmem:[#allocation3 + $0xf0] sm:$0xff] }
0x2d62   :  { %v7353_v7 = vpack.c.bf16 %v2907_v29, %v2906_v54  ;;  %v2905_v54 = vld [vmem:[#allocation2] sm:$0x1]  ;;  %v3243_v29 = vld [vmem:[#allocation3 + $0x130] sm:$0xff] }
0x2d63   :  { %6370 = vtanh.f32 %v2768_v57  ;;  %v5221_v4 = vmul.f32 -1.442695, %v2768_v57  ;;  %v3161_v57 = vld [vmem:[#allocation3 + $0xf8] sm:$0xff] }
0x2d64   :  { %5904 = vmatpush3.bf16.msra.mxu0 %v7353_v7 }
0x2d65   :  { %6372 = vpow2.f32 %v5221_v4  ;;  %5905 = vmatprep.subr.bf16.mxu0 %v6558_v1  ;;  %v7410_v4 = vpack.c.bf16 %v3161_v57, %v3160_v62 }
0x2d6d   :  { %v6371_v63 = vpop.eup %6370 }
0x2d6e   :  { %2778 = vrot.lane.b32.xlu1 %v6371_v63, %s6561_s0 }
0x2d6f   :  { %v6373_v10 = vpop.eup %6372 }
0x2d70   :  { %v2772_v23 = vadd.f32 1.0, %v6373_v10 }
0x2d72   :  { %6374 = vrcp.f32 %v2772_v23  ;;  %v3162_v23 = vld [vmem:[#allocation3 + $0x100] sm:$0xff] }
0x2d7c   :  { %v6375_v0 = vpop.eup %6374 }
0x2d7d   :  { %v2776_v5 = vmul.f32 %v6375_v0, %v7270_v3  ;;  %v2909_v3 = vld [vmem:[%s7910_s3 + $0x18] sm:$0xff] }
0x2d7e   :  { %v7359_v27 = vpack.c.bf16 %v2909_v3, %v2908_v24  ;;  %v3244_v24 = vld [vmem:[#allocation3 + $0x138] sm:$0xff] }
0x2d80   :  { %5906 = vmatpush3.bf16.msra.mxu0 %v7359_v27 }
0x2d81   :  { %5922 = vmatprep.subr.bf16.mxu0 %v6558_v1 }
0x2de0   :  { %v2779_v17 = vpop.permute.xlu1 %2778 }
0x2de1   :  { %v2781_v8 = vmul.f32 %v6375_v0, %v2779_v17 }
0x2de3   :  { %2783 = vrot.lane.b32.xlu0 %v2781_v8, %s6562_s5  ;;  %v3111_v8 = vld [vmem:[#allocation3 + $0xe0] sm:$0xff] }
0x2e55   :  { %v2784_v13 = vpop.permute.xlu0 %2783 }
0x2e56   :  { %v7341_v12 = vadd.f32 %v2784_v13, %v2776_v5  ;;  %v3112_v5 = vld [vmem:[#allocation3 + $0xe8] sm:$0xff] }
0x2e57   :  { %v7425_v13 = vpack.c.bf16 %v3112_v5, %v3111_v8  ;;  %v3217_v5 = vrot.slane %v7274_v61, 7 }
0x2e58   :  { %6376 = vtanh.f32 %v7341_v12 }
0x2e62   :  { %v6377_v28 = vpop.eup %6376 }
0x2e63   :  { %2789 = vrot.lane.b32.xlu1 %v6377_v28, %s6561_s0  ;;  %v7431_v28 = vpack.c.bf16 %v3244_v24, %v3243_v29 }
0x2ed5   :  { %v2790_v40 = vpop.permute.xlu1 %2789 }
0x2ed6   :  { %v2792_v11 = vmul.f32 %v6375_v0, %v2790_v40  ;;  %v3163_v0 = vld [vmem:[#allocation3 + $0x108] sm:$0xff] }
0x2ed7   :  { %v7414_v17 = vpack.c.bf16 %v3163_v0, %v3162_v23 }
0x2ed8   :  { %v2793_v16 = vpack.c.bf16 %v2792_v11, %v2792_v11  ;;  %v2859_v19 = vrot.slane %v2792_v11, 1  ;;  %v3245_v11 = vld [vmem:[#allocation3 + $0x140] sm:$0xff] }
0x2eda   :  { %v2874_v36 = vsel %vm2873_vm8, %v7281_v25, %v2859_v19  ;;  %2795 = vrot.lane.b32.xlu0 %v2793_v16, %s6562_s5  ;;  %v3246_v16 = vld [vmem:[#allocation3 + $0x148] sm:$0xff] }
0x2edb   :  { %v2903_v51 = vpack.c.bf16 %v2874_v36, %v2874_v36  ;;  %v7437_v22 = vpack.c.bf16 %v3246_v16, %v3245_v11  ;;  %v3238_v11 = vld [vmem:[#allocation3 + $0x120] sm:$0xff] }
0x2f4c   :  { %v7368_v20 = vpop.permute.xlu0 %2795 }
0x2f4d   :  { %5900 = vmatmul.mubr.msk.bf16.vlgmr.msra.gmra.mrb[92].mxu1 %vm59_vm1, %v7368_v20  ;;  %5908 = vmatmul.mubr.msk.bf16.vlgmr.msra.gmra.mrb[96].mxu0 %vm59_vm1, %v7368_v20 }
0x2f4e   :  { %5913 = vmatprep.mubr.msk.f32.mxu1 %vm6559_vm0, %v6558_v1  ;;  %5926 = vmatprep.mubr.msk.bf16.mxu0 %vm6559_vm0, %v6558_v1 }
0x2f4f   :  { %5923 = vmatpush3.bf16.msra.mxu0 %v7401_v14 }
0x2f50   :  { %5924 = vmatprep.subr.bf16.mxu0 %v6558_v1 }
0x2f53   :  { %5925 = vmatpush3.bf16.msra.mxu0 %v7425_v13 }
0x2f54   :  { %5938 = vmatprep.subr.bf16.mxu0 %v6558_v1 }
0x3020   :  { %v2834_v32 = vpop.f32.mrb[92].mxu1  ;;  %v2946_v25 = vpop.f32.mrb[96].mxu0 }
0x3021   :  { %v2835_v35 = vadd.f32 %v7229_v26, %v2834_v32  ;;  %v5901_v34 = vpop.f32.mrb[93].mxu1  ;;  %v5909_v18 = vpop.f32.mrb[97].mxu0  ;;  %v2955_v37 = vrot.slane %v2946_v25, %v7378_v6  ;;  %v7391_v26 = vld [vmem:[%s7910_s3 + $0x48] sm:$0x1] }
0x3022   :  { %v2837_v9 = vpop.f32.mrb[94].mxu1  ;;  %v2949_v38 = vpop.f32.mrb[98].mxu0  ;;  %v3369_v32 = vld [vmem:[#allocation3 + $0x180] sm:$0xff]  ;;  %v3370_v18 = vld [vmem:[#allocation3 + $0x188] sm:$0xff] }
0x3023   :  { %v2894_v39 = vrot.slane %v2835_v35, 1  ;;  %v5902_v43 = vpop.f32.mrb[95].mxu1  ;;  %v5910_v42 = vpop.f32.mrb[99].mxu0  ;;  %v7443_v35 = vpack.c.bf16 %v3369_v32, %v3368_v2  ;;  %v3371_v9 = vld [vmem:[#allocation3 + $0x190] sm:$0xff] }
0x3024   :  { %v7449_v43 = vpack.c.bf16 %v3371_v9, %v3370_v18  ;;  %v7495_v9 = vld [vmem:[#allocation3 + $0x150] sm:$0x1] }
0x3025   :  { %v7384_v44 = vsel %vm2873_vm8, %v7320_v15, %v2894_v39 }
0x3026   :  { %v2956_v45 = vadd.f32 %v2955_v37, %v7384_v44  ;;  %v7465_v37 = vld [vmem:[#allocation3 + $0xc0] sm:$0x1] }
0x3028   :  { %6378 = vtanh.f32 %v2956_v45 }
0x3032   :  { %v6379_v52 = vpop.eup %6378 }
0x3033   :  { %5912 = vmatpush3.xpose.msk.msra.mxu1 %vm59_vm1, %v6379_v52 }
0x3034   :  { %5916 = vmatprep.subr.bf16.mxu1 %v6558_v1 }
0x3036   :  { %5914 = vmatmul.mubr.msk.f32.vlgmr.msra.gmra.mrb[96].mxu1 %vm59_vm1, %v7391_v26 }
0x3037   :  { %5918 = vmatprep.mubr.msk.bf16.mxu1 %vm6559_vm0, %v6558_v1 }
0x3109   :  { %v3031_v15 = vpop.f32.mrb[96].mxu1 }
0x310a   :  { %v5915_v30 = vpop.f32.mrb[97].mxu1  ;;  %v3036_v46 = vsel %vm3035_vm9, %v3031_v15, -inf }
0x310b   :  { %3037 = vmax.xlane.f32.xlu1 %v3036_v46  ;;  %v7468_v30 = vld [vmem:[#allocation3 + $0xc8] sm:$0x1] }
0x311c   :  { %3101 = vperm.xlu1 %6185, %v2905_v54  }
0x3198   :  { %v3038_v41 = vpop.xlane.xlu1 %3037 }
0x3199   :  { %v3039_v48 = vsub.f32 %v3031_v15, %v3038_v41 }
0x319b   :  { %v3040_v47 = vmul.f32 1.442695, %v3039_v48 }
0x319d   :  { %6380 = vpow2.f32 %v3040_v47 }
0x31a7   :  { %v6381_v21 = vpop.eup %6380 }
0x31a8   :  { %v3042_v55 = vsel %vm3035_vm9, %v6381_v21, 0.0 }
0x31a9   :  { %3043 = vadd.xlane.f32.xlu0 %v3042_v55 }
0x31bf   :  { %3049 = vrot.lane.b32.xlu0 %v2903_v51, %s6562_s5 }
0x3236   :  { %v3044_v31 = vpop.xlane.xlu0 %3043 }
0x3237   :  { %6382 = vrcp.f32 %v3044_v31 }
0x323a   :  { %v3050_v59 = vpop.permute.xlu0 %3049 }
0x323b   :  { %v7406_v60 = vsel %vm2867_vm5, %v3050_v59, 0 }
0x323c   :  { %5917 = vmatpush3.bf16.msra.mxu1 %v7406_v60 }
0x323d   :  { %5930 = vmatprep.subr.bf16.mxu1 %v6558_v1 }
0x3241   :  { %v6383_v58 = vpop.eup %6382 }
0x3242   :  { %v3046_v63 = vmul.f32 %v6383_v58, %v6381_v21 }
0x3244   :  { %v3047_v10 = vpack.c.bf16 %v3046_v63, %v3046_v63 }
0x3246   :  { %5919 = vmatmul.mubr.msk.bf16.vlgmr.msra.gmra.mrb[100].mxu1 %vm3051_vm10, %v3047_v10 }
0x3247   :  { %5931 = vmatpush3.bf16.msra.mxu1 %v7410_v4  ;;  %5934 = vmatprep.mubr.msk.bf16.mxu1 %vm6559_vm0, %v6558_v1 }
0x3248   :  { %5932 = vmatprep.subr.bf16.mxu1 %v6558_v1 }
0x324b   :  { %5933 = vmatpush3.bf16.msra.mxu1 %v7414_v17 }
0x324c   :  { %5946 = vmatprep.subr.bf16.mxu1 %v6558_v1 }
0x324e   :  { %5935 = vmatmul.mubr.msk.bf16.vlgmr.msra.gmra.mrb[104].mxu1 %vm59_vm1, %v7298_v33 }
0x324f   :  { %5950 = vmatprep.mubr.msk.bf16.mxu1 %vm6559_vm0, %v6558_v1 }
0x3319   :  { %v7429_v3 = vpop.f32.mrb[100].mxu1 }
0x331a   :  { %v3113_v33 = vpack.c.bf16 %v7429_v3, %v7429_v3  ;;  %v5920_v40 = vpop.f32.mrb[101].mxu1 }
0x331b   :  { %v3095_v19 = vpop.f32.mrb[102].mxu1  ;;  %v3237_v40 = vld [vmem:[#allocation3 + $0x118] sm:$0xff] }
0x331c   :  { %v5921_v36 = vpop.f32.mrb[103].mxu1  ;;  %5927 = vmatmul.mubr.msk.bf16.vlgmr.msra.gmra.mrb[100].mxu0 %vm59_vm1, %v3113_v33  ;;  %v3236_v33 = vld [vmem:[#allocation3 + $0x110] sm:$0xff]  ;;  %v3239_v19 = vld [vmem:[#allocation3 + $0x128] sm:$0xff] }
0x331d   :  { %5939 = vmatpush3.bf16.msra.mxu0 %v7431_v28  ;;  %5942 = vmatprep.mubr.msk.bf16.mxu0 %vm6559_vm0, %v6558_v1  ;;  %v7479_v16 = vpack.c.bf16 %v3237_v40, %v3236_v33  ;;  %v7482_v36 = vpack.c.bf16 %v3239_v19, %v3238_v11 }
0x331e   :  { %5940 = vmatprep.subr.bf16.mxu0 %v6558_v1 }
0x331f   :  { %5947 = vmatpush3.bf16.msra.mxu1 %v7479_v16 }
0x3320   :  { %5948 = vmatprep.subr.bf16.mxu1 %v6558_v1 }
0x3321   :  { %v3200_v25 = vpop.f32.mrb[104].mxu1  ;;  %5941 = vmatpush3.bf16.msra.mxu0 %v7437_v22 }
0x3322   :  { %v5936_v34 = vpop.f32.mrb[105].mxu1  ;;  %5954 = vmatprep.subr.bf16.mxu0 %v6558_v1 }
0x3323   :  { %v3203_v38 = vpop.f32.mrb[106].mxu1  ;;  %5949 = vmatpush3.bf16.msra.mxu1 %v7482_v36 }
0x3324   :  { %v5937_v39 = vpop.f32.mrb[107].mxu1  ;;  %5943 = vmatmul.mubr.msk.bf16.vlgmr.msra.gmra.mrb[104].mxu0 %vm59_vm1, %v7331_v56  ;;  %v3102_v56 = vpop.permute.xlu1 %3101  ;;  %5962 = vmatprep.subr.bf16.mxu1 %v6558_v1 }
0x3325   :  { %5955 = vmatpush3.bf16.msra.mxu0 %v7443_v35  ;;  %5958 = vmatprep.mubr.msk.bf16.mxu0 %vm6559_vm0, %v6558_v1  ;;  %v3107_v42 = vrot.slane %v3102_v56, %v7378_v6 }
0x3326   :  { %5956 = vmatprep.subr.bf16.mxu0 %v6558_v1 }
0x3327   :  { %v3108_v45 = vmul.f32 %v3107_v42, %v7465_v37 }
0x3329   :  { %5957 = vmatpush3.bf16.msra.mxu0 %v7449_v43 }
0x332a   :  { %5970 = vmatprep.subr.bf16.mxu0 %v6558_v1 }
0x332c   :  { %5959 = vmatmul.mubr.msk.bf16.vlgmr.msra.gmra.mrb[108].mxu0 %vm59_vm1, %v7368_v20 }
0x332d   :  { %5971 = vmatpush3.bf16.msra.mxu0 %v7353_v7  ;;  %5974 = vmatprep.mubr.msk.bf16.mxu0 %vm6559_vm0, %v6558_v1 }
0x332e   :  { %5972 = vmatprep.subr.bf16.mxu0 %v6558_v1 }
0x3331   :  { %5973 = vmatpush3.bf16.msra.mxu0 %v7359_v27 }
0x3332   :  { %5983 = vmatprep.subr.bf16.mxu0 %v6558_v1 }
0x33ef   :  { %v3153_v52 = vpop.f32.mrb[100].mxu0 }
0x33f0   :  { %v3159_v20 = vadd.f32 %v3153_v52, %v3108_v45  ;;  %v5928_v15 = vpop.f32.mrb[101].mxu0 }
0x33f1   :  { %v3156_v46 = vpop.f32.mrb[102].mxu0 }
0x33f2   :  { %v3206_v41 = vadd.f32 %v3200_v25, %v3159_v20  ;;  %v5929_v48 = vpop.f32.mrb[103].mxu0 }
0x33f4   :  { %v3208_v47 = vadd.f32 %v7468_v30, %v3206_v41 }
0x33f6   :  { %6384 = vtanh.f32 %v3208_v47  ;;  %v5229_v58 = vmul.f32 -1.442695, %v3208_v47 }
0x33f7   :  { %v3283_v21 = vpop.f32.mrb[104].mxu0 }
0x33f8   :  { %v5944_v55 = vpop.f32.mrb[105].mxu0  ;;  %6386 = vpow2.f32 %v5229_v58 }
0x33f9   :  { %v3286_v51 = vpop.f32.mrb[106].mxu0 }
0x33fa   :  { %v5945_v49 = vpop.f32.mrb[107].mxu0 }
0x33fb   :  { %v3361_v49 = vld [vmem:[#allocation3 + $0x158] sm:$0xff] }
0x33ff   :  { %v7471_v53 = vpop.f32.mrb[108].mxu0 }
0x3400   :  { %v6385_v31 = vpop.eup %6384  ;;  %v5960_v59 = vpop.f32.mrb[109].mxu0 }
0x3401   :  { %3221 = vrot.lane.b32.xlu1 %v6385_v31, %s6561_s0  ;;  %v3411_v62 = vpop.f32.mrb[110].mxu0  ;;  %v3362_v31 = vld [vmem:[#allocation3 + $0x160] sm:$0xff]  ;;  %v3363_v59 = vld [vmem:[#allocation3 + $0x168] sm:$0xff] }
0x3402   :  { %v5961_v57 = vpop.f32.mrb[111].mxu0  ;;  %v6387_v63 = vpop.eup %6386  ;;  %v7504_v62 = vpack.c.bf16 %v3362_v31, %v3361_v49 }
0x3403   :  { %v3212_v10 = vadd.f32 1.0, %v6387_v63  ;;  %v3364_v57 = vld [vmem:[#allocation3 + $0x170] sm:$0xff] }
0x3404   :  { %v7507_v58 = vpack.c.bf16 %v3364_v57, %v3363_v59  ;;  %v7556_v57 = vld [vmem:[%s7910_s3 + $0x58] sm:$0x1] }
0x3405   :  { %6388 = vrcp.f32 %v3212_v10 }
0x340f   :  { %v6389_v23 = vpop.eup %6388 }
0x3410   :  { %v3219_v54 = vmul.f32 %v6389_v23, %v3217_v5  ;;  %v7520_v5 = vld [vmem:[#allocation3 + $0x198] sm:$0x1] }
0x3473   :  { %v3222_v0 = vpop.permute.xlu1 %3221 }
0x3474   :  { %v3224_v8 = vmul.f32 %v6389_v23, %v3222_v0 }
0x3476   :  { %3226 = vrot.lane.b32.xlu0 %v3224_v8, %s6562_s5 }
0x34e8   :  { %v3227_v29 = vpop.permute.xlu0 %3226 }
0x34e9   :  { %v7476_v24 = vadd.f32 %v3227_v29, %v3219_v54 }
0x34eb   :  { %6390 = vtanh.f32 %v7476_v24 }
0x34f5   :  { %v6391_v61 = vpop.eup %6390 }
0x34f6   :  { %3232 = vrot.lane.b32.xlu1 %v6391_v61, %s6561_s0 }
0x3568   :  { %v3233_v2 = vpop.permute.xlu1 %3232 }
0x3569   :  { %v3235_v32 = vmul.f32 %v6389_v23, %v3233_v2 }
0x356b   :  { %v3240_v25 = vpack.c.bf16 %v3235_v32, %v3235_v32 }
0x356d   :  { %3290 = vrot.lane.b32.xlu0 %v3240_v25, %s6562_s5 }
0x35df   :  { %v7489_v34 = vpop.permute.xlu0 %3290 }
0x35e0   :  { %5951 = vmatmul.mubr.msk.bf16.vlgmr.msra.gmra.mrb[108].mxu1 %vm59_vm1, %v7489_v34 }
0x35e1   :  { %5966 = vmatprep.mubr.msk.bf16.mxu1 %vm6559_vm0, %v6558_v1  ;;  %5963 = vmatpush3.bf16.msra.mxu1 %v7504_v62 }
0x35e2   :  { %5964 = vmatprep.subr.bf16.mxu1 %v6558_v1 }
0x35e5   :  { %5965 = vmatpush3.bf16.msra.mxu1 %v7507_v58 }
0x35e6   :  { %5978 = vmatprep.subr.mxu1 %v6558_v1 }
0x36b3   :  { %v3329_v18 = vpop.f32.mrb[108].mxu1 }
0x36b4   :  { %v3330_v38 = vadd.f32 %v3329_v18, %v3283_v21  ;;  %v5952_v39 = vpop.f32.mrb[109].mxu1 }
0x36b5   :  { %v3332_v56 = vpop.f32.mrb[110].mxu1 }
0x36b6   :  { %v3336_v42 = vadd.f32 %v7495_v9, %v3330_v38  ;;  %v5953_v45 = vpop.f32.mrb[111].mxu1 }
0x36b8   :  { %6392 = vtanh.f32 %v3336_v42  ;;  %v5232_v20 = vmul.f32 -1.442695, %v3336_v42 }
0x36ba   :  { %6394 = vpow2.f32 %v5232_v20 }
0x36c2   :  { %v6393_v52 = vpop.eup %6392 }
0x36c3   :  { %3346 = vrot.lane.b32.xlu1 %v6393_v52, %s6561_s0 }
0x36c4   :  { %v6395_v15 = vpop.eup %6394 }
0x36c5   :  { %v3340_v46 = vadd.f32 1.0, %v6395_v15 }
0x36c7   :  { %6396 = vrcp.f32 %v3340_v46 }
0x36d1   :  { %v6397_v41 = vpop.eup %6396 }
0x36d2   :  { %v3344_v21 = vmul.f32 %v6397_v41, %v7326_v50 }
0x3735   :  { %v3347_v48 = vpop.permute.xlu1 %3346 }
0x3736   :  { %v3349_v47 = vmul.f32 %v6397_v41, %v3347_v48 }
0x3738   :  { %3351 = vrot.lane.b32.xlu0 %v3349_v47, %s6562_s5 }
0x37aa   :  { %v3352_v55 = vpop.permute.xlu0 %3351 }
0x37ab   :  { %v7501_v51 = vadd.f32 %v3352_v55, %v3344_v21 }
0x37ad   :  { %6398 = vtanh.f32 %v7501_v51 }
0x37b7   :  { %v6399_v50 = vpop.eup %6398 }
0x37b8   :  { %3357 = vrot.lane.b32.xlu1 %v6399_v50, %s6561_s0  ;;  %v3493_v50 = vmul.f32 %v7556_v57, %v7429_v3 }
0x382a   :  { %v3358_v63 = vpop.permute.xlu1 %3357 }
0x382b   :  { %v3360_v10 = vmul.f32 %v6397_v41, %v3358_v63 }
0x382d   :  { %v3365_v23 = vpack.c.bf16 %v3360_v10, %v3360_v10 }
0x382f   :  { %3415 = vrot.lane.b32.xlu0 %v3365_v23, %s6562_s5 }
0x38a1   :  { %v7514_v0 = vpop.permute.xlu0 %3415 }
0x38a2   :  { %5967 = vmatmul.mubr.msk.bf16.vlgmr.msra.gmra.mrb[112].mxu1 %vm59_vm1, %v7514_v0 }
0x38a3   :  { %5980 = vmatprep.mubr.msk.f32.mxu1 %vm6559_vm0, %v6558_v1 }
0x3975   :  { %v3454_v8 = vpop.f32.mrb[112].mxu1 }
0x3976   :  { %v3455_v54 = vadd.f32 %v3454_v8, %v7471_v53  ;;  %v5968_v29 = vpop.f32.mrb[113].mxu1 }
0x3977   :  { %v3457_v33 = vpop.f32.mrb[114].mxu1  ;;  %v3486_v29 = vld [vmem:[%s7910_s3 + $0x50] sm:$0x1] }
0x3978   :  { %v3461_v40 = vadd.f32 %v7520_v5, %v3455_v54  ;;  %v5969_v11 = vpop.f32.mrb[115].mxu1 }
0x397a   :  { %6400 = vtanh.f32 %v3461_v40  ;;  %v5235_v61 = vmul.f32 -1.442695, %v3461_v40 }
0x397c   :  { %6402 = vpow2.f32 %v5235_v61 }
0x3984   :  { %v6401_v19 = vpop.eup %6400 }
0x3985   :  { %3471 = vrot.lane.b32.xlu1 %v6401_v19, %s6561_s0 }
0x3986   :  { %v6403_v2 = vpop.eup %6402 }
0x3987   :  { %v3465_v32 = vadd.f32 1.0, %v6403_v2 }
0x3989   :  { %6404 = vrcp.f32 %v3465_v32 }
0x3993   :  { %v6405_v25 = vpop.eup %6404 }
0x3994   :  { %v3469_v53 = vmul.f32 %v6405_v25, %v7341_v12 }
0x39f7   :  { %v3472_v18 = vpop.permute.xlu1 %3471 }
0x39f8   :  { %v3474_v38 = vmul.f32 %v6405_v25, %v3472_v18 }
0x39fa   :  { %3476 = vrot.lane.b32.xlu0 %v3474_v38, %s6562_s5 }
0x3a6c   :  { %v3477_v39 = vpop.permute.xlu0 %3476 }
0x3a6d   :  { %v7527_v56 = vadd.f32 %v3477_v39, %v3469_v53 }
0x3a6f   :  { %6406 = vtanh.f32 %v7527_v56 }
0x3a79   :  { %v6407_v42 = vpop.eup %6406 }
0x3a7a   :  { %3482 = vrot.lane.b32.xlu1 %v6407_v42, %s6561_s0 }
0x3aec   :  { %v3483_v45 = vpop.permute.xlu1 %3482 }
0x3aed   :  { %v3485_v52 = vmul.f32 %v6405_v25, %v3483_v45 }
0x3aef   :  { %v3508_v20 = vpack.c.bf16 %v3485_v52, %v3485_v52 }
0x3af1   :  { %3510 = vrot.lane.b32.xlu0 %v3508_v20, %s6562_s5 }
0x3b63   :  { %v7532_v15 = vpop.permute.xlu0 %3510 }
0x3b64   :  { %5975 = vmatmul.mubr.msk.bf16.vlgmr.msra.gmra.mrb[112].mxu0 %vm59_vm1, %v7532_v15 }
0x3b65   :  { %5984 = vmatpush3.bf16.msra.mxu0 %v7406_v60  ;;  %5985 = vmatprep.mubr.msk.bf16.mxu0 %vm6559_vm0, %v6558_v1 }
0x3b66   :  { %5997 = vmatprep.subr.bf16.mxu0 %v6558_v1 }
0x3c37   :  { %v3549_v12 = vpop.f32.mrb[112].mxu0 }
0x3c38   :  { %v3558_v46 = vrot.slane %v3549_v12, %v7378_v6  ;;  %v5976_v41 = vpop.f32.mrb[113].mxu0 }
0x3c39   :  { %v3552_v48 = vpop.f32.mrb[114].mxu0 }
0x3c3a   :  { %v3559_v47 = vadd.f32 %v3558_v46, %v7384_v44  ;;  %v5977_v21 = vpop.f32.mrb[115].mxu0 }
0x3c3c   :  { %6408 = vtanh.f32 %v3559_v47 }
0x3c46   :  { %v6409_v55 = vpop.eup %6408 }
0x3c47   :  { %5979 = vmatpush3.xpose.msk.msra.mxu1 %vm59_vm1, %v6409_v55 }
0x3c48   :  { %5989 = vmatprep.subr.bf16.mxu1 %v6558_v1 }
0x3c4a   :  { %5981 = vmatmul.mubr.msk.f32.vlgmr.msra.gmra.mrb[98].mxu1 %vm59_vm1, %v7391_v26 }
0x3c4b   :  { %5990 = vmatpush3.bf16.msra.mxu1 %v7401_v14  ;;  %5993 = vmatprep.mubr.msk.bf16.mxu1 %vm6559_vm0, %v6558_v1 }
0x3c4c   :  { %5991 = vmatprep.subr.bf16.mxu1 %v6558_v1 }
0x3c4f   :  { %5992 = vmatpush3.bf16.msra.mxu1 %v7425_v13 }
0x3c50   :  { %6005 = vmatprep.subr.bf16.mxu1 %v6558_v1 }
0x3d1d   :  { %v3630_v49 = vpop.f32.mrb[98].mxu1 }
0x3d1e   :  { %v5982_v31 = vpop.f32.mrb[99].mxu1  ;;  %v3634_v59 = vsel %vm3035_vm9, %v3630_v49, -inf }
0x3d1f   :  { %3635 = vmax.xlane.f32.xlu1 %v3634_v59 }
0x3d30   :  { %3495 = vrot.lane.b32.xlu1 %v3493_v50, %s6563_s29 }
0x3dac   :  { %v3636_v63 = vpop.xlane.xlu1 %3635 }
0x3dad   :  { %v3637_v10 = vsub.f32 %v3630_v49, %v3636_v63 }
0x3daf   :  { %v3638_v23 = vmul.f32 1.442695, %v3637_v10 }
0x3db0   :  { %v3496_v11 = vpop.permute.xlu1 %3495 }
0x3db1   :  { %6410 = vpow2.f32 %v3638_v23 }
0x3dbb   :  { %v6411_v8 = vpop.eup %6410 }
0x3dbc   :  { %v3640_v54 = vsel %vm3035_vm9, %v6411_v8, 0.0 }
0x3dbd   :  { %3641 = vadd.xlane.f32.xlu0 %v3640_v54 }
0x3dd3   :  { %3488 = vrot.lane.b32.xlu0 %v3486_v29, %s6563_s29 }
0x3e4a   :  { %v3642_v33 = vpop.xlane.xlu0 %3641 }
0x3e4b   :  { %6412 = vrcp.f32 %v3642_v33 }
0x3e4e   :  { %v7566_v3 = vpop.permute.xlu0 %3488 }
0x3e4f   :  { %v3491_v40 = vmul.f32 %v7566_v3, %v3485_v52 }
0x3e51   :  { %v3498_v19 = vadd.f32 %v3496_v11, %v3491_v40 }
0x3e53   :  { %3500 = vrot.lane.b32.xlu1 %v3498_v19, %s6562_s5 }
0x3e55   :  { %v6413_v61 = vpop.eup %6412 }
0x3e56   :  { %v3644_v2 = vmul.f32 %v6413_v61, %v6411_v8 }
0x3e58   :  { %v3645_v32 = vpack.c.bf16 %v3644_v2, %v3644_v2 }
0x3e5a   :  { %5986 = vmatmul.mubr.msk.bf16.vlgmr.msra.gmra.mrb[116].mxu0 %vm3051_vm10, %v3645_v32 }
0x3e5b   :  { %5998 = vmatpush3.bf16.msra.mxu0 %v7410_v4  ;;  %6001 = vmatprep.mubr.msk.bf16.mxu0 %vm6559_vm0, %v6558_v1 }
0x3e5c   :  { %5999 = vmatprep.subr.bf16.mxu0 %v6558_v1 }
0x3e5f   :  { %6000 = vmatpush3.bf16.msra.mxu0 %v7414_v17 }
0x3e60   :  { %6013 = vmatprep.subr.bf16.mxu0 %v6558_v1 }
0x3e62   :  { %6002 = vmatmul.mubr.msk.bf16.vlgmr.msra.gmra.mrb[120].mxu0 %vm59_vm1, %v7489_v34 }
0x3e63   :  { %6014 = vmatpush3.bf16.msra.mxu0 %v7479_v16  ;;  %6017 = vmatprep.mubr.msk.bf16.mxu0 %vm6559_vm0, %v6558_v1 }
0x3e64   :  { %6015 = vmatprep.subr.bf16.mxu0 %v6558_v1 }
0x3e67   :  { %6016 = vmatpush3.bf16.msra.mxu0 %v7482_v36 }
0x3e68   :  { %6029 = vmatprep.subr.bf16.mxu0 %v6558_v1 }
0x3ec5   :  { %v3501_v25 = vpop.permute.xlu1 %3500 }
0x3ec6   :  { %v3504_v18 = vsel %vm3503_vm11, %v3501_v25, 0.0 }
0x3ec7   :  { %3505 = vadd.xlane.f32.xlu0 %v3504_v18 }
0x3f2d   :  { %v7586_v38 = vpop.f32.mrb[116].mxu0 }
0x3f2e   :  { %v3695_v34 = vpack.c.bf16 %v7586_v38, %v7586_v38  ;;  %v5987_v53 = vpop.f32.mrb[117].mxu0 }
0x3f2f   :  { %v3686_v39 = vpop.f32.mrb[118].mxu0 }
0x3f30   :  { %v5988_v42 = vpop.f32.mrb[119].mxu0  ;;  %5994 = vmatmul.mubr.msk.bf16.vlgmr.msra.gmra.mrb[116].mxu1 %vm59_vm1, %v3695_v34 }
0x3f31   :  { %6006 = vmatpush3.bf16.msra.mxu1 %v7431_v28  ;;  %6009 = vmatprep.mubr.msk.bf16.mxu1 %vm6559_vm0, %v6558_v1 }
0x3f32   :  { %6007 = vmatprep.subr.bf16.mxu1 %v6558_v1 }
0x3f35   :  { %v3774_v45 = vpop.f32.mrb[120].mxu0  ;;  %6008 = vmatpush3.bf16.msra.mxu1 %v7437_v22 }
0x3f36   :  { %v6003_v52 = vpop.f32.mrb[121].mxu0  ;;  %6021 = vmatprep.subr.bf16.mxu1 %v6558_v1 }
0x3f37   :  { %v3777_v20 = vpop.f32.mrb[122].mxu0 }
0x3f38   :  { %v6004_v12 = vpop.f32.mrb[123].mxu0  ;;  %6010 = vmatmul.mubr.msk.bf16.vlgmr.msra.gmra.mrb[120].mxu1 %vm59_vm1, %v7514_v0  ;;  %v7616_v0 = vld [vmem:[%s7910_s3 + $0x60] sm:$0x1] }
0x3f39   :  { %6022 = vmatpush3.bf16.msra.mxu1 %v7443_v35  ;;  %6025 = vmatprep.mubr.msk.bf16.mxu1 %vm6559_vm0, %v6558_v1 }
0x3f3a   :  { %6023 = vmatprep.subr.bf16.mxu1 %v6558_v1 }
0x3f3d   :  { %6024 = vmatpush3.bf16.msra.mxu1 %v7449_v43 }
0x3f3e   :  { %6037 = vmatprep.subr.bf16.mxu1 %v6558_v1 }
0x3f40   :  { %6026 = vmatmul.mubr.msk.bf16.vlgmr.msra.gmra.mrb[124].mxu1 %vm59_vm1, %v7532_v15 }
0x3f41   :  { %6038 = vmatpush3.bf16.msra.mxu1 %v7353_v7  ;;  %6041 = vmatprep.mubr.msk.bf16.mxu1 %vm6559_vm0, %v6558_v1 }
0x3f42   :  { %6039 = vmatprep.subr.bf16.mxu1 %v6558_v1 }
0x3f45   :  { %6040 = vmatpush3.bf16.msra.mxu1 %v7359_v27 }
0x3f46   :  { %6056 = vmatprep.subr.bf16.mxu1 %v6558_v1 }
0x3f54   :  { %v3506_v46 = vpop.xlane.xlu0 %3505 }
0x3f55   :  { %v7619_v41 = vadd.f32 %v3506_v46, %v7616_v0 }
0x3f57   :  { %3691 = vperm.xlu1 %6185, %v7619_v41  }
0x3fd6   :  { %v3692_v15 = vpop.permute.xlu1 %3691 }
0x3fd7   :  { %v3694_v48 = vmul.f32 %v3692_v15, %v7465_v37 }
0x4003   :  { %v3733_v47 = vpop.f32.mrb[116].mxu1 }
0x4004   :  { %v3739_v21 = vadd.f32 %v3733_v47, %v3694_v48  ;;  %v5995_v55 = vpop.f32.mrb[117].mxu1 }
0x4005   :  { %v3736_v49 = vpop.f32.mrb[118].mxu1 }
0x4006   :  { %v3780_v31 = vadd.f32 %v3774_v45, %v3739_v21  ;;  %v5996_v59 = vpop.f32.mrb[119].mxu1 }
0x4008   :  { %v3781_v50 = vadd.f32 %v3780_v31, %v7468_v30 }
0x400a   :  { %6414 = vtanh.f32 %v3781_v50  ;;  %v5242_v19 = vmul.f32 -1.442695, %v3781_v50 }
0x400b   :  { %v3841_v63 = vpop.f32.mrb[120].mxu1 }
0x400c   :  { %v6011_v10 = vpop.f32.mrb[121].mxu1  ;;  %6416 = vpow2.f32 %v5242_v19 }
0x400d   :  { %v3844_v23 = vpop.f32.mrb[122].mxu1 }
0x400e   :  { %v6012_v8 = vpop.f32.mrb[123].mxu1 }
0x4013   :  { %v7624_v54 = vpop.f32.mrb[124].mxu1 }
0x4014   :  { %v6415_v29 = vpop.eup %6414  ;;  %v6027_v33 = vpop.f32.mrb[125].mxu1 }
0x4015   :  { %v3956_v40 = vpop.f32.mrb[126].mxu1  ;;  %3791 = vrot.lane.b32.xlu1 %v6415_v29, %s6561_s0 }
0x4016   :  { %v6028_v11 = vpop.f32.mrb[127].mxu1  ;;  %v6417_v61 = vpop.eup %6416 }
0x4017   :  { %v3785_v2 = vadd.f32 1.0, %v6417_v61 }
0x4019   :  { %6418 = vrcp.f32 %v3785_v2 }
0x4023   :  { %v6419_v32 = vpop.eup %6418 }
0x4024   :  { %v3789_v34 = vmul.f32 %v6419_v32, %v7476_v24 }
0x4087   :  { %v3792_v25 = vpop.permute.xlu1 %3791 }
0x4088   :  { %v3794_v18 = vmul.f32 %v6419_v32, %v3792_v25 }
0x408a   :  { %3796 = vrot.lane.b32.xlu1 %v3794_v18, %s6562_s5 }
0x40fc   :  { %v3797_v53 = vpop.permute.xlu1 %3796 }
0x40fd   :  { %v7629_v39 = vadd.f32 %v3797_v53, %v3789_v34 }
0x40ff   :  { %6420 = vtanh.f32 %v7629_v39 }
0x4109   :  { %v6421_v42 = vpop.eup %6420 }
0x410a   :  { %3802 = vrot.lane.b32.xlu1 %v6421_v42, %s6561_s0 }
0x417c   :  { %v3803_v45 = vpop.permute.xlu1 %3802 }
0x417d   :  { %v3805_v52 = vmul.f32 %v6419_v32, %v3803_v45 }
0x417f   :  { %v3806_v20 = vpack.c.bf16 %v3805_v52, %v3805_v52 }
0x4181   :  { %3848 = vrot.lane.b32.xlu1 %v3806_v20, %s6562_s5 }
0x41f3   :  { %v7634_v12 = vpop.permute.xlu1 %3848 }
0x41f4   :  { %6018 = vmatmul.mubr.msk.bf16.vlgmr.msra.gmra.mrb[124].mxu0 %vm59_vm1, %v7634_v12 }
0x41f5   :  { %6030 = vmatpush3.bf16.msra.mxu0 %v7504_v62  ;;  %6033 = vmatprep.mubr.msk.bf16.mxu0 %vm6559_vm0, %v6558_v1 }
0x41f6   :  { %6031 = vmatprep.subr.bf16.mxu0 %v6558_v1 }
0x41f9   :  { %6032 = vmatpush3.bf16.msra.mxu0 %v7507_v58 }
0x41fa   :  { %6045 = vmatprep.subr.mxu0 %v6558_v1 }
0x42c7   :  { %v3887_v24 = vpop.f32.mrb[124].mxu0 }
0x42c8   :  { %v3888_v46 = vadd.f32 %v3887_v24, %v3841_v63  ;;  %v6019_v15 = vpop.f32.mrb[125].mxu0 }
0x42c9   :  { %v3890_v48 = vpop.f32.mrb[126].mxu0 }
0x42ca   :  { %v3893_v47 = vadd.f32 %v3888_v46, %v7495_v9  ;;  %v6020_v21 = vpop.f32.mrb[127].mxu0 }
0x42cc   :  { %6422 = vtanh.f32 %v3893_v47  ;;  %v5245_v49 = vmul.f32 -1.442695, %v3893_v47 }
0x42ce   :  { %6424 = vpow2.f32 %v5245_v49 }
0x42d6   :  { %v6423_v55 = vpop.eup %6422 }
0x42d7   :  { %3903 = vrot.lane.b32.xlu1 %v6423_v55, %s6561_s0 }
0x42d8   :  { %v6425_v31 = vpop.eup %6424 }
0x42d9   :  { %v3897_v59 = vadd.f32 1.0, %v6425_v31 }
0x42db   :  { %6426 = vrcp.f32 %v3897_v59 }
0x42e5   :  { %v6427_v50 = vpop.eup %6426 }
0x42e6   :  { %v3901_v63 = vmul.f32 %v6427_v50, %v7501_v51 }
0x4349   :  { %v3904_v10 = vpop.permute.xlu1 %3903 }
0x434a   :  { %v3906_v23 = vmul.f32 %v6427_v50, %v3904_v10 }
0x434c   :  { %3908 = vrot.lane.b32.xlu1 %v3906_v23, %s6562_s5 }
0x43be   :  { %v3909_v8 = vpop.permute.xlu1 %3908 }
0x43bf   :  { %v7648_v29 = vadd.f32 %v3909_v8, %v3901_v63 }
0x43c1   :  { %6428 = vtanh.f32 %v7648_v29 }
0x43cb   :  { %v6429_v33 = vpop.eup %6428 }
0x43cc   :  { %3914 = vrot.lane.b32.xlu1 %v6429_v33, %s6561_s0 }
0x443e   :  { %v3915_v40 = vpop.permute.xlu1 %3914 }
0x443f   :  { %v3917_v11 = vmul.f32 %v6427_v50, %v3915_v40 }
0x4441   :  { %v3918_v19 = vpack.c.bf16 %v3917_v11, %v3917_v11 }
0x4443   :  { %3960 = vrot.lane.b32.xlu0 %v3918_v19, %s6562_s5 }
0x44b5   :  { %v7653_v61 = vpop.permute.xlu0 %3960 }
0x44b6   :  { %6034 = vmatmul.mubr.msk.bf16.vlgmr.msra.gmra.mrb[128].mxu0 %vm59_vm1, %v7653_v61 }
0x44b7   :  { %6047 = vmatprep.mubr.msk.f32.mxu0 %vm6559_vm0, %v6558_v1 }
0x4589   :  { %v3999_v51 = vpop.f32.mrb[128].mxu0 }
0x458a   :  { %v4000_v2 = vadd.f32 %v3999_v51, %v7624_v54  ;;  %v6035_v32 = vpop.f32.mrb[129].mxu0 }
0x458b   :  { %v4002_v25 = vpop.f32.mrb[130].mxu0 }
0x458c   :  { %v4005_v18 = vadd.f32 %v4000_v2, %v7520_v5  ;;  %v6036_v34 = vpop.f32.mrb[131].mxu0 }
0x458e   :  { %6430 = vtanh.f32 %v4005_v18  ;;  %v5248_v42 = vmul.f32 -1.442695, %v4005_v18 }
0x4590   :  { %6432 = vpow2.f32 %v5248_v42 }
0x4598   :  { %v6431_v53 = vpop.eup %6430 }
0x4599   :  { %4015 = vrot.lane.b32.xlu1 %v6431_v53, %s6561_s0 }
0x459a   :  { %v6433_v45 = vpop.eup %6432 }
0x459b   :  { %v4009_v52 = vadd.f32 1.0, %v6433_v45 }
0x459d   :  { %6434 = vrcp.f32 %v4009_v52 }
0x45a7   :  { %v6435_v20 = vpop.eup %6434 }
0x45a8   :  { %v4013_v54 = vmul.f32 %v6435_v20, %v7527_v56 }
0x460b   :  { %v4016_v24 = vpop.permute.xlu1 %4015 }
0x460c   :  { %v4018_v46 = vmul.f32 %v6435_v20, %v4016_v24 }
0x460e   :  { %4020 = vrot.lane.b32.xlu1 %v4018_v46, %s6562_s5 }
0x4680   :  { %v4021_v15 = vpop.permute.xlu1 %4020 }
0x4681   :  { %v7664_v48 = vadd.f32 %v4021_v15, %v4013_v54 }
0x4683   :  { %6436 = vtanh.f32 %v7664_v48 }
0x468d   :  { %v6437_v47 = vpop.eup %6436 }
0x468e   :  { %4026 = vrot.lane.b32.xlu1 %v6437_v47, %s6561_s0 }
0x4700   :  { %v4027_v21 = vpop.permute.xlu1 %4026 }
0x4701   :  { %v4029_v55 = vmul.f32 %v6435_v20, %v4027_v21 }
0x4703   :  { %v4045_v49 = vpack.c.bf16 %v4029_v55, %v4029_v55  ;;  %v4030_v34 = vmul.f32 %v4029_v55, %v7566_v3 }
0x4705   :  { %4047 = vrot.lane.b32.xlu1 %v4045_v49, %s6562_s5 }
0x4777   :  { %v7669_v31 = vpop.permute.xlu1 %4047 }
0x4778   :  { %6042 = vmatmul.mubr.msk.bf16.vlgmr.msra.gmra.mrb[128].mxu1 %vm59_vm1, %v7669_v31 }
0x4779   :  { %6057 = vmatpush3.bf16.msra.mxu1 %v7401_v14  ;;  %6060 = vmatprep.mubr.msk.bf16.mxu1 %vm6559_vm0, %v6558_v1 }
0x477a   :  { %6058 = vmatprep.subr.bf16.mxu1 %v6558_v1 }
0x477d   :  { %6059 = vmatpush3.bf16.msra.mxu1 %v7425_v13 }
0x477e   :  { %6072 = vmatprep.subr.bf16.mxu1 %v6558_v1 }
0x484b   :  { %v4086_v56 = vpop.f32.mrb[128].mxu1 }
0x484c   :  { %v4095_v59 = vrot.slane %v4086_v56, %v7378_v6  ;;  %v6043_v50 = vpop.f32.mrb[129].mxu1 }
0x484d   :  { %v4089_v10 = vpop.f32.mrb[130].mxu1 }
0x484e   :  { %v4096_v23 = vadd.f32 %v4095_v59, %v7384_v44  ;;  %v6044_v63 = vpop.f32.mrb[131].mxu1 }
0x4850   :  { %6438 = vtanh.f32 %v4096_v23 }
0x485a   :  { %v6439_v8 = vpop.eup %6438 }
0x485b   :  { %6046 = vmatpush3.xpose.msk.msra.mxu0 %vm59_vm1, %v6439_v8 }
0x485c   :  { %6050 = vmatprep.subr.bf16.mxu0 %v6558_v1 }
0x485e   :  { %6048 = vmatmul.mubr.msk.f32.vlgmr.msra.gmra.mrb[132].mxu0 %vm59_vm1, %v7391_v26  ;;  %v4031_v26 = vmul.f32 %v7586_v38, %v7556_v57 }
0x485f   :  { %6051 = vmatpush3.bf16.msra.mxu0 %v7406_v60  ;;  %6052 = vmatprep.mubr.msk.bf16.mxu0 %vm6559_vm0, %v6558_v1 }
0x4860   :  { %6064 = vmatprep.subr.bf16.mxu0 %v6558_v1 }
0x4931   :  { %v4167_v33 = vpop.f32.mrb[132].mxu0 }
0x4932   :  { %v6049_v40 = vpop.f32.mrb[133].mxu0  ;;  %v4171_v11 = vsel %vm3035_vm9, %v4167_v33, -inf }
0x4933   :  { %4172 = vmax.xlane.f32.xlu1 %v4171_v11 }
0x49c0   :  { %v4173_v19 = vpop.xlane.xlu1 %4172 }
0x49c1   :  { %v4174_v51 = vsub.f32 %v4167_v33, %v4173_v19 }
0x49c3   :  { %v4175_v2 = vmul.f32 1.442695, %v4174_v51 }
0x49c5   :  { %6440 = vpow2.f32 %v4175_v2 }
0x49cf   :  { %v6441_v32 = vpop.eup %6440 }
0x49d0   :  { %v4177_v25 = vsel %vm3035_vm9, %v6441_v32, 0.0 }
0x49d1   :  { %4178 = vadd.xlane.f32.xlu0 %v4177_v25 }
0x49e7   :  { %4033 = vrot.lane.b32.xlu0 %v4031_v26, %s6563_s29 }
0x4a5e   :  { %v4179_v18 = vpop.xlane.xlu0 %4178 }
0x4a5f   :  { %6442 = vrcp.f32 %v4179_v18 }
0x4a62   :  { %v4034_v53 = vpop.permute.xlu0 %4033 }
0x4a63   :  { %v4036_v42 = vadd.f32 %v4034_v53, %v4030_v34 }
0x4a65   :  { %4038 = vrot.lane.b32.xlu1 %v4036_v42, %s6562_s5 }
0x4a69   :  { %v6443_v45 = vpop.eup %6442 }
0x4a6a   :  { %v4181_v52 = vmul.f32 %v6443_v45, %v6441_v32 }
0x4a6c   :  { %v4182_v20 = vpack.c.bf16 %v4181_v52, %v4181_v52 }
0x4a6e   :  { %6053 = vmatmul.mubr.msk.bf16.vlgmr.msra.gmra.mrb[136].mxu0 %vm3051_vm10, %v4182_v20 }
0x4a6f   :  { %6065 = vmatpush3.bf16.msra.mxu0 %v7410_v4  ;;  %6068 = vmatprep.mubr.msk.bf16.mxu0 %vm6559_vm0, %v6558_v1 }
0x4a70   :  { %6066 = vmatprep.subr.bf16.mxu0 %v6558_v1 }
0x4a73   :  { %6067 = vmatpush3.bf16.msra.mxu0 %v7414_v17 }
0x4a74   :  { %6080 = vmatprep.subr.bf16.mxu0 %v6558_v1 }
0x4a76   :  { %6069 = vmatmul.mubr.msk.bf16.vlgmr.msra.gmra.mrb[140].mxu0 %vm59_vm1, %v7634_v12 }
0x4a77   :  { %6081 = vmatpush3.bf16.msra.mxu0 %v7479_v16  ;;  %6084 = vmatprep.mubr.msk.bf16.mxu0 %vm6559_vm0, %v6558_v1 }
0x4a78   :  { %6082 = vmatprep.subr.bf16.mxu0 %v6558_v1 }
0x4a7b   :  { %6083 = vmatpush3.bf16.msra.mxu0 %v7482_v36 }
0x4a7c   :  { %6096 = vmatprep.subr.bf16.mxu0 %v6558_v1 }
0x4ad7   :  { %v4039_v38 = vpop.permute.xlu1 %4038 }
0x4ad8   :  { %v4041_v24 = vsel %vm3503_vm11, %v4039_v38, 0.0 }
0x4ad9   :  { %4042 = vadd.xlane.f32.xlu1 %v4041_v24 }
0x4b41   :  { %v7712_v46 = vpop.f32.mrb[136].mxu0 }
0x4b42   :  { %v4232_v12 = vpack.c.bf16 %v7712_v46, %v7712_v46  ;;  %v6054_v54 = vpop.f32.mrb[137].mxu0 }
0x4b43   :  { %v4223_v15 = vpop.f32.mrb[138].mxu0 }
0x4b44   :  { %v6055_v47 = vpop.f32.mrb[139].mxu0  ;;  %6061 = vmatmul.mubr.msk.bf16.vlgmr.msra.gmra.mrb[132].mxu1 %vm59_vm1, %v4232_v12 }
0x4b45   :  { %6073 = vmatpush3.bf16.msra.mxu1 %v7431_v28  ;;  %6076 = vmatprep.mubr.msk.bf16.mxu1 %vm6559_vm0, %v6558_v1 }
0x4b46   :  { %6074 = vmatprep.subr.bf16.mxu1 %v6558_v1 }
0x4b49   :  { %v4311_v21 = vpop.f32.mrb[140].mxu0  ;;  %6075 = vmatpush3.bf16.msra.mxu1 %v7437_v22 }
0x4b4a   :  { %v6070_v55 = vpop.f32.mrb[141].mxu0  ;;  %6088 = vmatprep.subr.bf16.mxu1 %v6558_v1 }
0x4b4b   :  { %v4314_v49 = vpop.f32.mrb[142].mxu0 }
0x4b4c   :  { %v6071_v56 = vpop.f32.mrb[143].mxu0  ;;  %6077 = vmatmul.mubr.msk.bf16.vlgmr.msra.gmra.mrb[136].mxu1 %vm59_vm1, %v7653_v61 }
0x4b4d   :  { %6089 = vmatpush3.bf16.msra.mxu1 %v7443_v35  ;;  %6092 = vmatprep.mubr.msk.bf16.mxu1 %vm6559_vm0, %v6558_v1 }
0x4b4e   :  { %6090 = vmatprep.subr.bf16.mxu1 %v6558_v1 }
0x4b51   :  { %6091 = vmatpush3.bf16.msra.mxu1 %v7449_v43 }
0x4b52   :  { %6104 = vmatprep.subr.bf16.mxu1 %v6558_v1 }
0x4b54   :  { %6093 = vmatmul.mubr.msk.bf16.vlgmr.msra.gmra.mrb[140].mxu1 %vm59_vm1, %v7669_v31 }
0x4b55   :  { %6105 = vmatpush3.bf16.msra.mxu1 %v7353_v7  ;;  %6108 = vmatprep.mubr.msk.bf16.mxu1 %vm6559_vm0, %v6558_v1 }
0x4b56   :  { %6106 = vmatprep.subr.bf16.mxu1 %v6558_v1 }
0x4b59   :  { %6107 = vmatpush3.bf16.msra.mxu1 %v7359_v27 }
0x4b5a   :  { %6117 = vmatprep.subr.bf16.mxu1 %v6558_v1 }
0x4b66   :  { %v4043_v61 = vpop.xlane.xlu1 %4042 }
0x4b67   :  { %v7740_v59 = vadd.f32 %v4043_v61, %v7616_v0 }
0x4b69   :  { %4228 = vperm.xlu0 %6184, %v7740_v59  }
0x4be8   :  { %v4229_v50 = vpop.permute.xlu0 %4228 }
0x4be9   :  { %v4231_v31 = vmul.f32 %v4229_v50, %v7465_v37 }
0x4c17   :  { %v4270_v10 = vpop.f32.mrb[132].mxu1 }
0x4c18   :  { %v4276_v7 = vadd.f32 %v4270_v10, %v4231_v31  ;;  %v6062_v23 = vpop.f32.mrb[133].mxu1 }
0x4c19   :  { %v4273_v63 = vpop.f32.mrb[134].mxu1 }
0x4c1a   :  { %v4317_v8 = vadd.f32 %v4311_v21, %v4276_v7  ;;  %v6063_v33 = vpop.f32.mrb[135].mxu1 }
0x4c1c   :  { %v4318_v40 = vadd.f32 %v4317_v8, %v7468_v30 }
0x4c1e   :  { %6444 = vtanh.f32 %v4318_v40  ;;  %v5255_v18 = vmul.f32 -1.442695, %v4318_v40 }
0x4c1f   :  { %v4378_v27 = vpop.f32.mrb[136].mxu1 }
0x4c20   :  { %v6078_v11 = vpop.f32.mrb[137].mxu1  ;;  %6446 = vpow2.f32 %v5255_v18 }
0x4c21   :  { %v4381_v19 = vpop.f32.mrb[138].mxu1 }
0x4c22   :  { %v6079_v51 = vpop.f32.mrb[139].mxu1 }
0x4c27   :  { %v7745_v2 = vpop.f32.mrb[140].mxu1 }
0x4c28   :  { %v6445_v32 = vpop.eup %6444  ;;  %v6094_v25 = vpop.f32.mrb[141].mxu1 }
0x4c29   :  { %v4493_v26 = vpop.f32.mrb[142].mxu1  ;;  %4328 = vrot.lane.b32.xlu0 %v6445_v32, %s6561_s0 }
0x4c2a   :  { %v6095_v37 = vpop.f32.mrb[143].mxu1  ;;  %v6447_v34 = vpop.eup %6446 }
0x4c2b   :  { %v4322_v53 = vadd.f32 1.0, %v6447_v34 }
0x4c2d   :  { %6448 = vrcp.f32 %v4322_v53 }
0x4c37   :  { %v6449_v42 = vpop.eup %6448 }
0x4c38   :  { %v4326_v52 = vmul.f32 %v6449_v42, %v7629_v39 }
0x4c9b   :  { %v4329_v30 = vpop.permute.xlu0 %4328 }
0x4c9c   :  { %v4331_v45 = vmul.f32 %v6449_v42, %v4329_v30 }
0x4c9e   :  { %4333 = vrot.lane.b32.xlu0 %v4331_v45, %s6562_s5 }
0x4d10   :  { %v4334_v20 = vpop.permute.xlu0 %4333 }
0x4d11   :  { %v7750_v38 = vadd.f32 %v4334_v20, %v4326_v52 }
0x4d13   :  { %6450 = vtanh.f32 %v7750_v38 }
0x4d1d   :  { %v6451_v24 = vpop.eup %6450 }
0x4d1e   :  { %4339 = vrot.lane.b32.xlu0 %v6451_v24, %s6561_s0 }
0x4d90   :  { %v4340_v12 = vpop.permute.xlu0 %4339 }
0x4d91   :  { %v4342_v54 = vmul.f32 %v6449_v42, %v4340_v12 }
0x4d93   :  { %v4343_v15 = vpack.c.bf16 %v4342_v54, %v4342_v54 }
0x4d95   :  { %4385 = vrot.lane.b32.xlu0 %v4343_v15, %s6562_s5 }
0x4e07   :  { %v7755_v47 = vpop.permute.xlu0 %4385 }
0x4e08   :  { %6085 = vmatmul.mubr.msk.bf16.vlgmr.msra.gmra.mrb[144].mxu0 %vm59_vm1, %v7755_v47 }
0x4e09   :  { %6097 = vmatpush3.bf16.msra.mxu0 %v7504_v62  ;;  %6100 = vmatprep.mubr.msk.bf16.mxu0 %vm6559_vm0, %v6558_v1 }
0x4e0a   :  { %6098 = vmatprep.subr.bf16.mxu0 %v6558_v1 }
0x4e0d   :  { %6099 = vmatpush3.bf16.msra.mxu0 %v7507_v58 }
0x4e0e   :  { %6112 = vmatprep.subr.mxu0 %v6558_v1 }
0x4edb   :  { %v4424_v39 = vpop.f32.mrb[144].mxu0 }
0x4edc   :  { %v4425_v21 = vadd.f32 %v4424_v39, %v4378_v27  ;;  %v6086_v55 = vpop.f32.mrb[145].mxu0 }
0x4edd   :  { %v4427_v49 = vpop.f32.mrb[146].mxu0 }
0x4ede   :  { %v4430_v56 = vadd.f32 %v4425_v21, %v7495_v9  ;;  %v6087_v61 = vpop.f32.mrb[147].mxu0 }
0x4ee0   :  { %6452 = vtanh.f32 %v4430_v56  ;;  %v5258_v31 = vmul.f32 -1.442695, %v4430_v56 }
0x4ee2   :  { %6454 = vpow2.f32 %v5258_v31 }
0x4eea   :  { %v6453_v50 = vpop.eup %6452 }
0x4eeb   :  { %4440 = vrot.lane.b32.xlu0 %v6453_v50, %s6561_s0 }
0x4eec   :  { %v6455_v10 = vpop.eup %6454 }
0x4eed   :  { %v4434_v7 = vadd.f32 1.0, %v6455_v10 }
0x4eef   :  { %6456 = vrcp.f32 %v4434_v7 }
0x4ef9   :  { %v6457_v23 = vpop.eup %6456 }
0x4efa   :  { %v4438_v33 = vmul.f32 %v6457_v23, %v7648_v29 }
0x4f5d   :  { %v4441_v63 = vpop.permute.xlu0 %4440 }
0x4f5e   :  { %v4443_v8 = vmul.f32 %v6457_v23, %v4441_v63 }
0x4f60   :  { %4445 = vrot.lane.b32.xlu0 %v4443_v8, %s6562_s5 }
0x4fd2   :  { %v4446_v40 = vpop.permute.xlu0 %4445 }
0x4fd3   :  { %v7769_v27 = vadd.f32 %v4446_v40, %v4438_v33 }
0x4fd5   :  { %6458 = vtanh.f32 %v7769_v27 }
0x4fdf   :  { %v6459_v9 = vpop.eup %6458 }
0x4fe0   :  { %4451 = vrot.lane.b32.xlu0 %v6459_v9, %s6561_s0 }
0x5052   :  { %v4452_v11 = vpop.permute.xlu0 %4451 }
0x5053   :  { %v4454_v19 = vmul.f32 %v6457_v23, %v4452_v11  ;;  %v4568_v23 = vmul.f32 %v7712_v46, %v7556_v57 }
0x5055   :  { %v4455_v51 = vpack.c.bf16 %v4454_v19, %v4454_v19 }
0x5057   :  { %4497 = vrot.lane.b32.xlu1 %v4455_v51, %s6562_s5 }
0x50c9   :  { %v7774_v32 = vpop.permute.xlu1 %4497 }
0x50ca   :  { %6101 = vmatmul.mubr.msk.bf16.vlgmr.msra.gmra.mrb[148].mxu0 %vm59_vm1, %v7774_v32 }
0x50cb   :  { %6114 = vmatprep.mubr.msk.f32.mxu0 %vm6559_vm0, %v6558_v1 }
0x519d   :  { %v4536_v29 = vpop.f32.mrb[148].mxu0 }
0x519e   :  { %v4537_v25 = vadd.f32 %v4536_v29, %v7745_v2  ;;  %v6102_v26 = vpop.f32.mrb[149].mxu0 }
0x519f   :  { %v4539_v37 = vpop.f32.mrb[150].mxu0 }
0x51a0   :  { %v4542_v18 = vadd.f32 %v4537_v25, %v7520_v5  ;;  %v6103_v34 = vpop.f32.mrb[151].mxu0 }
0x51a2   :  { %6460 = vtanh.f32 %v4542_v18  ;;  %v5261_v42 = vmul.f32 -1.442695, %v4542_v18 }
0x51a4   :  { %6462 = vpow2.f32 %v5261_v42 }
0x51ac   :  { %v6461_v53 = vpop.eup %6460 }
0x51ad   :  { %4552 = vrot.lane.b32.xlu0 %v6461_v53, %s6561_s0 }
0x51ae   :  { %v6463_v30 = vpop.eup %6462 }
0x51af   :  { %v4546_v45 = vadd.f32 1.0, %v6463_v30 }
0x51b1   :  { %6464 = vrcp.f32 %v4546_v45 }
0x51bb   :  { %v6465_v52 = vpop.eup %6464 }
0x51bc   :  { %v4550_v2 = vmul.f32 %v6465_v52, %v7664_v48 }
0x521f   :  { %v4553_v20 = vpop.permute.xlu0 %4552 }
0x5220   :  { %v4555_v24 = vmul.f32 %v6465_v52, %v4553_v20 }
0x5222   :  { %4557 = vrot.lane.b32.xlu0 %v4555_v24, %s6562_s5 }
0x5294   :  { %v4558_v12 = vpop.permute.xlu0 %4557 }
0x5295   :  { %v7785_v54 = vadd.f32 %v4558_v12, %v4550_v2 }
0x5297   :  { %6466 = vtanh.f32 %v7785_v54 }
0x52a1   :  { %v6467_v5 = vpop.eup %6466 }
0x52a2   :  { %4563 = vrot.lane.b32.xlu0 %v6467_v5, %s6561_s0 }
0x5314   :  { %v4564_v15 = vpop.permute.xlu0 %4563 }
0x5315   :  { %v4566_v39 = vmul.f32 %v6465_v52, %v4564_v15 }
0x5317   :  { %v4582_v21 = vpack.c.bf16 %v4566_v39, %v4566_v39  ;;  %v4567_v9 = vmul.f32 %v4566_v39, %v7566_v3 }
0x5319   :  { %4584 = vrot.lane.b32.xlu0 %v4582_v21, %s6562_s5 }
0x538b   :  { %v7790_v55 = vpop.permute.xlu0 %4584 }
0x538c   :  { %6109 = vmatmul.mubr.msk.bf16.vlgmr.msra.gmra.mrb[144].mxu1 %vm59_vm1, %v7790_v55 }
0x538d   :  { %6118 = vmatpush3.bf16.msra.mxu1 %v7406_v60  ;;  %6119 = vmatprep.mubr.msk.bf16.mxu1 %vm6559_vm0, %v6558_v1  ;;  %v6501_v60 = vld [vmem:[%s7910_s3 + $0x48] sm:$0x1] }
0x538e   :  { %6131 = vmatprep.subr.bf16.mxu1 %v6558_v1 }
0x545f   :  { %v4623_v48 = vpop.f32.mrb[144].mxu1 }
0x5460   :  { %v4632_v49 = vrot.slane %v4623_v48, %v7378_v6  ;;  %v6110_v56 = vpop.f32.mrb[145].mxu1 }
0x5461   :  { %v4626_v61 = vpop.f32.mrb[146].mxu1 }
0x5462   :  { %v4633_v50 = vadd.f32 %v4632_v49, %v7384_v44  ;;  %v6111_v31 = vpop.f32.mrb[147].mxu1 }
0x5464   :  { %6468 = vtanh.f32 %v4633_v50 }
0x546e   :  { %v6469_v10 = vpop.eup %6468 }
0x546f   :  { %6113 = vmatpush3.xpose.msk.msra.mxu0 %vm59_vm1, %v6469_v10 }
0x5470   :  { %6123 = vmatprep.subr.bf16.mxu0 %v6558_v1 }
0x5472   :  { %6115 = vmatmul.mubr.msk.f32.vlgmr.msra.gmra.mrb[134].mxu0 %vm59_vm1, %v6501_v60 }
0x5473   :  { %6124 = vmatpush3.bf16.msra.mxu0 %v7401_v14  ;;  %6127 = vmatprep.mubr.msk.bf16.mxu0 %vm6559_vm0, %v6558_v1 }
0x5474   :  { %6125 = vmatprep.subr.bf16.mxu0 %v6558_v1 }
0x5477   :  { %6126 = vmatpush3.bf16.msra.mxu0 %v7425_v13 }
0x5478   :  { %6139 = vmatprep.subr.bf16.mxu0 %v6558_v1 }
0x5545   :  { %v4704_v6 = vpop.f32.mrb[134].mxu0 }
0x5546   :  { %v4708_v44 = vsel %vm3035_vm9, %v4704_v6, -inf  ;;  %v6116_v7 = vpop.f32.mrb[135].mxu0 }
0x5547   :  { %4709 = vmax.xlane.f32.xlu0 %v4708_v44 }
0x555d   :  { %4570 = vrot.lane.b32.xlu0 %v4568_v23, %s6563_s29 }
0x55d4   :  { %v4710_v14 = vpop.xlane.xlu0 %4709 }
0x55d5   :  { %v4711_v63 = vsub.f32 %v4704_v6, %v4710_v14 }
0x55d7   :  { %v4712_v8 = vmul.f32 1.442695, %v4711_v63 }
0x55d8   :  { %v4571_v13 = vpop.permute.xlu0 %4570 }
0x55d9   :  { %6470 = vpow2.f32 %v4712_v8  ;;  %v4573_v11 = vadd.f32 %v4571_v13, %v4567_v9 }
0x55e3   :  { %v6471_v33 = vpop.eup %6470 }
0x55e4   :  { %v4714_v40 = vsel %vm3035_vm9, %v6471_v33, 0.0 }
0x55e5   :  { %4715 = vadd.xlane.f32.xlu1 %v4714_v40 }
0x55f6   :  { %4575 = vrot.lane.b32.xlu1 %v4573_v11, %s6562_s5 }
0x5672   :  { %v4716_v19 = vpop.xlane.xlu1 %4715 }
0x5673   :  { %6472 = vrcp.f32 %v4716_v19  ;;  %v6504_v19 = vld [vmem:[#allocation3 + $0x150] sm:$0x1] }
0x5676   :  { %v4576_v51 = vpop.permute.xlu1 %4575 }
0x5677   :  { %v4578_v57 = vsel %vm3503_vm11, %v4576_v51, 0.0 }
0x5678   :  { %4579 = vadd.xlane.f32.xlu0 %v4578_v57 }
0x567d   :  { %v6473_v46 = vpop.eup %6472 }
0x567e   :  { %v4718_v29 = vmul.f32 %v6473_v46, %v6471_v33 }
0x5680   :  { %v4719_v25 = vpack.c.bf16 %v4718_v29, %v4718_v29 }
0x5682   :  { %6120 = vmatmul.mubr.msk.bf16.vlgmr.msra.gmra.mrb[148].mxu1 %vm3051_vm10, %v4719_v25 }
0x5683   :  { %6132 = vmatpush3.bf16.msra.mxu1 %v7410_v4  ;;  %6135 = vmatprep.mubr.msk.bf16.mxu1 %vm6559_vm0, %v6558_v1 }
0x5684   :  { %6133 = vmatprep.subr.bf16.mxu1 %v6558_v1 }
0x5687   :  { %6134 = vmatpush3.bf16.msra.mxu1 %v7414_v17 }
0x5688   :  { %6147 = vmatprep.subr.bf16.mxu1 %v6558_v1 }
0x568a   :  { %6136 = vmatmul.mubr.msk.bf16.vlgmr.msra.gmra.mrb[152].mxu1 %vm59_vm1, %v7755_v47 }
0x568b   :  { %6148 = vmatpush3.bf16.msra.mxu1 %v7479_v16  ;;  %6151 = vmatprep.mubr.msk.bf16.mxu1 %vm6559_vm0, %v6558_v1 }
0x568c   :  { %6149 = vmatprep.subr.bf16.mxu1 %v6558_v1 }
0x568f   :  { %6150 = vmatpush3.bf16.msra.mxu1 %v7482_v36 }
0x5690   :  { %6163 = vmatprep.subr.bf16.mxu1 %v6558_v1 }
0x5705   :  { %v4580_v4 = vpop.xlane.xlu0 %4579 }
0x5706   :  { %v7836_v26 = vadd.f32 %v4580_v4, %v7616_v0 }
0x5708   :  { %4765 = vperm.xlu1 %6185, %v7836_v26  }
0x5755   :  { %v7839_v17 = vpop.f32.mrb[148].mxu1 }
0x5756   :  { %v4769_v16 = vpack.c.bf16 %v7839_v17, %v7839_v17  ;;  %v6121_v47 = vpop.f32.mrb[149].mxu1 }
0x5757   :  { %v4760_v37 = vpop.f32.mrb[150].mxu1 }
0x5758   :  { %v6122_v18 = vpop.f32.mrb[151].mxu1  ;;  %6128 = vmatmul.mubr.msk.bf16.vlgmr.msra.gmra.mrb[152].mxu0 %vm59_vm1, %v4769_v16 }
0x5759   :  { %6140 = vmatpush3.bf16.msra.mxu0 %v7431_v28  ;;  %6143 = vmatprep.mubr.msk.bf16.mxu0 %vm6559_vm0, %v6558_v1 }
0x575a   :  { %6141 = vmatprep.subr.bf16.mxu0 %v6558_v1 }
0x575d   :  { %v4848_v36 = vpop.f32.mrb[152].mxu1  ;;  %6142 = vmatpush3.bf16.msra.mxu0 %v7437_v22  ;;  %v6502_v22 = vld [vmem:[#allocation3 + $0xc0] sm:$0x1] }
0x575e   :  { %v6137_v34 = vpop.f32.mrb[153].mxu1  ;;  %6155 = vmatprep.subr.bf16.mxu0 %v6558_v1 }
0x575f   :  { %v4851_v53 = vpop.f32.mrb[154].mxu1 }
0x5760   :  { %v6138_v42 = vpop.f32.mrb[155].mxu1  ;;  %6144 = vmatmul.mubr.msk.bf16.vlgmr.msra.gmra.mrb[156].mxu0 %vm59_vm1, %v7774_v32 }
0x5761   :  { %6156 = vmatpush3.bf16.msra.mxu0 %v7443_v35  ;;  %6159 = vmatprep.mubr.msk.bf16.mxu0 %vm6559_vm0, %v6558_v1  ;;  %v6503_v35 = vld [vmem:[#allocation3 + $0xc8] sm:$0x1] }
0x5762   :  { %6157 = vmatprep.subr.bf16.mxu0 %v6558_v1 }
0x5765   :  { %6158 = vmatpush3.bf16.msra.mxu0 %v7449_v43 }
0x5768   :  { %6160 = vmatmul.mubr.msk.bf16.vlgmr.msra.gmra.mrb[160].mxu0 %vm59_vm1, %v7790_v55 }
0x5787   :  { %v4766_v28 = vpop.permute.xlu1 %4765 }
0x5788   :  { %v4768_v30 = vmul.f32 %v6502_v22, %v4766_v28 }
0x582b   :  { %v4807_v45 = vpop.f32.mrb[152].mxu0 }
0x582c   :  { %v4813_v52 = vadd.f32 %v4807_v45, %v4768_v30  ;;  %v6129_v20 = vpop.f32.mrb[153].mxu0  ;;  %v6505_v45 = vld [vmem:[#allocation3 + $0x198] sm:$0x1] }
0x582d   :  { %v4810_v24 = vpop.f32.mrb[154].mxu0 }
0x582e   :  { %v4854_v32 = vadd.f32 %v4848_v36, %v4813_v52  ;;  %v6130_v2 = vpop.f32.mrb[155].mxu0 }
0x5830   :  { %v4855_v12 = vadd.f32 %v6503_v35, %v4854_v32 }
0x5832   :  { %6474 = vtanh.f32 %v4855_v12  ;;  %v5268_v61 = vmul.f32 -1.442695, %v4855_v12 }
0x5833   :  { %v4915_v5 = vpop.f32.mrb[156].mxu0 }
0x5834   :  { %v6145_v15 = vpop.f32.mrb[157].mxu0  ;;  %6476 = vpow2.f32 %v5268_v61 }
0x5835   :  { %v4918_v39 = vpop.f32.mrb[158].mxu0 }
0x5836   :  { %v6146_v21 = vpop.f32.mrb[159].mxu0 }
0x583b   :  { %v7859_v43 = vpop.f32.mrb[160].mxu0 }
0x583c   :  { %v6475_v48 = vpop.eup %6474  ;;  %v6161_v55 = vpop.f32.mrb[161].mxu0 }
0x583d   :  { %4865 = vrot.lane.b32.xlu1 %v6475_v48, %s6561_s0  ;;  %v5030_v49 = vpop.f32.mrb[162].mxu0 }
0x583e   :  { %v6162_v56 = vpop.f32.mrb[163].mxu0  ;;  %v6477_v50 = vpop.eup %6476 }
0x583f   :  { %v4859_v31 = vadd.f32 1.0, %v6477_v50 }
0x5841   :  { %6478 = vrcp.f32 %v4859_v31 }
0x584b   :  { %v6479_v10 = vpop.eup %6478 }
0x584c   :  { %v4863_v44 = vmul.f32 %v6479_v10, %v7750_v38 }
0x58af   :  { %v4866_v60 = vpop.permute.xlu1 %4865 }
0x58b0   :  { %v4868_v6 = vmul.f32 %v6479_v10, %v4866_v60 }
0x58b2   :  { %4870 = vrot.lane.b32.xlu1 %v4868_v6, %s6562_s5 }
0x5924   :  { %v4871_v7 = vpop.permute.xlu1 %4870 }
0x5925   :  { %v4873_v23 = vadd.f32 %v4871_v7, %v4863_v44 }
0x5927   :  { %6480 = vtanh.f32 %v4873_v23 }
0x5931   :  { %v6481_v14 = vpop.eup %6480 }
0x5932   :  { %4876 = vrot.lane.b32.xlu1 %v6481_v14, %s6561_s0 }
0x59a4   :  { %v4877_v63 = vpop.permute.xlu1 %4876 }
0x59a5   :  { %v4879_v8 = vmul.f32 %v6479_v10, %v4877_v63 }
0x59a7   :  { %v4880_v33 = vpack.c.bf16 %v4879_v8, %v4879_v8 }
0x59a9   :  { %4922 = vrot.lane.b32.xlu1 %v4880_v33, %s6562_s5 }
0x5a1b   :  { %v4923_v40 = vpop.permute.xlu1 %4922 }
0x5a1c   :  { %6152 = vmatmul.mubr.msk.bf16.vlgmr.msra.gmra.mrb[156].mxu1 %vm59_vm1, %v4923_v40 }
0x5a1d   :  { %6164 = vmatpush3.bf16.msra.mxu1 %v7504_v62  ;;  %6167 = vmatprep.mubr.msk.bf16.mxu1 %vm6559_vm0, %v6558_v1 }
0x5a1e   :  { %6165 = vmatprep.subr.bf16.mxu1 %v6558_v1 }
0x5a21   :  { %6166 = vmatpush3.bf16.msra.mxu1 %v7507_v58 }
0x5aef   :  { %v4961_v38 = vpop.f32.mrb[156].mxu1 }
0x5af0   :  { %v4962_v13 = vadd.f32 %v4961_v38, %v4915_v5  ;;  %v6153_v9 = vpop.f32.mrb[157].mxu1 }
0x5af1   :  { %v4964_v11 = vpop.f32.mrb[158].mxu1 }
0x5af2   :  { %v4967_v51 = vadd.f32 %v6504_v19, %v4962_v13  ;;  %v6154_v57 = vpop.f32.mrb[159].mxu1 }
0x5af4   :  { %6482 = vtanh.f32 %v4967_v51  ;;  %v5271_v29 = vmul.f32 -1.442695, %v4967_v51 }
0x5af6   :  { %6484 = vpow2.f32 %v5271_v29 }
0x5afe   :  { %v6483_v46 = vpop.eup %6482 }
0x5aff   :  { %4977 = vrot.lane.b32.xlu1 %v6483_v46, %s6561_s0 }
0x5b00   :  { %v6485_v62 = vpop.eup %6484 }
0x5b01   :  { %v4971_v25 = vadd.f32 1.0, %v6485_v62 }
0x5b03   :  { %6486 = vrcp.f32 %v4971_v25 }
0x5b0d   :  { %v6487_v4 = vpop.eup %6486 }
0x5b0e   :  { %v4975_v58 = vmul.f32 %v6487_v4, %v7769_v27 }
0x5b71   :  { %v4978_v1 = vpop.permute.xlu1 %4977 }
0x5b72   :  { %v4980_v16 = vmul.f32 %v6487_v4, %v4978_v1 }
0x5b74   :  { %4982 = vrot.lane.b32.xlu1 %v4980_v16, %s6562_s5 }
0x5be6   :  { %v4983_v47 = vpop.permute.xlu1 %4982 }
0x5be7   :  { %v4985_v37 = vadd.f32 %v4983_v47, %v4975_v58 }
0x5be9   :  { %6488 = vtanh.f32 %v4985_v37 }
0x5bf3   :  { %v6489_v18 = vpop.eup %6488 }
0x5bf4   :  { %4988 = vrot.lane.b32.xlu1 %v6489_v18, %s6561_s0 }
0x5c66   :  { %v4989_v36 = vpop.permute.xlu1 %4988 }
0x5c67   :  { %v4991_v34 = vmul.f32 %v6487_v4, %v4989_v36 }
0x5c69   :  { %v4992_v53 = vpack.c.bf16 %v4991_v34, %v4991_v34 }
0x5c6b   :  { %5034 = vrot.lane.b32.xlu0 %v4992_v53, %s6562_s5 }
0x5c6f   :  { %5119 = vrot.lane.b32.xlu0 %v7740_v59, %s6564_s10 }
0x5c73   :  { %5122 = vrot.lane.b32.xlu0 %v7836_v26, %s6565_s11 }
0x5cdd   :  { %v5035_v42 = vpop.permute.xlu0 %5034 }
0x5cde   :  { %6168 = vmatmul.mubr.msk.bf16.vlgmr.msra.gmra.mrb[160].mxu1 %vm59_vm1, %v5035_v42 }
0x5db1   :  { %v5073_v27 = vpop.f32.mrb[160].mxu1 }
0x5db2   :  { %v5074_v28 = vadd.f32 %v5073_v27, %v7859_v43  ;;  %v6169_v22 = vpop.f32.mrb[161].mxu1  ;;  %v6506_v43 = vld [vmem:[%s7910_s3 + $0x58] sm:$0x1]  ;;  %s6566_s3 = smov 3  }
0x5db3   :  { %v5076_v30 = vpop.f32.mrb[162].mxu1  ;;  %v5105_v48 = vmul.f32 %v6506_v43, %v7839_v17  ;;  %v5120_v17 = vpop.permute.xlu0 %5119 }
0x5db4   :  { %v5079_v52 = vadd.f32 %v6505_v45, %v5074_v28  ;;  %v6170_v20 = vpop.f32.mrb[163].mxu1 }
0x5db6   :  { %6490 = vtanh.f32 %v5079_v52  ;;  %v5274_v32 = vmul.f32 -1.442695, %v5079_v52 }
0x5db7   :  { %v5123_v6 = vpop.permute.xlu0 %5122 }
0x5db8   :  { %6492 = vpow2.f32 %v5274_v32 }
0x5dc0   :  { %v6491_v24 = vpop.eup %6490 }
0x5dc1   :  { %5089 = vrot.lane.b32.xlu1 %v6491_v24, %s6561_s0 }
0x5dc2   :  { %v6493_v59 = vpop.eup %6492 }
0x5dc3   :  { %v5083_v2 = vadd.f32 1.0, %v6493_v59 }
0x5dc5   :  { %6494 = vrcp.f32 %v5083_v2 }
0x5dcf   :  { %v6495_v26 = vpop.eup %6494 }
0x5dd0   :  { %v5087_v5 = vmul.f32 %v6495_v26, %v7785_v54 }
0x5e33   :  { %v5090_v35 = vpop.permute.xlu1 %5089 }
0x5e34   :  { %v5092_v12 = vmul.f32 %v6495_v26, %v5090_v35 }
0x5e36   :  { %5094 = vrot.lane.b32.xlu1 %v5092_v12, %s6562_s5 }
0x5ea8   :  { %v5095_v15 = vpop.permute.xlu1 %5094 }
0x5ea9   :  { %v5097_v39 = vadd.f32 %v5095_v15, %v5087_v5 }
0x5eab   :  { %6496 = vtanh.f32 %v5097_v39 }
0x5eb5   :  { %v6497_v21 = vpop.eup %6496 }
0x5eb6   :  { %5100 = vrot.lane.b32.xlu1 %v6497_v21, %s6561_s0  ;;  %s6567_s0 = smov [#allocation6]  }
0x5eb7   :  { %s5143_s14 = sshll.u32 %s6567_s0, 4  ;;  %s5144_s14 = int_to_ptr.vmem [resolvable:$true] %s5143_s14 }
0x5eb8   :  { %s6533_s15 = scalar_lea.vmem %s5144_s14, 32  ;;  %p6534_p9 = scmp.lt.s32.totalorder %s5144_s14, %s5144_s14 }
0x5eba   :  { %5107 = vrot.lane.b32.xlu1 %v5105_v48, %s6563_s29 }
0x5f28   :  { %v5101_v55 = vpop.permute.xlu1 %5100 }
0x5f29   :  { %v5103_v49 = vmul.f32 %v6495_v26, %v5101_v55 }
0x5f2b   :  { %v5104_v56 = vmul.f32 %v5103_v49, %v7566_v3  ;;  %v5130_v3 = vsel %vm5129_vm12, %v7619_v41, %v5120_v17 }
0x5f2c   :  { %v5108_v61 = vpop.permute.xlu1 %5107  ;;  %v5132_v44 = vsel %vm5131_vm13, %v5130_v3, %v5123_v6 }
0x5f2d   :  { %v5110_v54 = vadd.f32 %v5108_v61, %v5104_v56 }
0x5f2f   :  { %5112 = vrot.lane.b32.xlu1 %v5110_v54, %s6562_s5  ;;  %s6529_s5 = scalar_lea.vmem %s5144_s14, 16 }
0x5f30   :  { %p6530_p8 = scmp.ne.s32.totalorder %s5144_s14, %s6529_s5  ;;  %p6535_p10 = scmp.lt.s32.totalorder %s6533_s15, %s6529_s5 }
0x5f32   :  { %p6536_p11 = por %p6535_p10, %p6534_p9 }
0x5f34   :  { %p6537_p12 = pnand %p6536_p11, %p6530_p8 }
0x5fa1   :  { %v5113_v50 = vpop.permute.xlu1 %5112 }
0x5fa2   :  { %v5115_v31 = vsel %vm3503_vm11, %v5113_v50, 0.0 }
0x5fa3   :  { %5116 = vadd.xlane.f32.xlu1 %v5115_v31 }
0x6030   :  { %v5117_v10 = vpop.xlane.xlu1 %5116 }
0x6031   :  { %v5118_v60 = vadd.f32 %v5117_v10, %v7616_v0 }
0x6033   :  { %5126 = vrot.lane.b32.xlu0 %v5118_v60, %s6566_s3 }
0x60a5   :  { %v5127_v7 = vpop.permute.xlu0 %5126 }
0x60a6   :  { %v5134_v23 = vsel %vm5133_vm14, %v5132_v44, %v5127_v7 }
0x60a7   :  { %5136 = vst.msk [vmem:[#allocation6] sm:$0x1] %vm5135_vm15, %v5134_v23 }
0x60a8   :  { %6540 = shalt.err (!%p6537_p12)
}
0x60a9   :  { %s6541_s18 = scalar_lea.hbm %s7911_s4, 16 }
0x60aa   :  { %p6542_p13 = scmp.ne.s32.totalorder %s7911_s4, %s6541_s18  ;;  %p6545_p0 = scmp.lt.u32.totalorder %s6541_s18, %s7911_s4 }
0x60ac   :  { %p6547_p1 = pnand %p6545_p0, %p6542_p13 }
0x60ae   :  { %6550 = shalt.err (!%p6547_p1)
}
0x60af   :  { %5146 = dma.vmem_to_hbm [thread:$0]  %s5144_s14, 16, %s7911_s4, [#allocation5]  }
0x60b0   :  { %6553 = dma.done.wait [#allocation5], 16  }
0x60b1   :  { %6554 = vsyncadd [#allocation5], 4294967280 }
0x60b2   :  { %5150 = vsyncpa [#allocation4], 1 }
0x60b3   :  { %5151 = vsyncpa [#allocation5], 1 }

</bundles_post_ra>
